<compile_context>
chip_gen: v7x
topology: tpu7x:2x2x1
jax: 0.10.0
libtpu: 0.0.40
codegen_flags: <defaults>
</compile_context>

<pallas_src>
import functools
import math

import jax
import jax.numpy as jnp
import numpy as np
from jax.experimental import pallas as pl
from jax.experimental.pallas import tpu as pltpu

_EPS = 1e-5    # nn.InstanceNorm2d default eps (affine=False, biased variance)
_LPAD = 128    # conv1 image starts on a lane-tile boundary


def _round_up(x, m):
    return (x + m - 1) // m * m


# ----------------------------- host-side tables ------------------------------
def _cubic_weight(d, a=-0.75):
    d = np.abs(np.asarray(d, np.float64))
    return np.where(
        d <= 1.0, ((a + 2.0) * d - (a + 3.0)) * d * d + 1.0,
        np.where(d < 2.0, (((d - 5.0) * d + 8.0) * d - 4.0) * a, 0.0))


def _bicubic_matrix(in_size, out_size, align_corners):
    """(out_size, in_size) 1-D bicubic interpolation matrix, PyTorch semantics."""
    out_idx = np.arange(out_size, dtype=np.float64)
    if align_corners:
        scale = (in_size - 1) / (out_size - 1) if out_size > 1 else 0.0
        src = out_idx * scale
    else:
        src = (out_idx + 0.5) * (in_size / out_size) - 0.5
    base = np.floor(src).astype(np.int64)
    t = src - base
    m = np.zeros((out_size, in_size), np.float64)
    for o in range(out_size):
        for tap in (-1, 0, 1, 2):
            idx = int(np.clip(base[o] + tap, 0, in_size - 1))  # clamped access
            m[o, idx] += float(_cubic_weight(tap - t[o]))
    return m


def _dx_masks(H, W):
    """(3, H*W) masks: row dx+1 zeroes columns whose w+dx falls outside [0, W)."""
    w = np.tile(np.arange(W), H)
    return np.stack([(w >= 1), np.ones(H * W, bool), (w <= W - 2)]).astype(np.float32)


# ------------------------------ in-kernel math --------------------------------
def _erf(x):
    # Abramowitz & Stegun 7.1.26 (|err| < 1.5e-7); abs/exp/mul/add/select + one
    # divide.  (The divide could go to the EUP via pl.reciprocal(approx=True);
    # kept exact for portability - it is off the MXU critical path either way.)
    sign = jnp.where(x >= 0.0, 1.0, -1.0)
    ax = jnp.abs(x)
    t = 1.0 / (1.0 + 0.3275911 * ax)
    poly = t * (0.254829592 + t * (-0.284496736 + t * (1.421413741
           + t * (-1.453152027 + t * 1.061405429))))
    return sign * (1.0 - poly * jnp.exp(-ax * ax))


def _gelu(x):
    # matches torch.nn.GELU(approximate='none') up to the erf approximation
    return 0.5 * x * (1.0 + _erf(x * (1.0 / math.sqrt(2.0))))


def _instance_norm(y):
    # per-channel over the flattened spatial axis, biased variance, two-pass
    mean = jnp.mean(y, axis=-1, keepdims=True)
    c = y - mean
    var = jnp.mean(c * c, axis=-1, keepdims=True)
    return c * jax.lax.rsqrt(var + _EPS)


def _conv3x3(x_bf, w_ref, b_ref, dx_mask, W, HW, off):
    """3x3 'same' conv as ONE MXU matmul over stacked lane-shifted windows.

    x_bf:    (C_in, X) bf16; image at lanes [off, off+HW), >= W+1 zero lanes on
             both sides of it.
    w_ref:   Ref (C_out, 9*C_in) bf16, tap-major (k = (dy+1)*3 + (dx+1))
    b_ref:   Ref (C_out, 1) f32
    dx_mask: (3, HW) bf16 (exact 0/1), kills row wrap-around for dx != 0
    """
    wins = []
    for dy in (-1, 0, 1):
        for dx in (-1, 0, 1):
            d = dy * W + dx
            win = x_bf[:, off + d:off + d + HW]            # (C_in, HW) bf16
            if dx != 0:
                win = win * dx_mask[dx + 1:dx + 2, :]
            wins.append(win)
    stacked = jnp.concatenate(wins, axis=0)                # (9*C_in, HW) bf16
    return jnp.dot(w_ref[...], stacked,
                   preferred_element_type=jnp.float32) + b_ref[...]


# ---------------------------------- kernel ------------------------------------
def _fused_kernel(x_ref, w1_ref, b1_ref, w2_ref, b2_ref, u1_ref, ur_ref,
                  m1_ref, m2_ref, *rest, W, HW, C_in, C_out, pad_residual):
    if pad_residual:
        (o_ref,) = rest
        wm_ref = bm_ref = None
    else:
        wm_ref, bm_ref, o_ref = rest

    W2, HW2 = 2 * W, 4 * HW
    pad2 = W2 + 1

    xe = x_ref[0]            # (C_in, X1) bf16, zero-flanked, image at lane _LPAD
    m1 = m1_ref[...]         # (3, HW)  bf16
    m2 = m2_ref[...]         # (3, HW2) bf16

    # conv1 -> GELU -> InstanceNorm                         (at H x W)
    y1 = _instance_norm(_gelu(_conv3x3(xe, w1_ref, b1_ref, m1, W, HW, _LPAD)))

    # bicubic x2 (align_corners=False): one bf16 MXU matmul whose RHS already
    # carries conv2's zero flank columns and 128-lane padding.
    y1u = jnp.dot(y1.astype(jnp.bfloat16), u1_ref[...],
                  preferred_element_type=jnp.float32).astype(jnp.bfloat16)

    # conv2 -> GELU -> InstanceNorm                         (at 2H x 2W)
    y2 = _instance_norm(_gelu(_conv3x3(y1u, w2_ref, b2_ref, m2, W2, HW2, pad2)))

    # residual branch: bicubic x2 of input (align_corners=True); aligned view.
    x0 = xe[:, _LPAD:_LPAD + HW]                                        # (C_in, HW)
    res = jnp.dot(x0, ur_ref[...], preferred_element_type=jnp.float32)  # (C_in, HW2)

    if pad_residual:
        # channel zero-pad: append zero rows so the epilogue is one dense store
        res = jnp.concatenate(
            [res, jnp.zeros((C_out - C_in, HW2), jnp.float32)], axis=0)
    else:
        # lazy 1x1 channel_mixing conv
        res = jnp.dot(wm_ref[...], res.astype(jnp.bfloat16),
                      preferred_element_type=jnp.float32) + bm_ref[...]

    o_ref[0] = (y2 + res).astype(o_ref.dtype)   # single dense (C_out, HW2) store


# --------------------------------- wrapper ------------------------------------
def init_params(key, in_channels, out_channels):
    """PyTorch-style uniform init; lazy channel_mixing created eagerly if needed."""
    k1, k2, k3, k4, k5, k6 = jax.random.split(key, 6)

    def conv_init(kw, kb, c_out, c_in, ksz):
        fan_in = c_in * ksz * ksz
        bound = 1.0 / math.sqrt(fan_in)
        w = jax.random.uniform(kw, (c_out, c_in, ksz, ksz), jnp.float32, -bound, bound)
        b = jax.random.uniform(kb, (c_out,), jnp.float32, -bound, bound)
        return w, b

    w1, b1 = conv_init(k1, k2, out_channels, in_channels, 3)
    w2, b2 = conv_init(k3, k4, out_channels, out_channels, 3)
    params = dict(w1=w1, b1=b1, w2=w2, b2=b2)
    if out_channels <= in_channels:
        wm, bm = conv_init(k5, k6, out_channels, in_channels, 1)
        params["wm"], params["bm"] = wm, bm
    return params


def residual_upscale_conv_block(params, x):
    """x: (N, C_in, H, W) f32 -> (N, C_out, 2H, 2W) f32."""
    N, C_in, H, W = x.shape
    C_out = params["w1"].shape[0]
    H2, W2 = 2 * H, 2 * W
    HW, HW2 = H * W, H2 * W2
    pad1, pad2 = W + 1, W2 + 1
    X1 = _round_up(_LPAD + HW + pad1, 128)      # conv1 input lane width
    X2 = _round_up(HW2 + 2 * pad2, 128)         # conv2 input lane width
    pad_residual = C_out > C_in

    # conv weights -> tap-major (C_out, 9*C_in) bf16: ONE MXU matmul per conv
    w1f = jnp.transpose(params["w1"], (0, 2, 3, 1)).reshape(C_out, 9 * C_in).astype(jnp.bfloat16)
    w2f = jnp.transpose(params["w2"], (0, 2, 3, 1)).reshape(C_out, 9 * C_out).astype(jnp.bfloat16)
    b1 = params["b1"].reshape(C_out, 1).astype(jnp.float32)
    b2 = params["b2"].reshape(C_out, 1).astype(jnp.float32)

    # Bicubic interpolation matrices (PyTorch semantics), built at trace time.
    # NOTE: dense Kronecker form is O((H*W)^2) -- at much larger H*W switch to
    # separable 1-D bicubic matmuls and set vmem_limit_bytes explicitly.
    u1 = np.kron(_bicubic_matrix(H, H2, False), _bicubic_matrix(W, W2, False)).T
    u1_ext = np.zeros((HW, X2), np.float64)
    u1_ext[:, pad2:pad2 + HW2] = u1             # fold conv2's zero flanks + lane pad in
    ur = np.kron(_bicubic_matrix(H, H2, True), _bicubic_matrix(W, W2, True)).T

    u1_ext = jnp.asarray(u1_ext, jnp.bfloat16)  # (HW, X2)
    ur = jnp.asarray(ur, jnp.bfloat16)          # (HW, HW2)
    m1 = jnp.asarray(_dx_masks(H, W), jnp.bfloat16)     # (3, HW)
    m2 = jnp.asarray(_dx_masks(H2, W2), jnp.bfloat16)   # (3, HW2)

    # Input: flatten spatial dims; zero-flank so the image starts at lane 128
    # (aligned residual view) with >= W+1 zero lanes on both sides; bf16 once
    # host-side (halves the x DMA, no in-kernel cast).
    x_flat = x.reshape(N, C_in, HW).astype(jnp.float32)
    x_ext = jnp.pad(x_flat, ((0, 0), (0, 0), (_LPAD, X1 - _LPAD - HW))).astype(jnp.bfloat16)

    args = [x_ext, w1f, b1, w2f, b2, u1_ext, ur, m1, m2]
    in_specs = [
        pl.BlockSpec((1, C_in, X1), lambda n: (n, 0, 0)),
        pl.BlockSpec((C_out, 9 * C_in), lambda n: (0, 0)),
        pl.BlockSpec((C_out, 1), lambda n: (0, 0)),
        pl.BlockSpec((C_out, 9 * C_out), lambda n: (0, 0)),
        pl.BlockSpec((C_out, 1), lambda n: (0, 0)),
        pl.BlockSpec((HW, X2), lambda n: (0, 0)),
        pl.BlockSpec((HW, HW2), lambda n: (0, 0)),
        pl.BlockSpec((3, HW), lambda n: (0, 0)),
        pl.BlockSpec((3, HW2), lambda n: (0, 0)),
    ]
    if not pad_residual:
        args += [params["wm"].reshape(C_out, C_in).astype(jnp.bfloat16),
                 params["bm"].reshape(C_out, 1).astype(jnp.float32)]
        in_specs += [pl.BlockSpec((C_out, C_in), lambda n: (0, 0)),
                     pl.BlockSpec((C_out, 1), lambda n: (0, 0))]

    kernel = functools.partial(_fused_kernel, W=W, HW=HW, C_in=C_in,
                               C_out=C_out, pad_residual=pad_residual)

    # grid=(N,) "parallel": both samples land on v7x's two TensorCores; on
    # single-core chips it is just a 2-step sequential loop (negligible here).
    out = pl.pallas_call(
        kernel,
        out_shape=jax.ShapeDtypeStruct((N, C_out, HW2), jnp.float32),
        grid=(N,),
        in_specs=in_specs,
        out_specs=pl.BlockSpec((1, C_out, HW2), lambda n: (n, 0, 0)),
        compiler_params=pltpu.CompilerParams(dimension_semantics=("parallel",)),
    )(*args)
    return out.reshape(N, C_out, H2, W2)


# ----------------------------- pure-JAX reference ------------------------------
def _reference(params, x):
    N, C_in, H, W = x.shape
    C_out = params["w1"].shape[0]

    def conv(v, w, b):
        y = jax.lax.conv_general_dilated(
            v, w, window_strides=(1, 1),
            padding=[(w.shape[2] // 2,) * 2, (w.shape[3] // 2,) * 2],
            dimension_numbers=("NCHW", "OIHW", "NCHW"),
            precision=jax.lax.Precision.HIGHEST)
        return y + b[None, :, None, None]

    def gelu(v):
        return 0.5 * v * (1.0 + jax.lax.erf(v / math.sqrt(2.0)))

    def inorm(v):
        m = jnp.mean(v, axis=(2, 3), keepdims=True)
        s = jnp.mean(jnp.square(v - m), axis=(2, 3), keepdims=True)
        return (v - m) * jax.lax.rsqrt(s + _EPS)

    def upsample2x(v, align_corners):
        ah = jnp.asarray(_bicubic_matrix(v.shape[2], 2 * v.shape[2], align_corners), jnp.float32)
        aw = jnp.asarray(_bicubic_matrix(v.shape[3], 2 * v.shape[3], align_corners), jnp.float32)
        return jnp.einsum("Hh,nchw,Ww->ncHW", ah, v, aw,
                          precision=jax.lax.Precision.HIGHEST)

    out = inorm(gelu(conv(x, params["w1"], params["b1"])))
    out = upsample2x(out, align_corners=False)     # F.interpolate(scale=2, bicubic)
    out = inorm(gelu(conv(out, params["w2"], params["b2"])))
    residual = upsample2x(x, align_corners=True)   # nn.Upsample(size=out[2:], bicubic, ac=True)
    if C_out > C_in:
        residual = jnp.pad(residual, ((0, 0), (0, C_out - C_in), (0, 0), (0, 0)))
    else:
        residual = (jnp.einsum("oc,nchw->nohw", params["wm"].reshape(C_out, C_in),
                               residual, precision=jax.lax.Precision.HIGHEST)
                    + params["bm"].reshape(1, C_out, 1, 1))
    return out + residual


if __name__ == "__main__":
    key = jax.random.PRNGKey(0)
    kx1, kx2, kp1, kp2 = jax.random.split(key, 4)
    fwd = jax.jit(residual_upscale_conv_block)

    def check(out, ref, name):
        # The kernel's convs / bicubic / 1x1 matmuls use bf16 operands with f32
        # accumulation and pass through two InstanceNorms, so it does not
        # bit-match the f32 reference: expected relative error ~0.5-1%.
        rel = float(jnp.sqrt(jnp.sum((out - ref) ** 2) / jnp.sum(ref ** 2)))
        mx = float(jnp.max(jnp.abs(out - ref)))
        assert rel < 4e-2, (name, rel)
        assert mx < 3e-1, (name, mx)

    # Case 1: out_channels > in_channels -> zero-padded residual channels.
    x1 = jax.random.normal(kx1, (2, 4, 16, 16), jnp.float32)
    params1 = init_params(kp1, in_channels=4, out_channels=8)
    out1 = jax.block_until_ready(fwd(params1, x1))
    assert out1.shape == (2, 8, 32, 32)
    check(out1, _reference(params1, x1), "pad_residual")

    # Case 2: out_channels == in_channels -> lazy 1x1 channel_mixing residual.
    x2 = jax.random.normal(kx2, (2, 8, 16, 16), jnp.float32)
    params2 = init_params(kp2, in_channels=8, out_channels=8)
    out2 = jax.block_until_ready(fwd(params2, x2))
    assert out2.shape == (2, 8, 32, 32)
    check(out2, _reference(params2, x2), "channel_mixing")

    print("KERNEL_OK")
</pallas_src>

<mosaic_0001>
module attributes {stable_mosaic.version = 11 : i64} {
  func.func @_fused_kernel(%arg0: i32, %arg1: memref<1x4x512xbf16, #tpu.memory_space<vmem>>, %arg2: memref<8x36xbf16, #tpu.memory_space<vmem>>, %arg3: memref<8x1xf32, #tpu.memory_space<vmem>>, %arg4: memref<8x72xbf16, #tpu.memory_space<vmem>>, %arg5: memref<8x1xf32, #tpu.memory_space<vmem>>, %arg6: memref<256x1152xbf16, #tpu.memory_space<vmem>>, %arg7: memref<256x1024xbf16, #tpu.memory_space<vmem>>, %arg8: memref<3x256xbf16, #tpu.memory_space<vmem>>, %arg9: memref<3x1024xbf16, #tpu.memory_space<vmem>>, %arg10: memref<1x8x1024xf32, #tpu.memory_space<vmem>>) attributes {dimension_semantics = [#tpu.dimension_semantics<parallel>], iteration_bounds = array<i64: 2>, scalar_prefetch = 0 : i64, scratch_operands = 0 : i64, tpu.core_type = #tpu.core_type<tc>, window_params = [{transform_indices = @transform_0, window_bounds = array<i64: 1, 4, 512>}, {pipeline_mode = #tpu.pipeline_mode<synchronous>, transform_indices = @transform_1, window_bounds = array<i64: 8, 36>}, {pipeline_mode = #tpu.pipeline_mode<synchronous>, transform_indices = @transform_2, window_bounds = array<i64: 8, 1>}, {pipeline_mode = #tpu.pipeline_mode<synchronous>, transform_indices = @transform_3, window_bounds = array<i64: 8, 72>}, {pipeline_mode = #tpu.pipeline_mode<synchronous>, transform_indices = @transform_4, window_bounds = array<i64: 8, 1>}, {pipeline_mode = #tpu.pipeline_mode<synchronous>, transform_indices = @transform_5, window_bounds = array<i64: 256, 1152>}, {pipeline_mode = #tpu.pipeline_mode<synchronous>, transform_indices = @transform_6, window_bounds = array<i64: 256, 1024>}, {pipeline_mode = #tpu.pipeline_mode<synchronous>, transform_indices = @transform_7, window_bounds = array<i64: 3, 256>}, {pipeline_mode = #tpu.pipeline_mode<synchronous>, transform_indices = @transform_8, window_bounds = array<i64: 3, 1024>}, {transform_indices = @transform_9, window_bounds = array<i64: 1, 8, 1024>}]} {
    %c0 = arith.constant 0 : index
    %c0_0 = arith.constant 0 : index
    %c0_1 = arith.constant 0 : index
    %0 = vector.load %arg1[%c0, %c0_0, %c0_1] : memref<1x4x512xbf16, #tpu.memory_space<vmem>>, vector<1x4x512xbf16>
    %1 = vector.shape_cast %0 : vector<1x4x512xbf16> to vector<4x512xbf16>
    %c0_2 = arith.constant 0 : index
    %c0_3 = arith.constant 0 : index
    %2 = vector.load %arg8[%c0_2, %c0_3] : memref<3x256xbf16, #tpu.memory_space<vmem>>, vector<3x256xbf16>
    %c0_4 = arith.constant 0 : index
    %c0_5 = arith.constant 0 : index
    %3 = vector.load %arg9[%c0_4, %c0_5] : memref<3x1024xbf16, #tpu.memory_space<vmem>>, vector<3x1024xbf16>
    %4 = vector.extract_strided_slice %1 {offsets = [0, 111], sizes = [4, 256], strides = [1, 1]} : vector<4x512xbf16> to vector<4x256xbf16>
    %5 = vector.extract_strided_slice %2 {offsets = [0, 0], sizes = [1, 256], strides = [1, 1]} : vector<3x256xbf16> to vector<1x256xbf16>
    %6 = vector.broadcast %5 : vector<1x256xbf16> to vector<4x256xbf16>
    %7 = arith.mulf %4, %6 : vector<4x256xbf16>
    %8 = vector.extract_strided_slice %1 {offsets = [0, 112], sizes = [4, 256], strides = [1, 1]} : vector<4x512xbf16> to vector<4x256xbf16>
    %9 = vector.extract_strided_slice %1 {offsets = [0, 113], sizes = [4, 256], strides = [1, 1]} : vector<4x512xbf16> to vector<4x256xbf16>
    %10 = vector.extract_strided_slice %2 {offsets = [2, 0], sizes = [1, 256], strides = [1, 1]} : vector<3x256xbf16> to vector<1x256xbf16>
    %11 = vector.broadcast %10 : vector<1x256xbf16> to vector<4x256xbf16>
    %12 = arith.mulf %9, %11 : vector<4x256xbf16>
    %13 = vector.extract_strided_slice %1 {offsets = [0, 127], sizes = [4, 256], strides = [1, 1]} : vector<4x512xbf16> to vector<4x256xbf16>
    %14 = vector.extract_strided_slice %2 {offsets = [0, 0], sizes = [1, 256], strides = [1, 1]} : vector<3x256xbf16> to vector<1x256xbf16>
    %15 = vector.broadcast %14 : vector<1x256xbf16> to vector<4x256xbf16>
    %16 = arith.mulf %13, %15 : vector<4x256xbf16>
    %17 = vector.extract_strided_slice %1 {offsets = [0, 128], sizes = [4, 256], strides = [1, 1]} : vector<4x512xbf16> to vector<4x256xbf16>
    %18 = vector.extract_strided_slice %1 {offsets = [0, 129], sizes = [4, 256], strides = [1, 1]} : vector<4x512xbf16> to vector<4x256xbf16>
    %19 = vector.extract_strided_slice %2 {offsets = [2, 0], sizes = [1, 256], strides = [1, 1]} : vector<3x256xbf16> to vector<1x256xbf16>
    %20 = vector.broadcast %19 : vector<1x256xbf16> to vector<4x256xbf16>
    %21 = arith.mulf %18, %20 : vector<4x256xbf16>
    %22 = vector.extract_strided_slice %1 {offsets = [0, 143], sizes = [4, 256], strides = [1, 1]} : vector<4x512xbf16> to vector<4x256xbf16>
    %23 = vector.extract_strided_slice %2 {offsets = [0, 0], sizes = [1, 256], strides = [1, 1]} : vector<3x256xbf16> to vector<1x256xbf16>
    %24 = vector.broadcast %23 : vector<1x256xbf16> to vector<4x256xbf16>
    %25 = arith.mulf %22, %24 : vector<4x256xbf16>
    %26 = vector.extract_strided_slice %1 {offsets = [0, 144], sizes = [4, 256], strides = [1, 1]} : vector<4x512xbf16> to vector<4x256xbf16>
    %27 = vector.extract_strided_slice %1 {offsets = [0, 145], sizes = [4, 256], strides = [1, 1]} : vector<4x512xbf16> to vector<4x256xbf16>
    %28 = vector.extract_strided_slice %2 {offsets = [2, 0], sizes = [1, 256], strides = [1, 1]} : vector<3x256xbf16> to vector<1x256xbf16>
    %29 = vector.broadcast %28 : vector<1x256xbf16> to vector<4x256xbf16>
    %30 = arith.mulf %27, %29 : vector<4x256xbf16>
    %31 = tpu.concatenate %7, %8, %12, %16, %17, %21, %25, %26, %30 in 0 : vector<4x256xbf16>, vector<4x256xbf16>, vector<4x256xbf16>, vector<4x256xbf16>, vector<4x256xbf16>, vector<4x256xbf16>, vector<4x256xbf16>, vector<4x256xbf16>, vector<4x256xbf16> -> vector<36x256xbf16>
    %c0_6 = arith.constant 0 : index
    %c0_7 = arith.constant 0 : index
    %32 = vector.load %arg2[%c0_6, %c0_7] : memref<8x36xbf16, #tpu.memory_space<vmem>>, vector<8x36xbf16>
    %cst = arith.constant dense<0.000000e+00> : vector<8x256xf32>
    %33 = tpu.matmul %32, %31, %cst {dimension_numbers = #tpu.dot_dimension_numbers<[1], [0], [0], [1], [0, 0, 1, 1], [], []>} : vector<8x36xbf16>, vector<36x256xbf16>, vector<8x256xf32> -> vector<8x256xf32>
    %c0_8 = arith.constant 0 : index
    %c0_9 = arith.constant 0 : index
    %34 = vector.load %arg3[%c0_8, %c0_9] : memref<8x1xf32, #tpu.memory_space<vmem>>, vector<8x1xf32>
    %35 = vector.broadcast %34 : vector<8x1xf32> to vector<8x256xf32>
    %36 = arith.addf %33, %35 : vector<8x256xf32>
    %cst_10 = arith.constant 5.000000e-01 : f32
    %37 = vector.broadcast %cst_10 : f32 to vector<8x256xf32>
    %38 = arith.mulf %37, %36 : vector<8x256xf32>
    %cst_11 = arith.constant 0.707106769 : f32
    %39 = vector.broadcast %cst_11 : f32 to vector<8x256xf32>
    %40 = arith.mulf %36, %39 : vector<8x256xf32>
    %cst_12 = arith.constant 0.000000e+00 : f32
    %41 = vector.broadcast %cst_12 : f32 to vector<8x256xf32>
    %42 = arith.cmpf oge, %40, %41 : vector<8x256xf32>
    %cst_13 = arith.constant 1.000000e+00 : f32
    %cst_14 = arith.constant -1.000000e+00 : f32
    %43 = vector.broadcast %cst_13 : f32 to vector<8x256xf32>
    %44 = vector.broadcast %cst_14 : f32 to vector<8x256xf32>
    %45 = arith.select %42, %43, %44 : vector<8x256xi1>, vector<8x256xf32>
    %46 = math.absf %40 : vector<8x256xf32>
    %cst_15 = arith.constant 0.327591091 : f32
    %47 = vector.broadcast %cst_15 : f32 to vector<8x256xf32>
    %48 = arith.mulf %47, %46 : vector<8x256xf32>
    %cst_16 = arith.constant 1.000000e+00 : f32
    %49 = vector.broadcast %cst_16 : f32 to vector<8x256xf32>
    %50 = arith.addf %49, %48 : vector<8x256xf32>
    %cst_17 = arith.constant 1.000000e+00 : f32
    %51 = vector.broadcast %cst_17 : f32 to vector<8x256xf32>
    %52 = arith.divf %51, %50 : vector<8x256xf32>
    %cst_18 = arith.constant 1.06140542 : f32
    %53 = vector.broadcast %cst_18 : f32 to vector<8x256xf32>
    %54 = arith.mulf %52, %53 : vector<8x256xf32>
    %cst_19 = arith.constant -1.45315206 : f32
    %55 = vector.broadcast %cst_19 : f32 to vector<8x256xf32>
    %56 = arith.addf %55, %54 : vector<8x256xf32>
    %57 = arith.mulf %52, %56 : vector<8x256xf32>
    %cst_20 = arith.constant 1.42141378 : f32
    %58 = vector.broadcast %cst_20 : f32 to vector<8x256xf32>
    %59 = arith.addf %58, %57 : vector<8x256xf32>
    %60 = arith.mulf %52, %59 : vector<8x256xf32>
    %cst_21 = arith.constant -0.284496725 : f32
    %61 = vector.broadcast %cst_21 : f32 to vector<8x256xf32>
    %62 = arith.addf %61, %60 : vector<8x256xf32>
    %63 = arith.mulf %52, %62 : vector<8x256xf32>
    %cst_22 = arith.constant 0.254829586 : f32
    %64 = vector.broadcast %cst_22 : f32 to vector<8x256xf32>
    %65 = arith.addf %64, %63 : vector<8x256xf32>
    %66 = arith.mulf %52, %65 : vector<8x256xf32>
    %cst_23 = arith.constant 0.000000e+00 : f32
    %67 = vector.broadcast %cst_23 : f32 to vector<8x256xf32>
    %68 = arith.subf %67, %46 : vector<8x256xf32>
    %69 = arith.mulf %68, %46 : vector<8x256xf32>
    %70 = math.exp %69 : vector<8x256xf32>
    %71 = arith.mulf %66, %70 : vector<8x256xf32>
    %cst_24 = arith.constant 1.000000e+00 : f32
    %72 = vector.broadcast %cst_24 : f32 to vector<8x256xf32>
    %73 = arith.subf %72, %71 : vector<8x256xf32>
    %74 = arith.mulf %45, %73 : vector<8x256xf32>
    %cst_25 = arith.constant 1.000000e+00 : f32
    %75 = vector.broadcast %cst_25 : f32 to vector<8x256xf32>
    %76 = arith.addf %75, %74 : vector<8x256xf32>
    %77 = arith.mulf %38, %76 : vector<8x256xf32>
    %cst_26 = arith.constant dense<0.000000e+00> : vector<8xf32>
    %78 = vector.multi_reduction <add>, %77, %cst_26 [1] : vector<8x256xf32> to vector<8xf32>
    %79 = vector.shape_cast %78 : vector<8xf32> to vector<8x1xf32>
    %cst_27 = arith.constant 2.560000e+02 : f32
    %80 = vector.broadcast %cst_27 : f32 to vector<8x1xf32>
    %81 = arith.divf %79, %80 : vector<8x1xf32>
    %82 = vector.broadcast %81 : vector<8x1xf32> to vector<8x256xf32>
    %83 = arith.subf %77, %82 : vector<8x256xf32>
    %84 = arith.mulf %83, %83 : vector<8x256xf32>
    %cst_28 = arith.constant dense<0.000000e+00> : vector<8xf32>
    %85 = vector.multi_reduction <add>, %84, %cst_28 [1] : vector<8x256xf32> to vector<8xf32>
    %86 = vector.shape_cast %85 : vector<8xf32> to vector<8x1xf32>
    %cst_29 = arith.constant 2.560000e+02 : f32
    %87 = vector.broadcast %cst_29 : f32 to vector<8x1xf32>
    %88 = arith.divf %86, %87 : vector<8x1xf32>
    %cst_30 = arith.constant 9.99999974E-6 : f32
    %89 = vector.broadcast %cst_30 : f32 to vector<8x1xf32>
    %90 = arith.addf %88, %89 : vector<8x1xf32>
    %91 = math.rsqrt %90 : vector<8x1xf32>
    %92 = vector.broadcast %91 : vector<8x1xf32> to vector<8x256xf32>
    %93 = arith.mulf %83, %92 : vector<8x256xf32>
    %94 = arith.truncf %93 : vector<8x256xf32> to vector<8x256xbf16>
    %c0_31 = arith.constant 0 : index
    %c0_32 = arith.constant 0 : index
    %95 = vector.load %arg6[%c0_31, %c0_32] : memref<256x1152xbf16, #tpu.memory_space<vmem>>, vector<256x1152xbf16>
    %cst_33 = arith.constant dense<0.000000e+00> : vector<8x1152xf32>
    %96 = tpu.matmul %94, %95, %cst_33 {dimension_numbers = #tpu.dot_dimension_numbers<[1], [0], [0], [1], [0, 0, 1, 1], [], []>} : vector<8x256xbf16>, vector<256x1152xbf16>, vector<8x1152xf32> -> vector<8x1152xf32>
    %97 = arith.truncf %96 : vector<8x1152xf32> to vector<8x1152xbf16>
    %98 = vector.extract_strided_slice %97 {offsets = [0, 0], sizes = [8, 1024], strides = [1, 1]} : vector<8x1152xbf16> to vector<8x1024xbf16>
    %99 = vector.extract_strided_slice %3 {offsets = [0, 0], sizes = [1, 1024], strides = [1, 1]} : vector<3x1024xbf16> to vector<1x1024xbf16>
    %100 = vector.broadcast %99 : vector<1x1024xbf16> to vector<8x1024xbf16>
    %101 = arith.mulf %98, %100 : vector<8x1024xbf16>
    %102 = vector.extract_strided_slice %97 {offsets = [0, 1], sizes = [8, 1024], strides = [1, 1]} : vector<8x1152xbf16> to vector<8x1024xbf16>
    %103 = vector.extract_strided_slice %97 {offsets = [0, 2], sizes = [8, 1024], strides = [1, 1]} : vector<8x1152xbf16> to vector<8x1024xbf16>
    %104 = vector.extract_strided_slice %3 {offsets = [2, 0], sizes = [1, 1024], strides = [1, 1]} : vector<3x1024xbf16> to vector<1x1024xbf16>
    %105 = vector.broadcast %104 : vector<1x1024xbf16> to vector<8x1024xbf16>
    %106 = arith.mulf %103, %105 : vector<8x1024xbf16>
    %107 = vector.extract_strided_slice %97 {offsets = [0, 32], sizes = [8, 1024], strides = [1, 1]} : vector<8x1152xbf16> to vector<8x1024xbf16>
    %108 = vector.extract_strided_slice %3 {offsets = [0, 0], sizes = [1, 1024], strides = [1, 1]} : vector<3x1024xbf16> to vector<1x1024xbf16>
    %109 = vector.broadcast %108 : vector<1x1024xbf16> to vector<8x1024xbf16>
    %110 = arith.mulf %107, %109 : vector<8x1024xbf16>
    %111 = vector.extract_strided_slice %97 {offsets = [0, 33], sizes = [8, 1024], strides = [1, 1]} : vector<8x1152xbf16> to vector<8x1024xbf16>
    %112 = vector.extract_strided_slice %97 {offsets = [0, 34], sizes = [8, 1024], strides = [1, 1]} : vector<8x1152xbf16> to vector<8x1024xbf16>
    %113 = vector.extract_strided_slice %3 {offsets = [2, 0], sizes = [1, 1024], strides = [1, 1]} : vector<3x1024xbf16> to vector<1x1024xbf16>
    %114 = vector.broadcast %113 : vector<1x1024xbf16> to vector<8x1024xbf16>
    %115 = arith.mulf %112, %114 : vector<8x1024xbf16>
    %116 = vector.extract_strided_slice %97 {offsets = [0, 64], sizes = [8, 1024], strides = [1, 1]} : vector<8x1152xbf16> to vector<8x1024xbf16>
    %117 = vector.extract_strided_slice %3 {offsets = [0, 0], sizes = [1, 1024], strides = [1, 1]} : vector<3x1024xbf16> to vector<1x1024xbf16>
    %118 = vector.broadcast %117 : vector<1x1024xbf16> to vector<8x1024xbf16>
    %119 = arith.mulf %116, %118 : vector<8x1024xbf16>
    %120 = vector.extract_strided_slice %97 {offsets = [0, 65], sizes = [8, 1024], strides = [1, 1]} : vector<8x1152xbf16> to vector<8x1024xbf16>
    %121 = vector.extract_strided_slice %97 {offsets = [0, 66], sizes = [8, 1024], strides = [1, 1]} : vector<8x1152xbf16> to vector<8x1024xbf16>
    %122 = vector.extract_strided_slice %3 {offsets = [2, 0], sizes = [1, 1024], strides = [1, 1]} : vector<3x1024xbf16> to vector<1x1024xbf16>
    %123 = vector.broadcast %122 : vector<1x1024xbf16> to vector<8x1024xbf16>
    %124 = arith.mulf %121, %123 : vector<8x1024xbf16>
    %125 = tpu.concatenate %101, %102, %106, %110, %111, %115, %119, %120, %124 in 0 : vector<8x1024xbf16>, vector<8x1024xbf16>, vector<8x1024xbf16>, vector<8x1024xbf16>, vector<8x1024xbf16>, vector<8x1024xbf16>, vector<8x1024xbf16>, vector<8x1024xbf16>, vector<8x1024xbf16> -> vector<72x1024xbf16>
    %c0_34 = arith.constant 0 : index
    %c0_35 = arith.constant 0 : index
    %126 = vector.load %arg4[%c0_34, %c0_35] : memref<8x72xbf16, #tpu.memory_space<vmem>>, vector<8x72xbf16>
    %cst_36 = arith.constant dense<0.000000e+00> : vector<8x1024xf32>
    %127 = tpu.matmul %126, %125, %cst_36 {dimension_numbers = #tpu.dot_dimension_numbers<[1], [0], [0], [1], [0, 0, 1, 1], [], []>} : vector<8x72xbf16>, vector<72x1024xbf16>, vector<8x1024xf32> -> vector<8x1024xf32>
    %c0_37 = arith.constant 0 : index
    %c0_38 = arith.constant 0 : index
    %128 = vector.load %arg5[%c0_37, %c0_38] : memref<8x1xf32, #tpu.memory_space<vmem>>, vector<8x1xf32>
    %129 = vector.broadcast %128 : vector<8x1xf32> to vector<8x1024xf32>
    %130 = arith.addf %127, %129 : vector<8x1024xf32>
    %cst_39 = arith.constant 5.000000e-01 : f32
    %131 = vector.broadcast %cst_39 : f32 to vector<8x1024xf32>
    %132 = arith.mulf %131, %130 : vector<8x1024xf32>
    %cst_40 = arith.constant 0.707106769 : f32
    %133 = vector.broadcast %cst_40 : f32 to vector<8x1024xf32>
    %134 = arith.mulf %130, %133 : vector<8x1024xf32>
    %cst_41 = arith.constant 0.000000e+00 : f32
    %135 = vector.broadcast %cst_41 : f32 to vector<8x1024xf32>
    %136 = arith.cmpf oge, %134, %135 : vector<8x1024xf32>
    %cst_42 = arith.constant 1.000000e+00 : f32
    %cst_43 = arith.constant -1.000000e+00 : f32
    %137 = vector.broadcast %cst_42 : f32 to vector<8x1024xf32>
    %138 = vector.broadcast %cst_43 : f32 to vector<8x1024xf32>
    %139 = arith.select %136, %137, %138 : vector<8x1024xi1>, vector<8x1024xf32>
    %140 = math.absf %134 : vector<8x1024xf32>
    %cst_44 = arith.constant 0.327591091 : f32
    %141 = vector.broadcast %cst_44 : f32 to vector<8x1024xf32>
    %142 = arith.mulf %141, %140 : vector<8x1024xf32>
    %cst_45 = arith.constant 1.000000e+00 : f32
    %143 = vector.broadcast %cst_45 : f32 to vector<8x1024xf32>
    %144 = arith.addf %143, %142 : vector<8x1024xf32>
    %cst_46 = arith.constant 1.000000e+00 : f32
    %145 = vector.broadcast %cst_46 : f32 to vector<8x1024xf32>
    %146 = arith.divf %145, %144 : vector<8x1024xf32>
    %cst_47 = arith.constant 1.06140542 : f32
    %147 = vector.broadcast %cst_47 : f32 to vector<8x1024xf32>
    %148 = arith.mulf %146, %147 : vector<8x1024xf32>
    %cst_48 = arith.constant -1.45315206 : f32
    %149 = vector.broadcast %cst_48 : f32 to vector<8x1024xf32>
    %150 = arith.addf %149, %148 : vector<8x1024xf32>
    %151 = arith.mulf %146, %150 : vector<8x1024xf32>
    %cst_49 = arith.constant 1.42141378 : f32
    %152 = vector.broadcast %cst_49 : f32 to vector<8x1024xf32>
    %153 = arith.addf %152, %151 : vector<8x1024xf32>
    %154 = arith.mulf %146, %153 : vector<8x1024xf32>
    %cst_50 = arith.constant -0.284496725 : f32
    %155 = vector.broadcast %cst_50 : f32 to vector<8x1024xf32>
    %156 = arith.addf %155, %154 : vector<8x1024xf32>
    %157 = arith.mulf %146, %156 : vector<8x1024xf32>
    %cst_51 = arith.constant 0.254829586 : f32
    %158 = vector.broadcast %cst_51 : f32 to vector<8x1024xf32>
    %159 = arith.addf %158, %157 : vector<8x1024xf32>
    %160 = arith.mulf %146, %159 : vector<8x1024xf32>
    %cst_52 = arith.constant 0.000000e+00 : f32
    %161 = vector.broadcast %cst_52 : f32 to vector<8x1024xf32>
    %162 = arith.subf %161, %140 : vector<8x1024xf32>
    %163 = arith.mulf %162, %140 : vector<8x1024xf32>
    %164 = math.exp %163 : vector<8x1024xf32>
    %165 = arith.mulf %160, %164 : vector<8x1024xf32>
    %cst_53 = arith.constant 1.000000e+00 : f32
    %166 = vector.broadcast %cst_53 : f32 to vector<8x1024xf32>
    %167 = arith.subf %166, %165 : vector<8x1024xf32>
    %168 = arith.mulf %139, %167 : vector<8x1024xf32>
    %cst_54 = arith.constant 1.000000e+00 : f32
    %169 = vector.broadcast %cst_54 : f32 to vector<8x1024xf32>
    %170 = arith.addf %169, %168 : vector<8x1024xf32>
    %171 = arith.mulf %132, %170 : vector<8x1024xf32>
    %cst_55 = arith.constant dense<0.000000e+00> : vector<8xf32>
    %172 = vector.multi_reduction <add>, %171, %cst_55 [1] : vector<8x1024xf32> to vector<8xf32>
    %173 = vector.shape_cast %172 : vector<8xf32> to vector<8x1xf32>
    %cst_56 = arith.constant 1.024000e+03 : f32
    %174 = vector.broadcast %cst_56 : f32 to vector<8x1xf32>
    %175 = arith.divf %173, %174 : vector<8x1xf32>
    %176 = vector.broadcast %175 : vector<8x1xf32> to vector<8x1024xf32>
    %177 = arith.subf %171, %176 : vector<8x1024xf32>
    %178 = arith.mulf %177, %177 : vector<8x1024xf32>
    %cst_57 = arith.constant dense<0.000000e+00> : vector<8xf32>
    %179 = vector.multi_reduction <add>, %178, %cst_57 [1] : vector<8x1024xf32> to vector<8xf32>
    %180 = vector.shape_cast %179 : vector<8xf32> to vector<8x1xf32>
    %cst_58 = arith.constant 1.024000e+03 : f32
    %181 = vector.broadcast %cst_58 : f32 to vector<8x1xf32>
    %182 = arith.divf %180, %181 : vector<8x1xf32>
    %cst_59 = arith.constant 9.99999974E-6 : f32
    %183 = vector.broadcast %cst_59 : f32 to vector<8x1xf32>
    %184 = arith.addf %182, %183 : vector<8x1xf32>
    %185 = math.rsqrt %184 : vector<8x1xf32>
    %186 = vector.broadcast %185 : vector<8x1xf32> to vector<8x1024xf32>
    %187 = arith.mulf %177, %186 : vector<8x1024xf32>
    %188 = vector.extract_strided_slice %1 {offsets = [0, 128], sizes = [4, 256], strides = [1, 1]} : vector<4x512xbf16> to vector<4x256xbf16>
    %c0_60 = arith.constant 0 : index
    %c0_61 = arith.constant 0 : index
    %189 = vector.load %arg7[%c0_60, %c0_61] : memref<256x1024xbf16, #tpu.memory_space<vmem>>, vector<256x1024xbf16>
    %cst_62 = arith.constant dense<0.000000e+00> : vector<4x1024xf32>
    %190 = tpu.matmul %188, %189, %cst_62 {dimension_numbers = #tpu.dot_dimension_numbers<[1], [0], [0], [1], [0, 0, 1, 1], [], []>} : vector<4x256xbf16>, vector<256x1024xbf16>, vector<4x1024xf32> -> vector<4x1024xf32>
    %cst_63 = arith.constant 0.000000e+00 : f32
    %191 = vector.broadcast %cst_63 : f32 to vector<4x1024xf32>
    %192 = tpu.concatenate %190, %191 in 0 : vector<4x1024xf32>, vector<4x1024xf32> -> vector<8x1024xf32>
    %193 = arith.addf %187, %192 : vector<8x1024xf32>
    %c0_64 = arith.constant 0 : index
    %c0_65 = arith.constant 0 : index
    %c0_66 = arith.constant 0 : index
    %194 = vector.load %arg10[%c0_64, %c0_65, %c0_66] : memref<1x8x1024xf32, #tpu.memory_space<vmem>>, vector<1x8x1024xf32>
    %195 = vector.shape_cast %194 : vector<1x8x1024xf32> to vector<8x1024xf32>
    %196 = vector.shape_cast %193 : vector<8x1024xf32> to vector<1x8x1024xf32>
    tpu.vector_store %arg10[%c0_64, %c0_65, %c0_66], %196 {strides = array<i32>} : memref<1x8x1024xf32, #tpu.memory_space<vmem>>, vector<1x8x1024xf32>,
    return
  }
  func.func @transform_0(%arg0: i32) -> (i32, i32, i32) {
    %c0_i32 = arith.constant 0 : i32
    %c0_i32_0 = arith.constant 0 : i32
    %c0_i32_1 = arith.constant 0 : i32
    return %arg0, %c0_i32, %c0_i32_0 : i32, i32, i32
  }
  func.func @transform_1(%arg0: i32) -> (i32, i32) {
    %c0_i32 = arith.constant 0 : i32
    %c0_i32_0 = arith.constant 0 : i32
    %c0_i32_1 = arith.constant 0 : i32
    return %c0_i32, %c0_i32_0 : i32, i32
  }
  func.func @transform_2(%arg0: i32) -> (i32, i32) {
    %c0_i32 = arith.constant 0 : i32
    %c0_i32_0 = arith.constant 0 : i32
    %c0_i32_1 = arith.constant 0 : i32
    return %c0_i32, %c0_i32_0 : i32, i32
  }
  func.func @transform_3(%arg0: i32) -> (i32, i32) {
    %c0_i32 = arith.constant 0 : i32
    %c0_i32_0 = arith.constant 0 : i32
    %c0_i32_1 = arith.constant 0 : i32
    return %c0_i32, %c0_i32_0 : i32, i32
  }
  func.func @transform_4(%arg0: i32) -> (i32, i32) {
    %c0_i32 = arith.constant 0 : i32
    %c0_i32_0 = arith.constant 0 : i32
    %c0_i32_1 = arith.constant 0 : i32
    return %c0_i32, %c0_i32_0 : i32, i32
  }
  func.func @transform_5(%arg0: i32) -> (i32, i32) {
    %c0_i32 = arith.constant 0 : i32
    %c0_i32_0 = arith.constant 0 : i32
    %c0_i32_1 = arith.constant 0 : i32
    return %c0_i32, %c0_i32_0 : i32, i32
  }
  func.func @transform_6(%arg0: i32) -> (i32, i32) {
    %c0_i32 = arith.constant 0 : i32
    %c0_i32_0 = arith.constant 0 : i32
    %c0_i32_1 = arith.constant 0 : i32
    return %c0_i32, %c0_i32_0 : i32, i32
  }
  func.func @transform_7(%arg0: i32) -> (i32, i32) {
    %c0_i32 = arith.constant 0 : i32
    %c0_i32_0 = arith.constant 0 : i32
    %c0_i32_1 = arith.constant 0 : i32
    return %c0_i32, %c0_i32_0 : i32, i32
  }
  func.func @transform_8(%arg0: i32) -> (i32, i32) {
    %c0_i32 = arith.constant 0 : i32
    %c0_i32_0 = arith.constant 0 : i32
    %c0_i32_1 = arith.constant 0 : i32
    return %c0_i32, %c0_i32_0 : i32, i32
  }
  func.func @transform_9(%arg0: i32) -> (i32, i32, i32) {
    %c0_i32 = arith.constant 0 : i32
    %c0_i32_0 = arith.constant 0 : i32
    %c0_i32_1 = arith.constant 0 : i32
    return %arg0, %c0_i32, %c0_i32_0 : i32, i32, i32
  }
}

</mosaic_0001>

<bundles_post_ra>
// kernel: residual_upscale_conv_block.1
= control target key start
LH: loop header
LB: loop body
LE: loop exit
PB: predicated region body
PF: predicated region fallthrough
CT: control target
= control target key end

     0   :  { %s4850_s30 = smov 0   ;;  %s6948_s0 = inlined_call_operand.vmem [shape: bf16[2,4,512], index: 0, kind: input, shape index: {}]   ;;  %s6949_s1 = inlined_call_operand.vmem [shape: bf16[8,36], index: 1, kind: input, shape index: {}]   ;;  %s6950_s2 = inlined_call_operand.vmem [shape: f32[8,1], index: 2, kind: input, shape index: {}]   ;;  %s6951_s3 = inlined_call_operand.vmem [shape: bf16[8,72], index: 3, kind: input, shape index: {}]   ;;  %s6952_s4 = inlined_call_operand.vmem [shape: f32[8,1], index: 4, kind: input, shape index: {}]   ;;  %s6953_s5 = inlined_call_operand.vmem [shape: bf16[256,1152], index: 5, kind: input, shape index: {}]   ;;  %s6954_s6 = inlined_call_operand.vmem [shape: bf16[256,1024], index: 6, kind: input, shape index: {}]   ;;  %s6955_s7 = inlined_call_operand.vmem [shape: bf16[3,256], index: 7, kind: input, shape index: {}]   ;;  %s6956_s8 = inlined_call_operand.vmem [shape: bf16[3,1024], index: 8, kind: input, shape index: {}]   ;;  %s6957_s9 = inlined_call_operand.vmem [shape: f32[2,8,1024], index: 9, kind: output, shape index: {}]  }
   0x1 LB: > { %s4170_s10 = sadd.s32 4294967295, %s4779_s30   ;;  %p4174_p0 = scmp.ge.s32.totalorder %s4779_s30, 1  ;;  %s4779_s30 = sphi %s4850_s30, %s19_s30  }
   0x2   : > { %p287_p1 = scmp.lt.s32.totalorder %s4779_s30, 3 }
   0x4   : > { %p288_p2 = pnand %p4174_p0, %p287_p1 }
   0x5   : > { %p323_p3 = scmp.lt.s32.totalorder (!%p288_p2), %s4170_s10, 1  ;;  %v4179_v0 = vld.sshfl [vmem:[%s6955_s7] sm:$0x33 pattern:$0x76325410] (!%p288_p2)  ;;  %v350_v1 = vlaneseq (!%p288_p2)  ;;  %s4782_s17 = smov (!%p288_p2), 127  }
   0x6   : > { %291 = sbr.rel (%p288_p2) target bundleno = 2075 (0x81b), region = 56  ;;  %v346_v2 = vcombine.high (!%p288_p2), %v4179_v0, %v4179_v0  ;;  %v348_v3 = vpack.i.b16 (!%p288_p2), %v4179_v0, %v4179_v0  ;;  %v4781_v5 = vmov (!%p288_p2), 1983009808   ;;  %s4783_s18 = smov (!%p288_p2), 113   ;;  %vm406_vm0 = vcmask (!%p288_p2), 1039360  }
   0x7   : > { %v351_v4 = vshrl.u32 (!%p288_p2), %v350_v1, 7  ;;  %v365_v6 = vunpack.c.l.s4 (!%p288_p2), %v4781_v5  ;;  %s4784_s19 = smov (!%p288_p2), 111   ;;  %s4785_s20 = smov (!%p288_p2), 95   ;;  %vm399_vm1 = vcmask (!%p288_p2), 924672   ;;  %vm374_vm2 = vcmask (!%p288_p2), 908288  }
   0x8   : > { %v355_v7 = vpack.i.b16 (!%p288_p2), %v346_v2, %v346_v2  ;;  %s4786_s21 = smov (!%p288_p2), 126   ;;  %s4787_s22 = smov (!%p288_p2), 112   ;;  %vm596_vm3 = vcmask (!%p288_p2), 1041408   ;;  %vm579_vm4 = vcmask (!%p288_p2), 777216   ;;  %vm606_vm5 = vcmask (!%p288_p2), 1043456  }
   0x9   : > { %v366_v8 = vunpack.c.0.s8 (!%p288_p2), %v365_v6  ;;  %v4864_v9 = vsub.s32 (!%p288_p2), 1, %v351_v4  ;;  %v4866_v10 = vsub.s32 (!%p288_p2), 0, %v351_v4  ;;  %vm499_vm6 = vcmask (!%p288_p2), 1031168   ;;  %s4788_s23 = smov (!%p288_p2), 17   ;;  %s4791_s15 = smov (!%p288_p2), 32  }
   0xa   : > { %vm613_vm7 = vcmask (!%p288_p2), 1045504   ;;  %vm526_vm8 = vcmask (!%p288_p2), 916480   ;;  %vm672_vm9 = vcmask (!%p288_p2), 138240   ;;  %vm683_vm10 = vcmask (!%p288_p2), 293888   ;;  %s4796_s25 = smov (!%p288_p2), 63   ;;  %s4797_s26 = smov (!%p288_p2), 62  }
   0xb   : > { %v4873_v12 = vsub.s32 (!%p288_p2), %v366_v8, %v351_v4  ;;  %v381_v13 = vrot.slane (!%p288_p2), %v348_v3, %v4864_v9  ;;  %v385_v14 = vrot.slane (!%p288_p2), %v355_v7, %v4864_v9  ;;  %v353_v15 = vrot.slane (!%p288_p2), %v348_v3, %v4866_v10  ;;  %s4798_s27 = smov (!%p288_p2), 96  }
   0xc   : > { %v360_v16 = vrot.slane (!%p288_p2), %v355_v7, %v4866_v10  ;;  %vm2072_vm13 = vcmask (!%p288_p2), 15360   ;;  %vm2206_vm14 = vcmask (!%p288_p2), 523264   ;;  %vm2248_vm15 = vcmask (!%p288_p2), 539648  }
   0xd   : > { %s6961_s10 = smov (!%p323_p3, %s4170_s10), 1  ;;  %v388_v17 = vcombine.low %v381_v13, %v385_v14 }
   0xe   : > { %s4464_s13 = sshll.u32 %s6961_s10, 3  ;;  %v363_v18 = vcombine.low %v353_v15, %v360_v16 }
   0xf   : > { %s327_s16 = scalar_lea.vmem %s6948_s0, %s4464_s13  ;;  %v4882_v19 = vrot.slane %v388_v17, %v4873_v12 }
  0x10   : > { %v4871_v11 = vld [vmem:[%s327_s16] sm:$0xff]  ;;  %v370_v21 = vrot.slane %v363_v18, %v4873_v12  ;;  %s4792_s16 = smov 2  }
  0x11   : > { %411 = vrot.lane.b32.xlu1 %v4871_v11, %s4782_s17  ;;  %v4887_v20 = vrot.slane %v4871_v11, %v4873_v12  ;;  %396 = vrot.lane.b32.xlu0 %v4882_v19, %s4783_s18  ;;  %v451_v22 = vcombine.low %v4871_v11, %v4871_v11  ;;  %v529_v26 = vcombine.high %v4871_v11, %v4871_v11 }
  0x13   : > { %v458_v23 = vrot.slane %v451_v22, %v4873_v12  ;;  %v4900_v24 = vcombine.high %v4887_v20, %v4887_v20  ;;  %v4912_v27 = vrot.slane %v529_v26, %v4873_v12  ;;  %v572_v3 = vcombine.low %v4887_v20, %v4887_v20 }
  0x15   : > { %419 = vrot.lane.b32.xlu1 %v4871_v11, %s4783_s18  ;;  %403 = vrot.lane.b32.xlu0 %v370_v21, %s4782_s17  ;;  %v466_v25 = vcombine.high %v458_v23, %v458_v23  ;;  %s4793_s18 = smov 34  }
  0x19   : > { %471 = vrot.lane.b32.xlu1 %v4887_v20, %s4782_s17  ;;  %427 = vrot.lane.b32.xlu0 %v4871_v11, %s4784_s19 }
  0x1d   : > { %371 = vrot.lane.b32.xlu1 %v370_v21, %s4784_s19  ;;  %469 = vrot.lane.b32.xlu0 %v466_v25, %s4782_s17 }
  0x21   : > { %538 = vrot.lane.b32.xlu1 %v4900_v24, %s4784_s19  ;;  %467 = vrot.lane.b32.xlu0 %v458_v23, %s4782_s17 }
  0x25   : > { %573 = vrot.lane.b32.xlu1 %v458_v23, %s4785_s20  ;;  %540 = vrot.lane.b32.xlu0 %v4912_v27, %s4784_s19 }
  0x83   : > { %v412_v28 = vpop.permute.xlu1 %411  ;;  %v397_v36 = vpop.permute.xlu0 %396 }
  0x84   : > { %v413_v29 = vrot.slane %v412_v28, 2  ;;  %v414_v30 = vrot.slane %v412_v28, 4  ;;  %v398_v37 = vrot.slane %v397_v36, 6 }
  0x86   : > { %v415_v31 = vsel %vm406_vm0, %v413_v29, %v414_v30  ;;  %v400_v40 = vsel %vm399_vm1, %v398_v37, %v397_v36 }
  0x87   : > { %v420_v32 = vpop.permute.xlu1 %419  ;;  %v418_v33 = vmul.bf16 %v415_v31, %v4882_v19  ;;  %v404_v43 = vpop.permute.xlu0 %403  ;;  %v402_v44 = vmul.bf16 %v400_v40, %v4871_v11 }
  0x88   : > { %v421_v34 = vrot.slane %v420_v32, 2  ;;  %v422_v35 = vrot.slane %v420_v32, 4  ;;  %v405_v45 = vrot.slane %v404_v43, 6 }
  0x89   : > { %v544_v38 = vcombine.low %v418_v33, %v418_v33  ;;  %v476_v52 = vcombine.high %v402_v44, %v402_v44  ;;  %v483_v56 = vrot.slane %v402_v44, %v4873_v12 }
  0x8a   : > { %v423_v39 = vsel %vm399_vm1, %v421_v34, %v422_v35  ;;  %v407_v47 = vsel %vm406_vm0, %v405_v45, %v404_v43  ;;  %vm2122_vm1 = vcmask 261120  }
  0x8b   : > { %v551_v41 = vrot.slane %v544_v38, %v4873_v12  ;;  %v426_v42 = vmul.bf16 %v423_v39, %v370_v21  ;;  %v409_v49 = vmul.bf16 %v407_v47, %v4871_v11  ;;  %v428_v50 = vpop.permute.xlu0 %427  ;;  %v490_v58 = vrot.slane %v476_v52, %v4873_v12  ;;  %v472_v5 = vpop.permute.xlu1 %471 }
  0x8c   : > { %v429_v54 = vrot.slane %v428_v50, 2  ;;  %v430_v55 = vrot.slane %v428_v50, 4  ;;  %v491_v60 = vcombine.low %v483_v56, %v483_v56 }
  0x8d   : > { %553 = vrot.lane.b32.xlu1 %v551_v41, %s4784_s19  ;;  %v565_v46 = vrot.slane %v426_v42, %v4873_v12  ;;  %v552_v51 = vcombine.high %v551_v41, %v551_v41  ;;  %v503_v53 = vcombine.low %v409_v49, %v409_v49  ;;  %v517_v61 = vrot.slane %v409_v49, %v4873_v12 }
  0x8e   : > { %v431_v59 = vsel %vm374_vm2, %v429_v54, %v430_v55  ;;  %v492_v62 = vcombine.low %v490_v58, %v490_v58 }
  0x8f   : > { %569 = vrot.lane.b32.xlu0 %v565_v46, %s4784_s19  ;;  %v566_v48 = vcombine.low %v565_v46, %v565_v46  ;;  %v510_v57 = vrot.slane %v503_v53, %v4873_v12  ;;  %v433_v63 = vmul.bf16 %v431_v59, %v4882_v19  ;;  %v519_v0 = vcombine.low %v517_v61, %v517_v61  ;;  %v372_v6 = vpop.permute.xlu1 %371  ;;  %v470_v7 = vpop.permute.xlu0 %469 }
  0x90   : > { %v373_v19 = vrot.slane %v372_v6, 6  ;;  %v474_v50 = vsel %vm406_vm0, %v470_v7, %v472_v5 }
  0x91   : > { %567 = vrot.lane.b32.xlu1 %v566_v48, %s4784_s19  ;;  %v518_v1 = vcombine.low %v510_v57, %v510_v57  ;;  %v589_v2 = vrot.slane %v433_v63, %v4873_v12 }
  0x92   : > { %v375_v22 = vsel %vm374_vm2, %v373_v19, %v372_v6 }
  0x93   : > { %555 = vrot.lane.b32.xlu0 %v552_v51, %s4784_s19  ;;  %v590_v4 = vcombine.high %v589_v2, %v589_v2  ;;  %v539_v8 = vpop.permute.xlu1 %538  ;;  %v468_v13 = vpop.permute.xlu0 %467  ;;  %v377_v25 = vmul.bf16 %v375_v22, %v4871_v11 }
  0x94   : > { %v473_v39 = vsel %vm406_vm0, %v468_v13, %v470_v7 }
  0x95   : > { %495 = vrot.lane.b32.xlu1 %v483_v56, %s4786_s21  ;;  %v435_v29 = vcombine.high %v377_v25, %v377_v25  ;;  %v442_v32 = vrot.slane %v377_v25, %v4873_v12 }
  0x97   : > { %522 = vrot.lane.b32.xlu0 %v510_v57, %s4787_s22  ;;  %v4944_v14 = vpop.permute.xlu1 %573  ;;  %v541_v15 = vpop.permute.xlu0 %540  ;;  %v449_v35 = vrot.slane %v435_v29, %v4873_v12  ;;  %v450_v11 = vcombine.high %v442_v32, %v442_v32  ;;  %v599_v53 = vsel %vm596_vm3, %v442_v32, %v473_v39 }
  0x98   : > { %v542_v34 = vsel %vm374_vm2, %v539_v8, %v541_v15 }
  0x99   : > { %493 = vrot.lane.b32.xlu1 %v491_v60, %s4786_s21  ;;  %v605_v47 = vsel %vm596_vm3, %v449_v35, %v472_v5  ;;  %v602_v56 = vsel %vm596_vm3, %v450_v11, %v474_v50  ;;  %v642_v5 = vld [vmem:[%s6950_s2] sm:$0xff] }
  0x9b   : > { %497 = vrot.lane.b32.xlu0 %v492_v62, %s4786_s21 }
  0x9d   : > { %524 = vrot.lane.b32.xlu1 %v519_v0, %s4787_s22 }
  0x9f   : > { %520 = vrot.lane.b32.xlu0 %v518_v1, %s4787_s22  ;;  %v4789_v1 = vmov 0   ;;  %s4795_s22 = smov 66  }
  0xa0   : > { %725 = vmatprep.mubr.bf16.mxu1 %v4789_v1  ;;  %4515 = vset.pattern.permute.xlu1 %v4789_v1 }
  0xa1   : > { %577 = vrot.lane.b32.xlu1 %v4887_v20, %s4785_s20  ;;  %4516 = vset.pattern.permute.xlu0 %v4789_v1 }
  0xa3   : > { %575 = vrot.lane.b32.xlu0 %v572_v3, %s4785_s20 }
  0xa5   : > { %593 = vrot.lane.b32.xlu1 %v590_v4, %s4784_s19 }
  0xa7   : > { %591 = vrot.lane.b32.xlu0 %v589_v2, %s4784_s19  ;;  %s4794_s19 = smov 64  }
  0xff   : > { %v554_v16 = vpop.permute.xlu1 %553 }
 0x100   : > { %v622_v57 = vsel %vm596_vm3, %v539_v8, %v554_v16 }
 0x101   : > { %v570_v17 = vpop.permute.xlu0 %569 }
 0x103   : > { %v568_v18 = vpop.permute.xlu1 %567 }
 0x104   : > { %v571_v40 = vsel %vm374_vm2, %v568_v18, %v570_v17  ;;  %v630_v60 = vsel %vm606_vm5, %v622_v57, %v568_v18 }
 0x105   : > { %v556_v20 = vpop.permute.xlu0 %555  ;;  %v636_v3 = vsel %vm613_vm7, %v630_v60, %v4944_v14 }
 0x106   : > { %v557_v31 = vsel %vm374_vm2, %v554_v16, %v556_v20  ;;  %v628_v37 = vsel %vm596_vm3, %v541_v15, %v556_v20 }
 0x107   : > { %v496_v21 = vpop.permute.xlu1 %495  ;;  %v625_v36 = vsel %vm596_vm3, %v542_v34, %v557_v31  ;;  %v634_v44 = vsel %vm606_vm5, %v628_v37, %v570_v17 }
 0x108   : > { %v632_v45 = vsel %vm606_vm5, %v625_v36, %v571_v40 }
 0x109   : > { %v523_v23 = vpop.permute.xlu0 %522 }
 0x10b   : > { %v494_v26 = vpop.permute.xlu1 %493 }
 0x10c   : > { %v500_v46 = vsel %vm499_vm6, %v494_v26, %v496_v21 }
 0x10d   : > { %v498_v28 = vpop.permute.xlu0 %497  ;;  %v608_v55 = vsel %vm606_vm5, %v599_v53, %v500_v46 }
 0x10e   : > { %v612_v51 = vsel %vm606_vm5, %v605_v47, %v498_v28  ;;  %v501_v54 = vsel %vm499_vm6, %v496_v21, %v498_v28  ;;  %v641_v28 = vld [vmem:[%s6949_s1] sm:$0xf] }
 0x10f   : > { %v525_v30 = vpop.permute.xlu1 %524  ;;  %v610_v62 = vsel %vm606_vm5, %v602_v56, %v501_v54 }
 0x110   : > { %v619_v59 = vsel %vm613_vm7, %v612_v51, %v525_v30  ;;  %v528_v61 = vsel %vm526_vm8, %v523_v23, %v525_v30 }
 0x111   : > { %v521_v33 = vpop.permute.xlu0 %520  ;;  %v617_v2 = vsel %vm613_vm7, %v610_v62, %v528_v61 }
 0x112   : > { %v527_v52 = vsel %vm526_vm8, %v521_v33, %v523_v23  ;;  %vm2389_vm8 = vcmask 785408  }
 0x113   : > { %v578_v38 = vpop.permute.xlu1 %577  ;;  %v615_v58 = vsel %vm613_vm7, %v608_v55, %v527_v52 }
 0x115   : > { %v576_v41 = vpop.permute.xlu0 %575 }
 0x116   : > { %v580_v42 = vsel %vm579_vm4, %v4944_v14, %v576_v41  ;;  %v581_v43 = vsel %vm579_vm4, %v576_v41, %v578_v38 }
 0x117   : > { %v640_v48 = vsel %vm613_vm7, %v634_v44, %v581_v43  ;;  %v638_v49 = vsel %vm613_vm7, %v632_v45, %v580_v42  ;;  %v594_v63 = vpop.permute.xlu1 %593  ;;  %vm2558_vm7 = vcmask 506880  }
 0x118   : > { %664 = vrot.lane.b32.xlu0 %v640_v48, %s4788_s23  ;;  %662 = vrot.lane.b32.xlu1 %v638_v49, %s4788_s23 }
 0x119   : > { %v592_v0 = vpop.permute.xlu0 %591 }
 0x11a   : > { %v595_v4 = vsel %vm374_vm2, %v592_v0, %v594_v63  ;;  %vm2164_vm2 = vcmask 277504  }
 0x11c   : > { %654 = vrot.lane.b32.xlu0 %v615_v58, %s4788_s23  ;;  %658 = vrot.lane.b32.xlu1 %v619_v59, %s4788_s23 }
 0x120   : > { %656 = vrot.lane.b32.xlu0 %v617_v2, %s4788_s23  ;;  %660 = vrot.lane.b32.xlu1 %v636_v3, %s4788_s23 }
 0x124   : > { %668 = vrot.lane.b32.xlu1 %v595_v4, %s4788_s23  ;;  %666 = vrot.lane.b32.xlu0 %v592_v0, %s4788_s23 }
 0x128   : > { %670 = vrot.lane.b32.xlu0 %v594_v63, %s4788_s23  ;;  %645 = vperm.xlu1 %4515, %v642_v5  }
 0x18a   : > { %v663_v6 = vpop.permute.xlu1 %662  ;;  %v665_v7 = vpop.permute.xlu0 %664 }
 0x18b   : > { %v676_v18 = vsel %vm672_vm9, %v663_v6, %v665_v7 }
 0x18e   : > { %v659_v8 = vpop.permute.xlu1 %658  ;;  %v655_v13 = vpop.permute.xlu0 %654 }
 0x192   : > { %v661_v15 = vpop.permute.xlu1 %660  ;;  %v657_v14 = vpop.permute.xlu0 %656 }
 0x193   : > { %v674_v16 = vsel %vm672_vm9, %v657_v14, %v659_v8  ;;  %v673_v17 = vsel %vm672_vm9, %v655_v13, %v657_v14  ;;  %v675_v21 = vsel %vm672_vm9, %v661_v15, %v663_v6  ;;  %v4790_v14 = vmov -1.0  }
 0x194   : > { %693 = vmatprep.subr.bf16.mxu1 %v674_v16 }
 0x195   : > { %694 = vmatpush1.bf16.msra.mxu1 %v673_v17 }
 0x196   : > { %v669_v19 = vpop.permute.xlu1 %668  ;;  %695 = vmatprep.subr.bf16.mxu1 %v676_v18  ;;  %v667_v20 = vpop.permute.xlu0 %666 }
 0x197   : > { %v677_v22 = vsel %vm672_vm9, %v667_v20, %v669_v19 }
 0x198   : > { %v688_v26 = vsel %vm596_vm3, %v677_v22, 0 }
 0x199   : > { %696 = vmatpush1.bf16.msra.mxu1 %v675_v21 }
 0x19a   : > { %v671_v23 = vpop.permute.xlu0 %670 }
 0x19b   : > { %v678_v25 = vsel %vm672_vm9, %v669_v19, %v671_v23  ;;  %vm2460_vm9 = vcmask 769024  }
 0x19c   : > { %4180 = vmatprep.subr.msk.bf16.mxu1 %vm596_vm3, %v678_v25  ;;  %vm2522_vm3 = vcmask 515072  }
 0x19d   : > { %698 = vmatpush1.bf16.msra.mxu1 %v688_v26 }
 0x1a0   : > { %4181 = vmatmul.mubr.msk.bf16.vlgmr.msra.gmra.mrb[0].mxu1 %vm683_vm10, %v641_v28  ;;  %vm2702_vm10 = vcmask 588800  }
 0x1a7   : > { %v646_v29 = vpop.permute.xlu1 %645 }
 0x273   : > { %v727_v30 = vpop.f32.mrb[0].mxu1 }
 0x274   : > { %v728_v31 = vadd.f32 %v727_v30, %v646_v29  ;;  %v729_v32 = vpop.f32.mrb[1].mxu1  ;;  %v4519_v30 = vld [vmem:[%s6953_s5] ss:$36 sps:$4 sm:$0xff]  }
 0x275   : > { %v730_v33 = vadd.f32 %v729_v32, %v646_v29  ;;  %v731_v34 = vpop.f32.mrb[2].mxu1  ;;  %v4521_v32 = vld [vmem:[%s6953_s5 + $0x4] ss:$36 sps:$4 sm:$0xff]  }
 0x276   : > { %v736_v35 = vmul.f32 0.70710677, %v728_v31  ;;  %v732_v36 = vpop.f32.mrb[3].mxu1  ;;  %v734_v21 = vmul.f32 0.5, %v728_v31  ;;  %v4522_v31 = vld [vmem:[%s6953_s5 + $0xc] ss:$36 sps:$4 sm:$0xff]   ;;  %1703 = vmatprep.subr.bf16.mxu1 %v4521_v32 }
 0x277   : > { %v737_v37 = vmul.f32 0.70710677, %v730_v33  ;;  %v735_v23 = vmul.f32 0.5, %v730_v33  ;;  %v4524_v33 = vld [vmem:[%s6953_s5 + $0x8] ss:$36 sps:$4 sm:$0xff]   ;;  %1744 = vmatprep.subr.bf16.mxu0 %v4522_v31  ;;  %1704 = vmatpush1.bf16.msra.mxu1 %v4519_v30 }
 0x278   : > { %v742_v38 = vand.u32 2147483647, %v736_v35  ;;  %vm738_vm11 = vcmp.ge.f32.partialorder %v736_v35, 0.0  ;;  %v4527_v34 = vld [vmem:[%s6953_s5 + $0x4c] ss:$36 sps:$4 sm:$0xff]   ;;  %1745 = vmatpush1.bf16.msra.mxu0 %v4524_v33 }
 0x279   : > { %v743_v11 = vand.u32 2147483647, %v737_v37  ;;  %vm739_vm12 = vcmp.ge.f32.partialorder %v737_v37, 0.0  ;;  %v740_v16 = vsel %vm738_vm11, 1.0, %v4790_v14  ;;  %v4528_v35 = vld [vmem:[%s6953_s5 + $0x54] ss:$36 sps:$4 sm:$0xff]   ;;  %1705 = vmatprep.subr.bf16.mxu1 %v4527_v34 }
 0x27a   : > { %v744_v39 = vmul.f32 0.3275911, %v742_v38  ;;  %v770_v43 = vsub.f32 0.0, %v742_v38  ;;  %v741_v18 = vsel %vm739_vm12, 1.0, %v4790_v14  ;;  %v4525_v36 = vld [vmem:[%s6953_s5 + $0x48] ss:$36 sps:$4 sm:$0xff]   ;;  %1746 = vmatprep.subr.bf16.mxu0 %v4528_v35 }
 0x27b   : > { %v745_v40 = vmul.f32 0.3275911, %v743_v11  ;;  %v771_v44 = vsub.f32 0.0, %v743_v11  ;;  %v4530_v37 = vld [vmem:[%s6953_s5 + $0x50] ss:$36 sps:$4 sm:$0xff]   ;;  %1706 = vmatpush1.bf16.msra.mxu1 %v4525_v36 }
 0x27c   : > { %v746_v41 = vadd.f32 1.0, %v744_v39  ;;  %v772_v46 = vmul.f32 %v770_v43, %v742_v38  ;;  %v4533_v38 = vld [vmem:[%s6953_s5 + $0x94] ss:$36 sps:$4 sm:$0xff]   ;;  %1747 = vmatpush1.bf16.msra.mxu0 %v4530_v37  ;;  %v4591_v30 = vld [vmem:[%s6953_s5 + $0x360] ss:$36 sps:$4 sm:$0xff]  }
 0x27d   : > { %v747_v42 = vadd.f32 1.0, %v745_v40  ;;  %v773_v48 = vmul.f32 %v771_v44, %v743_v11  ;;  %v4534_v11 = vld [vmem:[%s6953_s5 + $0x9c] ss:$36 sps:$4 sm:$0xff]   ;;  %v4531_v39 = vld [vmem:[%s6953_s5 + $0x90] ss:$36 sps:$4 sm:$0xff]   ;;  %1707 = vmatprep.subr.bf16.mxu1 %v4533_v38 }
 0x27e   : > { %4729 = vrcp.f32 %v746_v41  ;;  %v774_v52 = vmul.f32 1.442695, %v772_v46  ;;  %v4536_v40 = vld [vmem:[%s6953_s5 + $0x98] ss:$36 sps:$4 sm:$0xff]   ;;  %1748 = vmatprep.subr.bf16.mxu0 %v4534_v11  ;;  %v4542_v44 = vld [vmem:[%s6953_s5 + $0xe0] ss:$36 sps:$4 sm:$0xff]  }
 0x27f   : > { %4731 = vrcp.f32 %v747_v42  ;;  %v776_v54 = vmul.f32 1.442695, %v773_v48  ;;  %v4539_v41 = vld [vmem:[%s6953_s5 + $0xdc] ss:$36 sps:$4 sm:$0xff]   ;;  %v4540_v42 = vld [vmem:[%s6953_s5 + $0xe4] ss:$36 sps:$4 sm:$0xff]   ;;  %1708 = vmatpush1.bf16.msra.mxu1 %v4531_v39 }
 0x280   : > { %4733 = vpow2.f32 %v774_v52  ;;  %1749 = vmatpush1.bf16.msra.mxu0 %v4536_v40  ;;  %v4537_v43 = vld [vmem:[%s6953_s5 + $0xd8] ss:$36 sps:$4 sm:$0xff]   ;;  %1709 = vmatprep.subr.bf16.mxu1 %v4539_v41  ;;  %v4546_v46 = vld [vmem:[%s6953_s5 + $0x12c] ss:$36 sps:$4 sm:$0xff]   ;;  %v4612_v40 = vld [vmem:[%s6953_s5 + $0x444] ss:$36 sps:$4 sm:$0xff]  }
 0x281   : > { %4735 = vpow2.f32 %v776_v54  ;;  %1750 = vmatprep.subr.bf16.mxu0 %v4540_v42  ;;  %v4548_v48 = vld [vmem:[%s6953_s5 + $0x128] ss:$36 sps:$4 sm:$0xff]   ;;  %v4554_v52 = vld [vmem:[%s6953_s5 + $0x170] ss:$36 sps:$4 sm:$0xff]   ;;  %v4558_v54 = vld [vmem:[%s6953_s5 + $0x1bc] ss:$36 sps:$4 sm:$0xff]  }
 0x282   : > { %v4596_v32 = vld [vmem:[%s6953_s5 + $0x368] ss:$36 sps:$4 sm:$0xff]   ;;  %v4600_v34 = vld [vmem:[%s6953_s5 + $0x3b4] ss:$36 sps:$4 sm:$0xff]   ;;  %v4606_v37 = vld [vmem:[%s6953_s5 + $0x3fc] ss:$36 sps:$4 sm:$0xff]  }
 0x283   : > { %1710 = vmatpush1.bf16.msra.mxu1 %v4537_v43  ;;  %v4597_v31 = vld [vmem:[%s6953_s5 + $0x3a8] ss:$36 sps:$4 sm:$0xff]   ;;  %v4602_v35 = vld [vmem:[%s6953_s5 + $0x3b0] ss:$36 sps:$4 sm:$0xff]   ;;  %v4608_v11 = vld [vmem:[%s6953_s5 + $0x3f8] ss:$36 sps:$4 sm:$0xff]  }
 0x284   : > { %1751 = vmatpush1.bf16.msra.mxu0 %v4542_v44  ;;  %v4599_v33 = vld [vmem:[%s6953_s5 + $0x3ac] ss:$36 sps:$4 sm:$0xff]   ;;  %v4605_v36 = vld [vmem:[%s6953_s5 + $0x3f4] ss:$36 sps:$4 sm:$0xff]   ;;  %v4611_v39 = vld [vmem:[%s6953_s5 + $0x43c] ss:$36 sps:$4 sm:$0xff]  }
 0x285   : > { %1752 = vmatprep.subr.bf16.mxu0 %v4546_v46  ;;  %v4603_v38 = vld [vmem:[%s6953_s5 + $0x3f0] ss:$36 sps:$4 sm:$0xff]   ;;  %v4609_v41 = vld [vmem:[%s6953_s5 + $0x438] ss:$36 sps:$4 sm:$0xff]   ;;  %v4614_v42 = vld [vmem:[%s6953_s5 + $0x440] ss:$36 sps:$4 sm:$0xff]  }
 0x286   : > { %v4617_v43 = vld [vmem:[%s6953_s5 + $0x14] ss:$36 sps:$4 sm:$0xff]   ;;  %v4620_v44 = vld [vmem:[%s6953_s5 + $0x1c] ss:$36 sps:$4 sm:$0xff]  }
 0x288   : > { %v4730_v45 = vpop.eup %4729  ;;  %1753 = vmatpush1.bf16.msra.mxu0 %v4548_v48 }
 0x289   : > { %v4732_v47 = vpop.eup %4731  ;;  %v752_v49 = vmul.f32 1.0614054, %v4730_v45 }
 0x28a   : > { %v753_v50 = vmul.f32 1.0614054, %v4732_v47  ;;  %v4734_v5 = vpop.eup %4733 }
 0x28b   : > { %v754_v51 = vadd.f32 -1.4531521, %v752_v49  ;;  %v4736_v7 = vpop.eup %4735  ;;  %v4551_v49 = vld [vmem:[%s6953_s5 + $0x16c] ss:$36 sps:$4 sm:$0xff]  }
 0x28c   : > { %v755_v53 = vadd.f32 -1.4531521, %v753_v50  ;;  %v4552_v50 = vld [vmem:[%s6953_s5 + $0x174] ss:$36 sps:$4 sm:$0xff]  }
 0x28d   : > { %v756_v55 = vmul.f32 %v4730_v45, %v754_v51  ;;  %v4549_v51 = vld [vmem:[%s6953_s5 + $0x168] ss:$36 sps:$4 sm:$0xff]   ;;  %1754 = vmatprep.subr.bf16.mxu0 %v4552_v50 }
 0x28e   : > { %v757_v56 = vmul.f32 %v4732_v47, %v755_v53  ;;  %v4557_v53 = vld [vmem:[%s6953_s5 + $0x1b4] ss:$36 sps:$4 sm:$0xff]   ;;  %1755 = vmatpush1.bf16.msra.mxu0 %v4554_v52 }
 0x28f   : > { %v758_v57 = vadd.f32 1.4214138, %v756_v55  ;;  %v4555_v55 = vld [vmem:[%s6953_s5 + $0x1b0] ss:$36 sps:$4 sm:$0xff]   ;;  %1756 = vmatprep.subr.bf16.mxu0 %v4558_v54 }
 0x290   : > { %v759_v58 = vadd.f32 1.4214138, %v757_v56  ;;  %v4560_v56 = vld [vmem:[%s6953_s5 + $0x1b8] ss:$36 sps:$4 sm:$0xff]  }
 0x291   : > { %v760_v59 = vmul.f32 %v4730_v45, %v758_v57  ;;  %v4563_v57 = vld [vmem:[%s6953_s5 + $0x1fc] ss:$36 sps:$4 sm:$0xff]  }
 0x292   : > { %v761_v60 = vmul.f32 %v4732_v47, %v759_v58  ;;  %v4564_v58 = vld [vmem:[%s6953_s5 + $0x204] ss:$36 sps:$4 sm:$0xff]   ;;  %1757 = vmatpush1.bf16.msra.mxu0 %v4560_v56 }
 0x293   : > { %v762_v61 = vadd.f32 -0.28449672, %v760_v59  ;;  %v4561_v59 = vld [vmem:[%s6953_s5 + $0x1f8] ss:$36 sps:$4 sm:$0xff]   ;;  %1758 = vmatprep.subr.bf16.mxu0 %v4564_v58 }
 0x294   : > { %v763_v62 = vadd.f32 -0.28449672, %v761_v60  ;;  %v4566_v60 = vld [vmem:[%s6953_s5 + $0x200] ss:$36 sps:$4 sm:$0xff]  }
 0x295   : > { %v764_v63 = vmul.f32 %v4730_v45, %v762_v61  ;;  %v4569_v61 = vld [vmem:[%s6953_s5 + $0x244] ss:$36 sps:$4 sm:$0xff]  }
 0x296   : > { %v765_v0 = vmul.f32 %v4732_v47, %v763_v62  ;;  %v4570_v62 = vld [vmem:[%s6953_s5 + $0x24c] ss:$36 sps:$4 sm:$0xff]   ;;  %1759 = vmatpush1.bf16.msra.mxu0 %v4566_v60 }
 0x297   : > { %v766_v2 = vadd.f32 0.2548296, %v764_v63  ;;  %v4567_v63 = vld [vmem:[%s6953_s5 + $0x240] ss:$36 sps:$4 sm:$0xff]   ;;  %1760 = vmatprep.subr.bf16.mxu0 %v4570_v62 }
 0x298   : > { %v767_v3 = vadd.f32 0.2548296, %v765_v0  ;;  %v4572_v0 = vld [vmem:[%s6953_s5 + $0x248] ss:$36 sps:$4 sm:$0xff]  }
 0x299   : > { %v768_v4 = vmul.f32 %v4730_v45, %v766_v2  ;;  %v4545_v45 = vld [vmem:[%s6953_s5 + $0x124] ss:$36 sps:$4 sm:$0xff]   ;;  %v4575_v2 = vld [vmem:[%s6953_s5 + $0x28c] ss:$36 sps:$4 sm:$0xff]  }
 0x29a   : > { %v769_v6 = vmul.f32 %v4732_v47, %v767_v3  ;;  %v4543_v47 = vld [vmem:[%s6953_s5 + $0x120] ss:$36 sps:$4 sm:$0xff]   ;;  %1711 = vmatprep.subr.bf16.mxu1 %v4545_v45  ;;  %v4576_v3 = vld [vmem:[%s6953_s5 + $0x294] ss:$36 sps:$4 sm:$0xff]   ;;  %1761 = vmatpush1.bf16.msra.mxu0 %v4572_v0 }
 0x29b   : > { %v778_v8 = vmul.f32 %v4734_v5, %v768_v4  ;;  %1712 = vmatpush1.bf16.msra.mxu1 %v4543_v47  ;;  %v4573_v4 = vld [vmem:[%s6953_s5 + $0x288] ss:$36 sps:$4 sm:$0xff]   ;;  %v4578_v5 = vld [vmem:[%s6953_s5 + $0x290] ss:$36 sps:$4 sm:$0xff]   ;;  %1762 = vmatprep.subr.bf16.mxu0 %v4576_v3  ;;  %v336_v45 = vld [vmem:[%s6956_s8] sm:$0xff] }
 0x29c   : > { %v779_v13 = vmul.f32 %v4736_v7, %v769_v6  ;;  %1713 = vmatprep.subr.bf16.mxu1 %v4551_v49  ;;  %v4581_v6 = vld [vmem:[%s6953_s5 + $0x2d4] ss:$36 sps:$4 sm:$0xff]   ;;  %v4582_v7 = vld [vmem:[%s6953_s5 + $0x2dc] ss:$36 sps:$4 sm:$0xff]   ;;  %v1925_v46 = vrot.slane %v336_v45, %v4873_v12 }
 0x29d   : > { %v780_v15 = vsub.f32 1.0, %v778_v8  ;;  %v4579_v8 = vld [vmem:[%s6953_s5 + $0x2d0] ss:$36 sps:$4 sm:$0xff]  }
 0x29e   : > { %v781_v17 = vsub.f32 1.0, %v779_v13  ;;  %1763 = vmatpush1.bf16.msra.mxu0 %v4578_v5  ;;  %v4584_v13 = vld [vmem:[%s6953_s5 + $0x2d8] ss:$36 sps:$4 sm:$0xff]   ;;  %v1933_v47 = vcombine.high %v1925_v46, %v1925_v46  ;;  %v1953_v50 = vpack.i.b16 %v1925_v46, %v1925_v46 }
 0x29f   : > { %v782_v19 = vmul.f32 %v780_v15, %v740_v16  ;;  %1714 = vmatpush1.bf16.msra.mxu1 %v4549_v51  ;;  %1764 = vmatprep.subr.bf16.mxu0 %v4582_v7  ;;  %v4587_v15 = vld [vmem:[%s6953_s5 + $0x31c] ss:$36 sps:$4 sm:$0xff]   ;;  %v4588_v16 = vld [vmem:[%s6953_s5 + $0x324] ss:$36 sps:$4 sm:$0xff]   ;;  %v1918_v51 = vcombine.high %v336_v45, %v336_v45  ;;  %v4639_v45 = vld [vmem:[%s6953_s5 + $0x130] ss:$36 sps:$4 sm:$0xff]  }
 0x2a0   : > { %v783_v20 = vmul.f32 %v781_v17, %v741_v18  ;;  %1715 = vmatprep.subr.bf16.mxu1 %v4557_v53  ;;  %v4585_v17 = vld [vmem:[%s6953_s5 + $0x318] ss:$36 sps:$4 sm:$0xff]   ;;  %v1960_v48 = vpack.i.b16 %v1933_v47, %v1933_v47  ;;  %v2019_v52 = vrot.slane %v1953_v50, %v4864_v9 }
 0x2a1   : > { %v784_v22 = vadd.f32 1.0, %v782_v19  ;;  %v1932_v53 = vrot.slane %v1918_v51, %v4873_v12  ;;  %v4642_v46 = vld [vmem:[%s6953_s5 + $0x138] ss:$36 sps:$4 sm:$0xff]   ;;  %v4648_v51 = vld [vmem:[%s6953_s5 + $0x180] ss:$36 sps:$4 sm:$0xff]  }
 0x2a2   : > { %v785_v25 = vadd.f32 1.0, %v783_v20  ;;  %1765 = vmatpush1.bf16.msra.mxu0 %v4584_v13  ;;  %v5214_v49 = vrot.slane %v1960_v48, %v4866_v10  ;;  %v2023_v56 = vrot.slane %v1960_v48, %v4864_v9  ;;  %v4647_v47 = vld [vmem:[%s6953_s5 + $0x17c] ss:$36 sps:$4 sm:$0xff]   ;;  %v4650_v48 = vld [vmem:[%s6953_s5 + $0x184] ss:$36 sps:$4 sm:$0xff]  }
 0x2a3   : > { %v4995_v26 = vmul.f32 %v784_v22, %v734_v21  ;;  %1716 = vmatpush1.bf16.msra.mxu1 %v4555_v55  ;;  %1766 = vmatprep.subr.bf16.mxu0 %v4588_v16  ;;  %v1967_v54 = vpack.i.b16 %v1932_v53, %v1932_v53 }
 0x2a4   : > { %v4997_v28 = vmul.f32 %v785_v25, %v735_v23  ;;  %1717 = vmatprep.subr.bf16.mxu1 %v4563_v57  ;;  %v5226_v57 = vrot.slane %v1953_v50, %v4866_v10  ;;  %v4645_v50 = vld [vmem:[%s6953_s5 + $0x178] ss:$36 sps:$4 sm:$0xff]  }
 0x2a5   : > { %v2027_v55 = vrot.slane %v1967_v54, %v4864_v9  ;;  %v5233_v58 = vrot.slane %v1967_v54, %v4866_v10  ;;  %v4651_v54 = vld [vmem:[%s6953_s5 + $0x1c0] ss:$36 sps:$4 sm:$0xff]  }
 0x2a6   : > { %v788_v29 = vadd.f32 %v4997_v28, %v4995_v26 }
 0x2a7   : > { %1718 = vmatpush1.bf16.msra.mxu1 %v4561_v59  ;;  %v1934_v59 = vcombine.high %v1932_v53, %v1932_v53  ;;  %v4656_v53 = vld [vmem:[%s6953_s5 + $0x1cc] ss:$36 sps:$4 sm:$0xff]  }
 0x2a8   : > { %789 = vadd.xlane.f32.xlu0 %v788_v29  ;;  %1719 = vmatprep.subr.bf16.mxu1 %v4569_v61  ;;  %v4590_v29 = vld [vmem:[%s6953_s5 + $0x320] ss:$36 sps:$4 sm:$0xff]  }
 0x2a9   : > { %1767 = vmatpush1.bf16.msra.mxu0 %v4590_v29  ;;  %v1974_v60 = vpack.i.b16 %v1934_v59, %v1934_v59  ;;  %v4662_v59 = vld [vmem:[%s6953_s5 + $0x214] ss:$36 sps:$4 sm:$0xff]  }
 0x2ab   : > { %1720 = vmatpush1.bf16.msra.mxu1 %v4567_v63  ;;  %v5242_v61 = vrot.slane %v1974_v60, %v4866_v10  ;;  %v2031_v62 = vrot.slane %v1974_v60, %v4864_v9  ;;  %v337_v63 = vld [vmem:[%s6956_s8 + $0x8] sm:$0xff] }
 0x2ac   : > { %1721 = vmatprep.subr.bf16.mxu1 %v4575_v2  ;;  %v1942_v0 = vrot.slane %v337_v63, %v4873_v12  ;;  %v1935_v2 = vcombine.high %v337_v63, %v337_v63  ;;  %v4657_v60 = vld [vmem:[%s6953_s5 + $0x208] ss:$36 sps:$4 sm:$0xff]   ;;  %v4665_v63 = vld [vmem:[%s6953_s5 + $0x254] ss:$36 sps:$4 sm:$0xff]  }
 0x2ae   : > { %v1981_v3 = vpack.i.b16 %v1942_v0, %v1942_v0  ;;  %v1949_v5 = vrot.slane %v1935_v2, %v4873_v12  ;;  %v4663_v2 = vld [vmem:[%s6953_s5 + $0x250] ss:$36 sps:$4 sm:$0xff]  }
 0x2af   : > { %1722 = vmatpush1.bf16.msra.mxu1 %v4573_v4  ;;  %v1950_v4 = vcombine.high %v1942_v0, %v1942_v0  ;;  %v4668_v0 = vld [vmem:[%s6953_s5 + $0x25c] ss:$36 sps:$4 sm:$0xff]  }
 0x2b0   : > { %1723 = vmatprep.subr.bf16.mxu1 %v4581_v6  ;;  %v5264_v6 = vrot.slane %v1981_v3, %v4866_v10  ;;  %v2035_v13 = vrot.slane %v1981_v3, %v4864_v9  ;;  %v4666_v3 = vld [vmem:[%s6953_s5 + $0x258] ss:$36 sps:$4 sm:$0xff]  }
 0x2b1   : > { %v1988_v7 = vpack.i.b16 %v1950_v4, %v1950_v4  ;;  %v4671_v4 = vld [vmem:[%s6953_s5 + $0x29c] ss:$36 sps:$4 sm:$0xff]  }
 0x2b3   : > { %1724 = vmatpush1.bf16.msra.mxu1 %v4579_v8  ;;  %v1951_v8 = vcombine.high %v1949_v5, %v1949_v5  ;;  %v2039_v16 = vrot.slane %v1988_v7, %v4864_v9 }
 0x2b4   : > { %1725 = vmatprep.subr.bf16.mxu1 %v4587_v15  ;;  %v5270_v15 = vrot.slane %v1988_v7, %v4866_v10  ;;  %v4669_v7 = vld [vmem:[%s6953_s5 + $0x298] ss:$36 sps:$4 sm:$0xff]  }
 0x2b7   : > { %1726 = vmatpush1.bf16.msra.mxu1 %v4585_v17  ;;  %v2002_v17 = vpack.i.b16 %v1951_v8, %v1951_v8  ;;  %v4672_v8 = vld [vmem:[%s6953_s5 + $0x2a0] ss:$36 sps:$4 sm:$0xff]  }
 0x2b9   : > { %v2047_v29 = vrot.slane %v2002_v17, %v4864_v9 }
 0x2be   : > { %2106 = vrot.lane.b32.xlu0 %v5226_v57, %s4791_s15 }
 0x2c2   : > { %2110 = vrot.lane.b32.xlu0 %v5233_v58, %s4791_s15 }
 0x2c6   : > { %2058 = vrot.lane.b32.xlu0 %v2023_v56, %s4792_s16 }
 0x2ca   : > { %2148 = vrot.lane.b32.xlu0 %v2019_v52, %s4793_s18 }
 0x2ce   : > { %2152 = vrot.lane.b32.xlu0 %v2027_v55, %s4793_s18 }
 0x2d2   : > { %2192 = vrot.lane.b32.xlu0 %v5214_v49, %s4794_s19 }
 0x2d6   : > { %2232 = vrot.lane.b32.xlu0 %v2019_v52, %s4795_s22 }
 0x2da   : > { %2236 = vrot.lane.b32.xlu0 %v2027_v55, %s4795_s22 }
 0x2de   : > { %2114 = vrot.lane.b32.xlu0 %v5264_v6, %s4791_s15 }
 0x2e2   : > { %2064 = vrot.lane.b32.xlu0 %v2035_v13, %s4792_s16 }
 0x2e6   : > { %2156 = vrot.lane.b32.xlu0 %v2035_v13, %s4793_s18 }
 0x2ea   : > { %2198 = vrot.lane.b32.xlu0 %v5264_v6, %s4794_s19 }
 0x2ee   : > { %2240 = vrot.lane.b32.xlu0 %v2035_v13, %s4795_s22  ;;  %v4677_v13 = vld [vmem:[%s6953_s5 + $0x2e4] ss:$36 sps:$4 sm:$0xff]  }
 0x335   : > { %v790_v18 = vpop.xlane.xlu0 %789 }
 0x336   : > { %v792_v19 = vmul.f32 0.00390625, %v790_v18 }
 0x338   : > { %v5143_v20 = vsub.f32 %v4995_v26, %v792_v19  ;;  %v5146_v21 = vsub.f32 %v4997_v28, %v792_v19  ;;  %v4593_v26 = vld [vmem:[%s6953_s5 + $0x364] ss:$36 sps:$4 sm:$0xff]   ;;  %v4594_v28 = vld [vmem:[%s6953_s5 + $0x36c] ss:$36 sps:$4 sm:$0xff]   ;;  %v5278_v19 = vrot.slane %v2002_v17, %v4866_v10 }
 0x339   : > { %1727 = vmatprep.subr.bf16.mxu1 %v4593_v26  ;;  %1768 = vmatprep.subr.bf16.mxu0 %v4594_v28  ;;  %v4675_v17 = vld [vmem:[%s6953_s5 + $0x2e0] ss:$36 sps:$4 sm:$0xff]  }
 0x33a   : > { %v795_v22 = vmul.f32 %v5143_v20, %v5143_v20  ;;  %v796_v23 = vmul.f32 %v5146_v21, %v5146_v21  ;;  %1728 = vmatpush1.bf16.msra.mxu1 %v4591_v30  ;;  %1769 = vmatpush1.bf16.msra.mxu0 %v4596_v32 }
 0x33b   : > { %1729 = vmatprep.subr.bf16.mxu1 %v4599_v33  ;;  %1770 = vmatprep.subr.bf16.mxu0 %v4600_v34  ;;  %v4621_v34 = vld [vmem:[%s6953_s5 + $0x58] ss:$36 sps:$4 sm:$0xff]  }
 0x33c   : > { %v797_v25 = vadd.f32 %v796_v23, %v795_v22  ;;  %v1995_v23 = vpack.i.b16 %v1949_v5, %v1949_v5  ;;  %v4674_v5 = vld [vmem:[%s6953_s5 + $0x2a4] ss:$36 sps:$4 sm:$0xff]  }
 0x33e   : > { %798 = vadd.xlane.f32.xlu1 %v797_v25  ;;  %1730 = vmatpush1.bf16.msra.mxu1 %v4597_v31  ;;  %v5286_v25 = vrot.slane %v1995_v23, %v4864_v9  ;;  %v5293_v26 = vrot.slane %v1995_v23, %v4866_v10  ;;  %v4615_v9 = vld [vmem:[%s6953_s5 + $0x10] ss:$36 sps:$4 sm:$0xff]   ;;  %v4618_v10 = vld [vmem:[%s6953_s5 + $0x18] ss:$36 sps:$4 sm:$0xff]   ;;  %v4681_v23 = vld [vmem:[%s6953_s5 + $0x328] ss:$36 sps:$4 sm:$0xff]  }
 0x33f   : > { %1771 = vmatpush1.bf16.msra.mxu0 %v4602_v35  ;;  %1731 = vmatprep.subr.bf16.mxu1 %v4605_v36  ;;  %v4624_v35 = vld [vmem:[%s6953_s5 + $0x60] ss:$36 sps:$4 sm:$0xff]  }
 0x340   : > { %1772 = vmatprep.subr.bf16.mxu0 %v4606_v37  ;;  %2118 = vrot.lane.b32.xlu0 %v5293_v26, %s4791_s15  ;;  %v4629_v36 = vld [vmem:[%s6953_s5 + $0xa4] ss:$36 sps:$4 sm:$0xff]   ;;  %v4632_v37 = vld [vmem:[%s6953_s5 + $0xac] ss:$36 sps:$4 sm:$0xff]  }
 0x342   : > { %1732 = vmatpush1.bf16.msra.mxu1 %v4603_v38  ;;  %v4627_v38 = vld [vmem:[%s6953_s5 + $0xa0] ss:$36 sps:$4 sm:$0xff]  }
 0x343   : > { %1773 = vmatpush1.bf16.msra.mxu0 %v4608_v11  ;;  %1733 = vmatprep.subr.bf16.mxu1 %v4611_v39  ;;  %v4630_v11 = vld [vmem:[%s6953_s5 + $0xa8] ss:$36 sps:$4 sm:$0xff]  }
 0x344   : > { %1774 = vmatprep.subr.bf16.mxu0 %v4612_v40  ;;  %2068 = vrot.lane.b32.xlu0 %v5286_v25, %s4792_s16  ;;  %v4635_v39 = vld [vmem:[%s6953_s5 + $0xec] ss:$36 sps:$4 sm:$0xff]   ;;  %v4638_v40 = vld [vmem:[%s6953_s5 + $0xf4] ss:$36 sps:$4 sm:$0xff]  }
 0x346   : > { %1734 = vmatpush1.bf16.msra.mxu1 %v4609_v41  ;;  %v4633_v41 = vld [vmem:[%s6953_s5 + $0xe8] ss:$36 sps:$4 sm:$0xff]  }
 0x347   : > { %1775 = vmatpush1.bf16.msra.mxu0 %v4614_v42  ;;  %1785 = vmatprep.subr.bf16.mxu1 %v4617_v43  ;;  %v4636_v42 = vld [vmem:[%s6953_s5 + $0xf0] ss:$36 sps:$4 sm:$0xff]  }
 0x348   : > { %1826 = vmatprep.subr.bf16.mxu0 %v4620_v44  ;;  %2158 = vrot.lane.b32.xlu0 %v2039_v16, %s4793_s18  ;;  %v4641_v43 = vld [vmem:[%s6953_s5 + $0x134] ss:$36 sps:$4 sm:$0xff]   ;;  %v4644_v44 = vld [vmem:[%s6953_s5 + $0x13c] ss:$36 sps:$4 sm:$0xff]  }
 0x34c   : > { %2070 = vrot.lane.b32.xlu0 %v2047_v29, %s4792_s16 }
 0x34f   : > { %2108 = vrot.lane.b32.xlu1 %v5214_v49, %s4791_s15 }
 0x350   : > { %2200 = vrot.lane.b32.xlu0 %v5270_v15, %s4794_s19 }
 0x353   : > { %2056 = vrot.lane.b32.xlu1 %v2019_v52, %s4792_s16  ;;  %v4653_v52 = vld [vmem:[%s6953_s5 + $0x1c4] ss:$36 sps:$4 sm:$0xff]  }
 0x354   : > { %2204 = vrot.lane.b32.xlu0 %v5278_v19, %s4794_s19 }
 0x357   : > { %2060 = vrot.lane.b32.xlu1 %v2027_v55, %s4792_s16  ;;  %v4654_v55 = vld [vmem:[%s6953_s5 + $0x1c8] ss:$36 sps:$4 sm:$0xff]  }
 0x358   : > { %2244 = vrot.lane.b32.xlu0 %v5286_v25, %s4795_s22 }
 0x35b   : > { %2150 = vrot.lane.b32.xlu1 %v2023_v56, %s4793_s18 }
 0x35f   : > { %2190 = vrot.lane.b32.xlu1 %v5226_v57, %s4794_s19 }
 0x363   : > { %2194 = vrot.lane.b32.xlu1 %v5233_v58, %s4794_s19 }
 0x367   : > { %2234 = vrot.lane.b32.xlu1 %v2023_v56, %s4795_s22  ;;  %v4659_v56 = vld [vmem:[%s6953_s5 + $0x20c] ss:$36 sps:$4 sm:$0xff]  }
 0x36b   : > { %2112 = vrot.lane.b32.xlu1 %v5242_v61, %s4791_s15 }
 0x36f   : > { %2062 = vrot.lane.b32.xlu1 %v2031_v62, %s4792_s16 }
 0x373   : > { %2154 = vrot.lane.b32.xlu1 %v2031_v62, %s4793_s18 }
 0x377   : > { %2196 = vrot.lane.b32.xlu1 %v5242_v61, %s4794_s19 }
 0x37b   : > { %2238 = vrot.lane.b32.xlu1 %v2031_v62, %s4795_s22  ;;  %v4660_v62 = vld [vmem:[%s6953_s5 + $0x210] ss:$36 sps:$4 sm:$0xff]  }
 0x37f   : > { %2116 = vrot.lane.b32.xlu1 %v5270_v15, %s4791_s15 }
 0x383   : > { %2066 = vrot.lane.b32.xlu1 %v2039_v16, %s4792_s16  ;;  %s4799_s16 = smov 94  }
 0x387   : > { %2120 = vrot.lane.b32.xlu1 %v5278_v19, %s4791_s15 }
 0x38b   : > { %2160 = vrot.lane.b32.xlu1 %v5286_v25, %s4793_s18  ;;  %v4684_v25 = vld [vmem:[%s6953_s5 + $0x330] ss:$36 sps:$4 sm:$0xff]  }
 0x38f   : > { %2162 = vrot.lane.b32.xlu1 %v2047_v29, %s4793_s18 }
 0x393   : > { %2202 = vrot.lane.b32.xlu1 %v5293_v26, %s4794_s19 }
 0x397   : > { %2242 = vrot.lane.b32.xlu1 %v2039_v16, %s4795_s22  ;;  %v4680_v16 = vld [vmem:[%s6953_s5 + $0x2ec] ss:$36 sps:$4 sm:$0xff]  }
 0x39b   : > { %2246 = vrot.lane.b32.xlu1 %v2047_v29, %s4795_s22  ;;  %v4689_v29 = vld [vmem:[%s6953_s5 + $0x374] ss:$36 sps:$4 sm:$0xff]   ;;  %s4465_s22 = sshll.u32 %s6961_s10, 6 }
 0x3cb   : > { %v799_v12 = vpop.xlane.xlu1 %798 }
 0x3cc   : > { %v800_v18 = vmul.f32 0.00390625, %v799_v12  ;;  %v4678_v12 = vld [vmem:[%s6953_s5 + $0x2e8] ss:$36 sps:$4 sm:$0xff]  }
 0x3ce   : > { %v801_v22 = vadd.f32 1e-05, %v800_v18  ;;  %v4683_v18 = vld [vmem:[%s6953_s5 + $0x32c] ss:$36 sps:$4 sm:$0xff]  }
 0x3d0   : > { %4737 = vrsqrt.f32 %v801_v22  ;;  %v4686_v22 = vld [vmem:[%s6953_s5 + $0x334] ss:$36 sps:$4 sm:$0xff]  }
 0x3da   : > { %v4738_v28 = vpop.eup %4737 }
 0x3db   : > { %v804_v30 = vmul.f32 %v4738_v28, %v5146_v21  ;;  %v803_v32 = vmul.f32 %v4738_v28, %v5143_v20  ;;  %v4623_v20 = vld [vmem:[%s6953_s5 + $0x5c] ss:$36 sps:$4 sm:$0xff]   ;;  %v4626_v21 = vld [vmem:[%s6953_s5 + $0x64] ss:$36 sps:$4 sm:$0xff]  }
 0x3dc   : > { %v4692_v28 = vld [vmem:[%s6953_s5 + $0x37c] ss:$36 sps:$4 sm:$0xff]  }
 0x3dd   : > { %v5300_v31 = vpack.c.bf16 %v804_v30, %v804_v30  ;;  %v5308_v33 = vpack.c.bf16 %v803_v32, %v803_v32  ;;  %v4687_v30 = vld [vmem:[%s6953_s5 + $0x370] ss:$36 sps:$4 sm:$0xff]   ;;  %v4690_v32 = vld [vmem:[%s6953_s5 + $0x378] ss:$36 sps:$4 sm:$0xff]  }
 0x3df   : > { %1735 = vmatprep.mubr.bf16.mxu1 %v5300_v31  ;;  %1776 = vmatprep.mubr.bf16.mxu0 %v5300_v31 }
 0x3e0   : > { %1736 = vmatmul.mubr.bf16.vlgmr.msra.gmra.mrb[4].mxu1 %v5308_v33  ;;  %1777 = vmatmul.mubr.bf16.vlgmr.msra.gmra.mrb[0].mxu0 %v5308_v33 }
 0x3e1   : > { %1786 = vmatpush1.bf16.msra.mxu1 %v4615_v9  ;;  %1827 = vmatpush1.bf16.msra.mxu0 %v4618_v10  ;;  %v4695_v9 = vld [vmem:[%s6953_s5 + $0x3bc] ss:$36 sps:$4 sm:$0xff]   ;;  %v4698_v10 = vld [vmem:[%s6953_s5 + $0x3c4] ss:$36 sps:$4 sm:$0xff]  }
 0x3e2   : > { %1817 = vmatprep.mubr.bf16.mxu1 %v5300_v31  ;;  %1858 = vmatprep.mubr.bf16.mxu0 %v5300_v31 }
 0x3e3   : > { %1787 = vmatprep.subr.bf16.mxu1 %v4623_v20  ;;  %1828 = vmatprep.subr.bf16.mxu0 %v4626_v21  ;;  %v4693_v20 = vld [vmem:[%s6953_s5 + $0x3b8] ss:$36 sps:$4 sm:$0xff]   ;;  %v4696_v21 = vld [vmem:[%s6953_s5 + $0x3c0] ss:$36 sps:$4 sm:$0xff]  }
 0x3e5   : > { %1788 = vmatpush1.bf16.msra.mxu1 %v4621_v34  ;;  %1829 = vmatpush1.bf16.msra.mxu0 %v4624_v35  ;;  %v4701_v34 = vld [vmem:[%s6953_s5 + $0x404] ss:$36 sps:$4 sm:$0xff]   ;;  %v4704_v35 = vld [vmem:[%s6953_s5 + $0x40c] ss:$36 sps:$4 sm:$0xff]  }
 0x3e6   : > { %1789 = vmatprep.subr.bf16.mxu1 %v4629_v36  ;;  %1830 = vmatprep.subr.bf16.mxu0 %v4632_v37  ;;  %v4699_v36 = vld [vmem:[%s6953_s5 + $0x400] ss:$36 sps:$4 sm:$0xff]   ;;  %v4702_v37 = vld [vmem:[%s6953_s5 + $0x408] ss:$36 sps:$4 sm:$0xff]  }
 0x3e9   : > { %1790 = vmatpush1.bf16.msra.mxu1 %v4627_v38  ;;  %1831 = vmatpush1.bf16.msra.mxu0 %v4630_v11  ;;  %v4707_v38 = vld [vmem:[%s6953_s5 + $0x44c] ss:$36 sps:$4 sm:$0xff]   ;;  %v4710_v11 = vld [vmem:[%s6953_s5 + $0x454] ss:$36 sps:$4 sm:$0xff]  }
 0x3ea   : > { %1791 = vmatprep.subr.bf16.mxu1 %v4635_v39  ;;  %1832 = vmatprep.subr.bf16.mxu0 %v4638_v40  ;;  %v4705_v39 = vld [vmem:[%s6953_s5 + $0x448] ss:$36 sps:$4 sm:$0xff]   ;;  %v4708_v40 = vld [vmem:[%s6953_s5 + $0x450] ss:$36 sps:$4 sm:$0xff]  }
 0x3ed   : > { %1792 = vmatpush1.bf16.msra.mxu1 %v4633_v41  ;;  %1833 = vmatpush1.bf16.msra.mxu0 %v4636_v42  ;;  %v4712_v41 = vld [vmem:[%s6953_s5 + $0x260] ss:$36 sps:$4 sm:$0xff]  }
 0x3ee   : > { %1793 = vmatprep.subr.bf16.mxu1 %v4641_v43  ;;  %1834 = vmatprep.subr.bf16.mxu0 %v4644_v44  ;;  %v4713_v42 = vld [vmem:[%s6953_s5 + $0x20] ss:$36 sps:$4 sm:$0xff]   ;;  %v4714_v43 = vld [vmem:[%s6953_s5 + $0x2a8] ss:$36 sps:$4 sm:$0xff]  }
 0x3ef   : > { %v4715_v44 = vld [vmem:[%s6953_s5 + $0x68] ss:$36 sps:$4 sm:$0xff]  }
 0x3f1   : > { %1794 = vmatpush1.bf16.msra.mxu1 %v4639_v45  ;;  %1835 = vmatpush1.bf16.msra.mxu0 %v4642_v46  ;;  %v4716_v45 = vld [vmem:[%s6953_s5 + $0x2f0] ss:$36 sps:$4 sm:$0xff]  }
 0x3f2   : > { %1795 = vmatprep.subr.bf16.mxu1 %v4647_v47  ;;  %1836 = vmatprep.subr.bf16.mxu0 %v4650_v48  ;;  %v4717_v46 = vld [vmem:[%s6953_s5 + $0xb0] ss:$36 sps:$4 sm:$0xff]   ;;  %v4719_v47 = vld [vmem:[%s6953_s5 + $0xf8] ss:$36 sps:$4 sm:$0xff]   ;;  %v4720_v48 = vld [vmem:[%s6953_s5 + $0x380] ss:$36 sps:$4 sm:$0xff]  }
 0x3f5   : > { %1796 = vmatpush1.bf16.msra.mxu1 %v4645_v50  ;;  %1837 = vmatpush1.bf16.msra.mxu0 %v4648_v51  ;;  %v4721_v50 = vld [vmem:[%s6953_s5 + $0x140] ss:$36 sps:$4 sm:$0xff]   ;;  %v4722_v51 = vld [vmem:[%s6953_s5 + $0x3c8] ss:$36 sps:$4 sm:$0xff]  }
 0x3f6   : > { %1797 = vmatprep.subr.bf16.mxu1 %v4653_v52  ;;  %1838 = vmatprep.subr.bf16.mxu0 %v4656_v53  ;;  %v4723_v52 = vld [vmem:[%s6953_s5 + $0x188] ss:$36 sps:$4 sm:$0xff]   ;;  %v4724_v53 = vld [vmem:[%s6953_s5 + $0x410] ss:$36 sps:$4 sm:$0xff]  }
 0x3f9   : > { %1798 = vmatpush1.bf16.msra.mxu1 %v4651_v54  ;;  %1839 = vmatpush1.bf16.msra.mxu0 %v4654_v55  ;;  %v4725_v54 = vld [vmem:[%s6953_s5 + $0x1d0] ss:$36 sps:$4 sm:$0xff]   ;;  %v4726_v55 = vld [vmem:[%s6953_s5 + $0x458] ss:$36 sps:$4 sm:$0xff]  }
 0x3fa   : > { %1799 = vmatprep.subr.bf16.mxu1 %v4659_v56  ;;  %1840 = vmatprep.subr.bf16.mxu0 %v4662_v59  ;;  %v4727_v56 = vld [vmem:[%s6953_s5 + $0x218] ss:$36 sps:$4 sm:$0xff]   ;;  %v5564_v59 = vpop.permute.xlu0 %2106 }
 0x3fd   : > { %1800 = vmatpush1.bf16.msra.mxu1 %v4657_v60  ;;  %1841 = vmatpush1.bf16.msra.mxu0 %v4660_v62  ;;  %v5566_v60 = vpop.permute.xlu1 %2108 }
 0x3fe   : > { %1801 = vmatprep.subr.bf16.mxu1 %v4665_v63  ;;  %1842 = vmatprep.subr.bf16.mxu0 %v4668_v0  ;;  %v5568_v62 = vpop.permute.xlu0 %2110 }
 0x401   : > { %1802 = vmatpush1.bf16.msra.mxu1 %v4663_v2  ;;  %1843 = vmatpush1.bf16.msra.mxu0 %v4666_v3  ;;  %v2057_v63 = vpop.permute.xlu1 %2056 }
 0x402   : > { %1803 = vmatprep.subr.bf16.mxu1 %v4671_v4  ;;  %1844 = vmatprep.subr.bf16.mxu0 %v4674_v5  ;;  %v2059_v0 = vpop.permute.xlu0 %2058 }
 0x405   : > { %1804 = vmatpush1.bf16.msra.mxu1 %v4669_v7  ;;  %1845 = vmatpush1.bf16.msra.mxu0 %v4672_v8  ;;  %v5570_v2 = vpop.permute.xlu1 %2060 }
 0x406   : > { %1805 = vmatprep.subr.bf16.mxu1 %v4677_v13  ;;  %1846 = vmatprep.subr.bf16.mxu0 %v4680_v16  ;;  %v5572_v3 = vpop.permute.xlu0 %2148 }
 0x409   : > { %1806 = vmatpush1.bf16.msra.mxu1 %v4675_v17  ;;  %1847 = vmatpush1.bf16.msra.mxu0 %v4678_v12  ;;  %v5574_v4 = vpop.permute.xlu1 %2150 }
 0x40a   : > { %1807 = vmatprep.subr.bf16.mxu1 %v4683_v18  ;;  %1848 = vmatprep.subr.bf16.mxu0 %v4686_v22  ;;  %v5576_v5 = vpop.permute.xlu0 %2152 }
 0x40d   : > { %1808 = vmatpush1.bf16.msra.mxu1 %v4681_v23  ;;  %1849 = vmatpush1.bf16.msra.mxu0 %v4684_v25  ;;  %v2191_v25 = vpop.permute.xlu1 %2190 }
 0x40e   : > { %1809 = vmatprep.subr.bf16.mxu1 %v4689_v29  ;;  %1850 = vmatprep.subr.bf16.mxu0 %v4692_v28 }
 0x411   : > { %1810 = vmatpush1.bf16.msra.mxu1 %v4687_v30  ;;  %1851 = vmatpush1.bf16.msra.mxu0 %v4690_v32  ;;  %v2193_v30 = vpop.permute.xlu0 %2192 }
 0x412   : > { %1811 = vmatprep.subr.bf16.mxu1 %v4695_v9  ;;  %1852 = vmatprep.subr.bf16.mxu0 %v4698_v10  ;;  %v2074_v10 = vsel %vm2072_vm13, %v2059_v0, %v5570_v2 }
 0x415   : > { %1812 = vmatpush1.bf16.msra.mxu1 %v4693_v20  ;;  %1853 = vmatpush1.bf16.msra.mxu0 %v4696_v21  ;;  %v2195_v20 = vpop.permute.xlu1 %2194  ;;  %v2233_v21 = vpop.permute.xlu0 %2232 }
 0x416   : > { %1813 = vmatprep.subr.bf16.mxu1 %v4701_v34  ;;  %1854 = vmatprep.subr.bf16.mxu0 %v4704_v35 }
 0x419   : > { %1814 = vmatpush1.bf16.msra.mxu1 %v4699_v36  ;;  %1855 = vmatpush1.bf16.msra.mxu0 %v4702_v37  ;;  %v2208_v36 = vsel %vm2206_vm14, %v2193_v30, %v2195_v20  ;;  %v2235_v37 = vpop.permute.xlu1 %2234 }
 0x41a   : > { %1815 = vmatprep.subr.bf16.mxu1 %v4707_v38  ;;  %1856 = vmatprep.subr.bf16.mxu0 %v4710_v11 }
 0x41d   : > { %1816 = vmatpush1.bf16.msra.mxu1 %v4705_v39  ;;  %1857 = vmatpush1.bf16.msra.mxu0 %v4708_v40  ;;  %v2237_v39 = vpop.permute.xlu0 %2236 }
 0x41e   : > { %4466 = vmatprep.subr.bf16.mxu1 %v4712_v41  ;;  %v2250_v41 = vsel %vm2248_vm15, %v2235_v37, %v2237_v39 }
 0x420   : > { %1818 = vmatmul.mubr.bf16.vlgmr.msra.gmra.mrb[8].mxu1 %v5308_v33  ;;  %1859 = vmatmul.mubr.bf16.vlgmr.msra.gmra.mrb[4].mxu0 %v5308_v33 }
 0x421   : > { %4467 = vmatpush3.bf16.msra.mxu1 %v4713_v42  ;;  %1899 = vmatprep.mubr.bf16.mxu1 %v5300_v31  ;;  %v4718_v31 = vld [vmem:[%s6953_s5 + $0x338] ss:$36 sps:$4 sm:$0xff]   ;;  %v5611_v42 = vpop.permute.xlu1 %2112 }
 0x422   : > { %4468 = vmatprep.subr.bf16.mxu1 %v4714_v43  ;;  %2762 = vmatprep.mubr.bf16.mxu0 %v4789_v1 }
 0x425   : > { %4469 = vmatpush3.bf16.msra.mxu1 %v4715_v44  ;;  %v2073_v44 = vsel %vm2072_vm13, %v2057_v63, %v2059_v0  ;;  %v5642_v0 = vpop.permute.xlu0 %2114 }
 0x426   : > { %4470 = vmatprep.subr.bf16.mxu1 %v4716_v45  ;;  %v5619_v45 = vpop.permute.xlu1 %2062 }
 0x429   : > { %4471 = vmatpush3.bf16.msra.mxu1 %v4717_v46 }
 0x42a   : > { %4472 = vmatprep.subr.bf16.mxu1 %v4718_v31 }
 0x42d   : > { %4473 = vmatpush3.bf16.msra.mxu1 %v4719_v47  ;;  %v2207_v47 = vsel %vm2206_vm14, %v2191_v25, %v2193_v30 }
 0x42e   : > { %4474 = vmatprep.subr.bf16.mxu1 %v4720_v48  ;;  %v2249_v48 = vsel %vm2248_vm15, %v2233_v21, %v2235_v37 }
 0x431   : > { %4475 = vmatpush3.bf16.msra.mxu1 %v4721_v50 }
 0x432   : > { %4476 = vmatprep.subr.bf16.mxu1 %v4722_v51 }
 0x435   : > { %4477 = vmatpush3.bf16.msra.mxu1 %v4723_v52  ;;  %v2123_v52 = vsel %vm2122_vm1, %v5564_v59, %v5566_v60 }
 0x436   : > { %4478 = vmatprep.subr.bf16.mxu1 %v4724_v53  ;;  %v2155_v53 = vpop.permute.xlu1 %2154 }
 0x439   : > { %4479 = vmatpush3.bf16.msra.mxu1 %v4725_v54 }
 0x43a   : > { %4480 = vmatprep.subr.bf16.mxu1 %v4726_v55 }
 0x43d   : > { %4481 = vmatpush3.bf16.msra.mxu1 %v4727_v56  ;;  %v2165_v56 = vsel %vm2164_vm2, %v5572_v3, %v5574_v4 }
 0x440   : > { %1900 = vmatmul.mubr.bf16.vlgmr.msra.gmra.mrb[12].mxu1 %v5308_v33 }
 0x441   : > { %2844 = vmatprep.mubr.bf16.mxu1 %v4789_v1 }
 0x4b3   : > { %v1737_v7 = vpop.f32.mrb[4].mxu1  ;;  %v1778_v33 = vpop.f32.mrb[0].mxu0 }
 0x4b4   : > { %v5578_v8 = vpack.c.bf16 %v1737_v7, %v1737_v7  ;;  %v5580_v13 = vpack.c.bf16 %v1778_v33, %v1778_v33  ;;  %v1739_v16 = vpop.f32.mrb[5].mxu1  ;;  %v1780_v17 = vpop.f32.mrb[1].mxu0 }
 0x4b5   : > { %v1741_v12 = vpop.f32.mrb[6].mxu1  ;;  %v1782_v18 = vpop.f32.mrb[2].mxu0  ;;  %v5586_v29 = vpack.c.bf16 %v1739_v16, %v1739_v16  ;;  %v5588_v28 = vpack.c.bf16 %v1780_v17, %v1780_v17 }
 0x4b6   : > { %2402 = vrot.lane.b32.xlu0 %v5580_v13, %s4785_s20  ;;  %v1783_v22 = vpop.f32.mrb[3].mxu0  ;;  %2398 = vrot.lane.b32.xlu1 %v5578_v8, %s4785_s20  ;;  %v1742_v23 = vpop.f32.mrb[7].mxu1  ;;  %v2283_v32 = vrot.slane %v5578_v8, 4  ;;  %v2285_v9 = vrot.slane %v5580_v13, 4  ;;  %v2089_v34 = vmul.bf16 %v2057_v63, %v5578_v8  ;;  %v2091_v35 = vmul.bf16 %v2074_v10, %v5580_v13 }
 0x4b7   : > { %v2223_v38 = vmul.bf16 %v2191_v25, %v5578_v8  ;;  %v2225_v11 = vmul.bf16 %v2208_v36, %v5580_v13  ;;  %v2265_v40 = vmul.bf16 %v2233_v21, %v5578_v8  ;;  %v2267_v43 = vmul.bf16 %v2250_v41, %v5580_v13  ;;  %v5646_v7 = vpop.permute.xlu1 %2196 }
 0x4b8   : > { %v2284_v46 = vrot.slane %v5586_v29, 4  ;;  %v2090_v31 = vmul.bf16 %v2073_v44, %v5586_v29  ;;  %v2266_v50 = vmul.bf16 %v2249_v48, %v5586_v29  ;;  %v2224_v51 = vmul.bf16 %v2207_v47, %v5586_v29 }
 0x4b9   : > { %v2286_v54 = vrot.slane %v5588_v28, 4  ;;  %v2140_v55 = vmul.bf16 %v2123_v52, %v5586_v29  ;;  %v2075_v63 = vsel %vm2072_vm13, %v5570_v2, %v5619_v45  ;;  %v2182_v17 = vmul.bf16 %v2165_v56, %v5586_v29  ;;  %v5654_v2 = vpop.permute.xlu0 %2064 }
 0x4ba   : > { %2404 = vrot.lane.b32.xlu0 %v5588_v28, %s4785_s20  ;;  %2400 = vrot.lane.b32.xlu1 %v5586_v29, %s4785_s20  ;;  %v2092_v33 = vmul.bf16 %v2075_v63, %v5588_v28  ;;  %v2209_v12 = vsel %vm2206_vm14, %v2195_v20, %v5646_v7  ;;  %v2124_v25 = vsel %vm2122_vm1, %v5566_v60, %v5568_v62 }
 0x4bb   : > { %v2363_v16 = vrot.slane %v2140_v55, 4  ;;  %v2226_v18 = vmul.bf16 %v2209_v12, %v5588_v28  ;;  %v2434_v22 = vrot.slane %v2182_v17, 4  ;;  %v5657_v23 = vpop.permute.xlu1 %2238  ;;  %v2141_v10 = vmul.bf16 %v2124_v25, %v5580_v13 }
 0x4bc   : > { %v2251_v30 = vsel %vm2248_vm15, %v2237_v39, %v5657_v23  ;;  %v2166_v60 = vsel %vm2164_vm2, %v5574_v4, %v5576_v5  ;;  %v2181_v4 = vmul.bf16 %v5572_v3, %v5578_v8  ;;  %v2125_v44 = vsel %vm2122_vm1, %v5568_v62, %v5611_v42 }
 0x4bd   : > { %v2364_v21 = vrot.slane %v2141_v10, 4  ;;  %v2183_v36 = vmul.bf16 %v2166_v60, %v5580_v13  ;;  %v2142_v52 = vmul.bf16 %v2125_v44, %v5588_v28  ;;  %v2167_v62 = vsel %vm2164_vm2, %v5576_v5, %v2155_v53 }
 0x4be   : > { %2292 = vrot.lane.b32.xlu0 %v2283_v32, %s4782_s17  ;;  %2296 = vrot.lane.b32.xlu1 %v2285_v9, %s4782_s17  ;;  %v2433_v3 = vrot.slane %v2181_v4, 4  ;;  %v2076_v5 = vsel %vm2072_vm13, %v5619_v45, %v5654_v2 }
 0x4c2   : > { %2327 = vrot.lane.b32.xlu1 %v2089_v34, %s4786_s21  ;;  %2331 = vrot.lane.b32.xlu0 %v2091_v35, %s4786_s21  ;;  %v2139_v34 = vmul.bf16 %v5564_v59, %v5578_v8 }
 0x4c4   : > { %v2362_v35 = vrot.slane %v2139_v34, 4 }
 0x4c6   : > { %2478 = vrot.lane.b32.xlu1 %v2223_v38, %s4794_s19  ;;  %2482 = vrot.lane.b32.xlu0 %v2225_v11, %s4794_s19  ;;  %v5683_v38 = vpop.permute.xlu1 %2116 }
 0x4ca   : > { %2508 = vrot.lane.b32.xlu0 %v2285_v9, %s4796_s25  ;;  %2540 = vrot.lane.b32.xlu1 %v2265_v40, %s4797_s26  ;;  %v2268_v9 = vmul.bf16 %v2251_v30, %v5588_v28  ;;  %v2067_v56 = vpop.permute.xlu1 %2066 }
 0x4ce   : > { %2504 = vrot.lane.b32.xlu0 %v2283_v32, %s4796_s25  ;;  %2544 = vrot.lane.b32.xlu1 %v2267_v43, %s4797_s26  ;;  %v5666_v32 = vpop.permute.xlu0 %2156  ;;  %v2435_v43 = vrot.slane %v2183_v36, 4 }
 0x4d2   : > { %2294 = vrot.lane.b32.xlu0 %v2284_v46, %s4782_s17  ;;  %2329 = vrot.lane.b32.xlu1 %v2090_v31, %s4786_s21  ;;  %v5672_v20 = vpop.permute.xlu0 %2198 }
 0x4d6   : > { %2542 = vrot.lane.b32.xlu0 %v2266_v50, %s4797_s26  ;;  %2480 = vrot.lane.b32.xlu1 %v2224_v51, %s4794_s19  ;;  %v5681_v37 = vpop.permute.xlu0 %2240  ;;  %v5698_v50 = vsel %vm2164_vm2, %v2155_v53, %v5666_v32 }
 0x4d7   : > { %v2252_v34 = vsel %vm2248_vm15, %v5657_v23, %v5681_v37 }
 0x4da   : > { %2298 = vrot.lane.b32.xlu0 %v2286_v54, %s4782_s17  ;;  %2506 = vrot.lane.b32.xlu1 %v2284_v46, %s4796_s25  ;;  %v5710_v55 = vpop.permute.xlu0 %2118 }
 0x4de   : > { %2333 = vrot.lane.b32.xlu0 %v2092_v33, %s4786_s21  ;;  %2373 = vrot.lane.b32.xlu1 %v2363_v16, %s4798_s27  ;;  %v2365_v33 = vrot.slane %v2142_v52, 4  ;;  %v2184_v16 = vmul.bf16 %v2167_v62, %v5588_v28  ;;  %v2069_v12 = vpop.permute.xlu0 %2068 }
 0x4e0   : > { %v2436_v17 = vrot.slane %v2184_v16, 4 }
 0x4e2   : > { %2484 = vrot.lane.b32.xlu0 %v2226_v18, %s4794_s19  ;;  %2444 = vrot.lane.b32.xlu1 %v2434_v22, %s4799_s16  ;;  %v5720_v18 = vpop.permute.xlu1 %2120  ;;  %v2210_v22 = vsel %vm2206_vm14, %v5646_v7, %v5672_v20  ;;  %v5733_v45 = vpop.permute.xlu0 %2158 }
 0x4e6   : > { %2510 = vrot.lane.b32.xlu0 %v2286_v54, %s4796_s25  ;;  %v5747_v60 = vpop.permute.xlu0 %2070 }
 0x4ea   : > { %2546 = vrot.lane.b32.xlu0 %v2268_v9, %s4797_s26  ;;  %v5735_v9 = vpop.permute.xlu1 %2160  ;;  %v2201_v23 = vpop.permute.xlu0 %2200 }
 0x4ee   : > { %2375 = vrot.lane.b32.xlu0 %v2364_v21, %s4798_s27 }
 0x4f2   : > { %2371 = vrot.lane.b32.xlu0 %v2362_v35, %s4798_s27  ;;  %v5749_v35 = vpop.permute.xlu1 %2162 }
 0x4f3   : > { %v1819_v11 = vpop.f32.mrb[8].mxu1  ;;  %v1860_v39 = vpop.f32.mrb[4].mxu0 }
 0x4f4   : > { %v5686_v40 = vpack.c.bf16 %v1819_v11, %v1819_v11  ;;  %v1821_v59 = vpop.f32.mrb[9].mxu1  ;;  %v1862_v41 = vpop.f32.mrb[5].mxu0  ;;  %v5700_v51 = vpack.c.bf16 %v1860_v39, %v1860_v39  ;;  %v2077_v39 = vsel %vm2072_vm13, %v5654_v2, %v2067_v56 }
 0x4f5   : > { %v1823_v46 = vpop.f32.mrb[10].mxu1  ;;  %v1864_v31 = vpop.f32.mrb[6].mxu0  ;;  %v5727_v25 = vpack.c.bf16 %v1821_v59, %v1821_v59  ;;  %v5737_v10 = vpack.c.bf16 %v1862_v41, %v1862_v41  ;;  %v2078_v59 = vsel %vm2072_vm13, %v2067_v56, %v2069_v12  ;;  %v2211_v56 = vsel %vm2206_vm14, %v5672_v20, %v2201_v23 }
 0x4f6   : > { %v1824_v47 = vpop.f32.mrb[11].mxu1  ;;  %v1865_v48 = vpop.f32.mrb[7].mxu0  ;;  %2406 = vrot.lane.b32.xlu1 %v5686_v40, %s4785_s20  ;;  %2446 = vrot.lane.b32.xlu0 %v2435_v43, %s4799_s16  ;;  %v2185_v54 = vmul.bf16 %v5698_v50, %v5686_v40  ;;  %v2287_v63 = vrot.slane %v5686_v40, 4  ;;  %v2093_v53 = vmul.bf16 %v2076_v5, %v5686_v40  ;;  %v2227_v30 = vmul.bf16 %v2210_v22, %v5686_v40 }
 0x4f7   : > { %v2289_v7 = vrot.slane %v5700_v51, 4  ;;  %v2288_v21 = vrot.slane %v5727_v25, 4  ;;  %v2269_v36 = vmul.bf16 %v2252_v34, %v5686_v40  ;;  %v2290_v11 = vrot.slane %v5737_v10, 4  ;;  %v2203_v43 = vpop.permute.xlu1 %2202  ;;  %v5780_v5 = vpop.permute.xlu0 %2204 }
 0x4f8   : > { %v2095_v44 = vmul.bf16 %v2078_v59, %v5700_v51  ;;  %v2094_v46 = vmul.bf16 %v2077_v39, %v5727_v25  ;;  %v2079_v31 = vsel %vm2072_vm13, %v2069_v12, %v5747_v60  ;;  %v2212_v2 = vsel %vm2206_vm14, %v2201_v23, %v2203_v43 }
 0x4f9   : > { %v2229_v52 = vmul.bf16 %v2212_v2, %v5700_v51  ;;  %v2096_v62 = vmul.bf16 %v2079_v31, %v5737_v10  ;;  %v2127_v12 = vsel %vm2122_vm1, %v5642_v0, %v5683_v38  ;;  %v2171_v2 = vsel %vm2164_vm2, %v5735_v9, %v5749_v35 }
 0x4fa   : > { %2410 = vrot.lane.b32.xlu1 %v5700_v51, %s4785_s20  ;;  %2442 = vrot.lane.b32.xlu0 %v2433_v3, %s4799_s16  ;;  %v2144_v39 = vmul.bf16 %v2127_v12, %v5727_v25 }
 0x4fb   : > { %v5796_v22 = vpop.permute.xlu0 %2244 }
 0x4fc   : > { %v2367_v59 = vrot.slane %v2144_v39, 4 }
 0x4fe   : > { %2300 = vrot.lane.b32.xlu1 %v2287_v63, %s4782_s17  ;;  %2377 = vrot.lane.b32.xlu0 %v2365_v33, %s4798_s27  ;;  %v2228_v33 = vmul.bf16 %v2211_v56, %v5727_v25 }
 0x502   : > { %2335 = vrot.lane.b32.xlu1 %v2093_v53, %s4786_s21  ;;  %2448 = vrot.lane.b32.xlu0 %v2436_v17, %s4799_s16  ;;  %v5782_v53 = vpop.permute.xlu1 %2242  ;;  %v2128_v17 = vsel %vm2122_vm1, %v5683_v38, %v5710_v55 }
 0x506   : > { %2486 = vrot.lane.b32.xlu1 %v2227_v30, %s4794_s19  ;;  %2408 = vrot.lane.b32.xlu0 %v5727_v25, %s4785_s20  ;;  %v5798_v30 = vpop.permute.xlu1 %2246 }
 0x50a   : > { %2512 = vrot.lane.b32.xlu1 %v2287_v63, %s4796_s25  ;;  %2412 = vrot.lane.b32.xlu0 %v5737_v10, %s4785_s20  ;;  %v2126_v63 = vsel %vm2122_vm1, %v5611_v42, %v5642_v0  ;;  %v2213_v42 = vsel %vm2206_vm14, %v2203_v43, %v5780_v5  ;;  %v2170_v0 = vsel %vm2164_vm2, %v5733_v45, %v5735_v9 }
 0x50b   : > { %v2143_v16 = vmul.bf16 %v2126_v63, %v5686_v40  ;;  %v2230_v34 = vmul.bf16 %v2213_v42, %v5737_v10  ;;  %v2187_v23 = vmul.bf16 %v2170_v0, %v5700_v51  ;;  %v2009_v0 = vmul.bf16 %v5214_v49, %v5586_v29 }
 0x50c   : > { %v2254_v49 = vsel %vm2248_vm15, %v5782_v53, %v5796_v22 }
 0x50d   : > { %v2366_v20 = vrot.slane %v2143_v16, 4 }
 0x50e   : > { %2304 = vrot.lane.b32.xlu1 %v2289_v7, %s4782_s17  ;;  %2302 = vrot.lane.b32.xlu0 %v2288_v21, %s4782_s17 }
 0x512   : > { %2548 = vrot.lane.b32.xlu1 %v2269_v36, %s4797_s26  ;;  %2306 = vrot.lane.b32.xlu0 %v2290_v11, %s4782_s17  ;;  %v2145_v36 = vmul.bf16 %v2128_v17, %v5700_v51 }
 0x513   : > { %v4482_v41 = vpop.f32.mrb[12].mxu1 }
 0x514   : > { %v4483_v4 = vpop.f32.mrb[13].mxu1 }
 0x515   : > { %v4484_v47 = vadd.f32 %v4483_v4, %v4482_v41  ;;  %v4485_v48 = vpop.f32.mrb[14].mxu1 }
 0x516   : > { %v4486_v3 = vpop.f32.mrb[15].mxu1  ;;  %2339 = vrot.lane.b32.xlu1 %v2095_v44, %s4786_s21  ;;  %2337 = vrot.lane.b32.xlu0 %v2094_v46, %s4786_s21  ;;  %v2439_v44 = vrot.slane %v2187_v23, 4 }
 0x51a   : > { %2490 = vrot.lane.b32.xlu1 %v2229_v52, %s4794_s19  ;;  %2341 = vrot.lane.b32.xlu0 %v2096_v62, %s4786_s21  ;;  %v2188_v62 = vmul.bf16 %v2171_v2, %v5737_v10 }
 0x51e   : > { %2516 = vrot.lane.b32.xlu1 %v2289_v7, %s4796_s25  ;;  %2488 = vrot.lane.b32.xlu0 %v2228_v33, %s4794_s19  ;;  %v2437_v7 = vrot.slane %v2185_v54, 4  ;;  %v2368_v54 = vrot.slane %v2145_v36, 4  ;;  %v2440_v33 = vrot.slane %v2188_v62, 4 }
 0x522   : > { %2379 = vrot.lane.b32.xlu1 %v2366_v20, %s4798_s27  ;;  %2514 = vrot.lane.b32.xlu0 %v2288_v21, %s4796_s25  ;;  %v2129_v21 = vsel %vm2122_vm1, %v5710_v55, %v5720_v18  ;;  %v2169_v55 = vsel %vm2164_vm2, %v5666_v32, %v5733_v45  ;;  %v1915_v45 = vpack.c.bf16 %v4484_v47, %v4484_v47 }
 0x523   : > { %v2146_v41 = vmul.bf16 %v2129_v21, %v5737_v10  ;;  %v2186_v31 = vmul.bf16 %v2169_v55, %v5727_v25  ;;  %v2253_v20 = vsel %vm2248_vm15, %v5681_v37, %v5782_v53  ;;  %v2255_v37 = vsel %vm2248_vm15, %v5796_v22, %v5798_v30 }
 0x524   : > { %v2291_v63 = vrot.slane %v1915_v45, 4  ;;  %v2097_v16 = vmul.bf16 %v5747_v60, %v1915_v45  ;;  %v2231_v12 = vmul.bf16 %v5780_v5, %v1915_v45  ;;  %v2147_v60 = vmul.bf16 %v5720_v18, %v1915_v45 }
 0x525   : > { %v2369_v46 = vrot.slane %v2146_v41, 4  ;;  %v2438_v52 = vrot.slane %v2186_v31, 4  ;;  %v2189_v5 = vmul.bf16 %v5749_v35, %v1915_v45  ;;  %v2273_v2 = vmul.bf16 %v5798_v30, %v1915_v45 }
 0x526   : > { %2450 = vrot.lane.b32.xlu1 %v2437_v7, %s4799_s16  ;;  %2492 = vrot.lane.b32.xlu0 %v2230_v34, %s4794_s19  ;;  %v2270_v7 = vmul.bf16 %v2253_v20, %v5727_v25  ;;  %v2272_v34 = vmul.bf16 %v2255_v37, %v5737_v10  ;;  %v2370_v39 = vrot.slane %v2147_v60, 4 }
 0x527   : > { %v2441_v21 = vrot.slane %v2189_v5, 4 }
 0x528   : > { %v5814_v38 = vpop.permute.xlu1 %2398  ;;  %v5816_v50 = vpop.permute.xlu0 %2402 }
 0x52a   : > { %2383 = vrot.lane.b32.xlu1 %v2368_v54, %s4798_s27  ;;  %2381 = vrot.lane.b32.xlu0 %v2367_v59, %s4798_s27  ;;  %v2008_v54 = vmul.bf16 %v5226_v57, %v5578_v8  ;;  %v2696_v57 = vld [vmem:[%s6952_s4] sm:$0xff]  ;;  %v2271_v8 = vmul.bf16 %v2254_v49, %v5700_v51 }
 0x52c   : > { %v5825_v43 = vpop.permute.xlu1 %2400  ;;  %v5827_v4 = vpop.permute.xlu0 %2404 }
 0x52d   : > { %v5836_v32 = vsel %vm579_vm4, %v5816_v50, %v5827_v4  ;;  %v2416_v49 = vsel %vm579_vm4, %v5814_v38, %v5825_v43 }
 0x52e   : > { %2454 = vrot.lane.b32.xlu1 %v2439_v44, %s4799_s16  ;;  %2385 = vrot.lane.b32.xlu0 %v2369_v46, %s4798_s27 }
 0x530   : > { %v5840_v48 = vpop.permute.xlu1 %2296  ;;  %v2293_v3 = vpop.permute.xlu0 %2292 }
 0x532   : > { %2414 = vrot.lane.b32.xlu1 %v1915_v45, %s4785_s20  ;;  %2452 = vrot.lane.b32.xlu0 %v2438_v52, %s4799_s16 }
 0x534   : > { %v5845_v9 = vpop.permute.xlu1 %2327  ;;  %v5847_v56 = vpop.permute.xlu0 %2331 }
 0x536   : > { %2308 = vrot.lane.b32.xlu1 %v2291_v63, %s4782_s17  ;;  %2456 = vrot.lane.b32.xlu0 %v2440_v33, %s4799_s16 }
 0x538   : > { %v5851_v47 = vpop.permute.xlu0 %2482  ;;  %v5857_v17 = vpop.permute.xlu1 %2478 }
 0x53a   : > { %2343 = vrot.lane.b32.xlu1 %v2097_v16, %s4786_s21  ;;  %2518 = vrot.lane.b32.xlu0 %v2290_v11, %s4796_s25 }
 0x53c   : > { %v5863_v42 = vpop.permute.xlu0 %2508  ;;  %v5874_v36 = vpop.permute.xlu1 %2540 }
 0x53e   : > { %2494 = vrot.lane.b32.xlu1 %v2231_v12, %s4794_s19  ;;  %2550 = vrot.lane.b32.xlu0 %v2270_v7, %s4797_s26 }
 0x540   : > { %v5876_v11 = vpop.permute.xlu0 %2504  ;;  %v5888_v41 = vpop.permute.xlu1 %2544 }
 0x542   : > { %2387 = vrot.lane.b32.xlu1 %v2370_v39, %s4798_s27  ;;  %2554 = vrot.lane.b32.xlu0 %v2272_v34, %s4797_s26 }
 0x544   : > { %v2295_v18 = vpop.permute.xlu0 %2294  ;;  %v2330_v29 = vpop.permute.xlu1 %2329 }
 0x545   : > { %v2310_v59 = vsel %vm406_vm0, %v2293_v3, %v2295_v18  ;;  %v2311_v23 = vsel %vm406_vm0, %v2295_v18, %v5840_v48  ;;  %v2346_v7 = vsel %vm499_vm6, %v2330_v29, %v5847_v56  ;;  %v2345_v5 = vsel %vm499_vm6, %v5845_v9, %v2330_v29 }
 0x546   : > { %2458 = vrot.lane.b32.xlu1 %v2441_v21, %s4799_s16  ;;  %v2573_v35 = vsel %vm606_vm5, %v2009_v0, %v2311_v23  ;;  %v2569_v55 = vsel %vm606_vm5, %v2008_v54, %v2310_v59  ;;  %2699 = vperm.xlu0 %4516, %v2696_v57   ;;  %v2417_v54 = vsel %vm579_vm4, %v5825_v43, %v5816_v50 }
 0x547   : > { %2730 = vmatprep.subr.bf16.mxu0 %v2573_v35 }
 0x548   : > { %2731 = vmatpush1.bf16.msra.mxu0 %v2569_v55  ;;  %v2543_v44 = vpop.permute.xlu0 %2542  ;;  %v2481_v22 = vpop.permute.xlu1 %2480 }
 0x549   : > { %v2497_v50 = vsel %vm2206_vm14, %v2481_v22, %v5851_v47  ;;  %v2559_v43 = vsel %vm2558_vm7, %v5874_v36, %v2543_v44 }
 0x54a   : > { %2520 = vrot.lane.b32.xlu1 %v2291_v63, %s4796_s25 }
 0x54c   : > { %v2299_v46 = vpop.permute.xlu0 %2298  ;;  %v2507_v62 = vpop.permute.xlu1 %2506 }
 0x54d   : > { %v2524_v9 = vsel %vm2522_vm3, %v2507_v62, %v5863_v42  ;;  %v2523_v29 = vsel %vm2522_vm3, %v5876_v11, %v2507_v62 }
 0x54e   : > { %2552 = vrot.lane.b32.xlu1 %v2271_v8, %s4797_s26 }
 0x550   : > { %v5902_v31 = vpop.permute.xlu0 %2333  ;;  %v2374_v20 = vpop.permute.xlu1 %2373 }
 0x551   : > { %v5908_v53 = vsel %vm499_vm6, %v5847_v56, %v5902_v31 }
 0x552   : > { %2556 = vrot.lane.b32.xlu1 %v2273_v2, %s4797_s26  ;;  %s332_s26 = scalar_lea.vmem %s6957_s9, %s4465_s22 }
 0x554   : > { %v5911_v3 = vpop.permute.xlu0 %2484  ;;  %v2445_v34 = vpop.permute.xlu1 %2444 }
 0x555   : > { %v2498_v52 = vsel %vm2206_vm14, %v5851_v47, %v5911_v3  ;;  %v2560_v47 = vsel %vm2558_vm7, %v2543_v44, %v5888_v41 }
 0x558   : > { %v5916_v63 = vpop.permute.xlu0 %2510 }
 0x559   : > { %v2525_v30 = vsel %vm2522_vm3, %v5863_v42, %v5916_v63  ;;  %v2669_v42 = vsel %vm606_vm5, %v2497_v50, %v2524_v9 }
 0x55a   : > { %v5922_v45 = vsel %vm606_vm5, %v2498_v52, %v2525_v30  ;;  %v2496_v30 = vsel %vm2206_vm14, %v5857_v17, %v2481_v22  ;;  %v2707_v17 = vsel %vm606_vm5, %v2559_v43, 0  ;;  %v2312_v22 = vsel %vm406_vm0, %v5840_v48, %v2299_v46 }
 0x55b   : > { %v2665_v38 = vsel %vm606_vm5, %v2496_v30, %v2523_v29 }
 0x55c   : > { %v5924_v33 = vpop.permute.xlu0 %2546 }
 0x55d   : > { %v5929_v16 = vsel %vm2558_vm7, %v5888_v41, %v5924_v33  ;;  %v5984_v41 = vld [vmem:[%s6951_s3] sm:$0xf] }
 0x560   : > { %v5931_v12 = vpop.permute.xlu0 %2375 }
 0x561   : > { %v2391_v60 = vsel %vm2389_vm8, %v2374_v20, %v5931_v12 }
 0x562   : > { %v2605_v37 = vsel %vm606_vm5, %v2346_v7, %v2391_v60  ;;  %v2011_v7 = vmul.bf16 %v5242_v61, %v5588_v28  ;;  %v2010_v61 = vmul.bf16 %v5233_v58, %v5580_v13 }
 0x563   : > { %2732 = vmatprep.subr.bf16.mxu0 %v2605_v37 }
 0x564   : > { %v2372_v39 = vpop.permute.xlu0 %2371  ;;  %v2577_v28 = vsel %vm606_vm5, %v2010_v61, %v2312_v22  ;;  %v2713_v61 = vsel %vm606_vm5, %v5929_v16, 0 }
 0x565   : > { %v2390_v18 = vsel %vm2389_vm8, %v2372_v39, %v2374_v20 }
 0x566   : > { %v2601_v21 = vsel %vm606_vm5, %v2345_v5, %v2390_v18  ;;  %v2013_v5 = vmul.bf16 %v5270_v15, %v5727_v25  ;;  %v2012_v18 = vmul.bf16 %v5264_v6, %v5686_v40 }
 0x567   : > { %2733 = vmatpush1.bf16.msra.mxu0 %v2601_v21 }
 0x568   : > { %v5942_v0 = vpop.permute.xlu1 %2406  ;;  %v5944_v56 = vpop.permute.xlu0 %2446 }
 0x569   : > { %v2462_v59 = vsel %vm2460_vm9, %v2445_v34, %v5944_v56 }
 0x56a   : > { %v2637_v23 = vsel %vm606_vm5, %v2417_v54, %v2462_v59 }
 0x56b   : > { %2734 = vmatprep.subr.bf16.mxu0 %v2637_v23 }
 0x56c   : > { %v5954_v35 = vpop.permute.xlu1 %2410  ;;  %v2443_v55 = vpop.permute.xlu0 %2442 }
 0x56d   : > { %v2461_v57 = vsel %vm2460_vm9, %v2443_v55, %v2445_v34 }
 0x56e   : > { %v2633_v8 = vsel %vm606_vm5, %v2416_v49, %v2461_v57 }
 0x56f   : > { %2735 = vmatpush1.bf16.msra.mxu0 %v2633_v8 }
 0x570   : > { %v2301_v2 = vpop.permute.xlu1 %2300  ;;  %2736 = vmatprep.subr.bf16.mxu0 %v2669_v42  ;;  %v2378_v52 = vpop.permute.xlu0 %2377 }
 0x571   : > { %v2313_v11 = vsel %vm406_vm0, %v2299_v46, %v2301_v2  ;;  %v2392_v49 = vsel %vm2389_vm8, %v5931_v12, %v2378_v52  ;;  %v2419_v12 = vsel %vm579_vm4, %v5827_v4, %v5942_v0 }
 0x572   : > { %v2581_v36 = vsel %vm606_vm5, %v2011_v7, %v2313_v11 }
 0x573   : > { %2737 = vmatpush1.bf16.msra.mxu0 %v2665_v38 }
 0x574   : > { %v2336_v62 = vpop.permute.xlu1 %2335  ;;  %4326 = vmatprep.subr.msk.bf16.mxu0 %vm606_vm5, %v2560_v47  ;;  %v2449_v20 = vpop.permute.xlu0 %2448 }
 0x575   : > { %v2348_v8 = vsel %vm499_vm6, %v5902_v31, %v2336_v62  ;;  %v2463_v30 = vsel %vm2460_vm9, %v5944_v56, %v2449_v20 }
 0x576   : > { %v2641_v47 = vsel %vm606_vm5, %v5836_v32, %v2463_v30 }
 0x577   : > { %2739 = vmatpush1.bf16.msra.mxu0 %v2707_v17 }
 0x578   : > { %v5986_v44 = vpop.permute.xlu1 %2486  ;;  %2771 = vmatprep.subr.bf16.mxu0 %v2581_v36  ;;  %v5988_v60 = vpop.permute.xlu0 %2408 }
 0x579   : > { %v2499_v37 = vsel %vm2206_vm14, %v5911_v3, %v5986_v44 }
 0x57a   : > { %4327 = vmatmul.mubr.msk.bf16.vlgmr.msra.gmra.mrb[8].mxu0 %vm2702_vm10, %v5984_v41 }
 0x57b   : > { %2772 = vmatpush1.bf16.msra.mxu0 %v2577_v28  ;;  %2803 = vmatprep.mubr.bf16.mxu0 %v4789_v1  ;;  %v2420_v28 = vsel %vm579_vm4, %v5942_v0, %v5988_v60 }
 0x57c   : > { %v5996_v48 = vpop.permute.xlu1 %2512  ;;  %v5998_v46 = vpop.permute.xlu0 %2412 }
 0x57d   : > { %v2526_v58 = vsel %vm2522_vm3, %v5916_v63, %v5996_v48 }
 0x57e   : > { %v2677_v13 = vsel %vm606_vm5, %v2499_v37, %v2526_v58 }
 0x580   : > { %v6007_v34 = vpop.permute.xlu1 %2304  ;;  %v2303_v39 = vpop.permute.xlu0 %2302 }
 0x581   : > { %v2314_v21 = vsel %vm406_vm0, %v2301_v2, %v2303_v39  ;;  %v2315_v3 = vsel %vm406_vm0, %v2303_v39, %v6007_v34  ;;  %v2609_v2 = vsel %vm606_vm5, %v5908_v53, %v2392_v49 }
 0x582   : > { %v2589_v54 = vsel %vm606_vm5, %v2013_v5, %v2315_v3  ;;  %v2585_v63 = vsel %vm606_vm5, %v2012_v18, %v2314_v21 }
 0x583   : > { %2812 = vmatprep.subr.bf16.mxu1 %v2589_v54 }
 0x584   : > { %v6018_v59 = vpop.permute.xlu1 %2548  ;;  %2813 = vmatpush1.bf16.msra.mxu1 %v2585_v63  ;;  %v6020_v23 = vpop.permute.xlu0 %2306 }
 0x585   : > { %v2562_v32 = vsel %vm2558_vm7, %v5924_v33, %v6018_v59  ;;  %v2421_v33 = vsel %vm579_vm4, %v5988_v60, %v5954_v35  ;;  %v2015_v60 = vmul.bf16 %v5278_v19, %v5737_v10  ;;  %v2316_v18 = vsel %vm406_vm0, %v6007_v34, %v6020_v23 }
 0x586   : > { %v2014_v19 = vmul.bf16 %v5293_v26, %v5700_v51 }
 0x588   : > { %v6022_v9 = vpop.permute.xlu1 %2339  ;;  %v2338_v15 = vpop.permute.xlu0 %2337 }
 0x589   : > { %v2349_v56 = vsel %vm499_vm6, %v2336_v62, %v2338_v15  ;;  %v2350_v7 = vsel %vm499_vm6, %v2338_v15, %v6022_v9 }
 0x58c   : > { %v6024_v25 = vpop.permute.xlu1 %2490  ;;  %v6026_v6 = vpop.permute.xlu0 %2341 }
 0x590   : > { %v6028_v40 = vpop.permute.xlu1 %2516  ;;  %v2489_v55 = vpop.permute.xlu0 %2488 }
 0x591   : > { %v2501_v0 = vsel %vm2206_vm14, %v2489_v55, %v6024_v25  ;;  %v2500_v10 = vsel %vm2206_vm14, %v5986_v44, %v2489_v55  ;;  %v2351_v44 = vsel %vm499_vm6, %v6022_v9, %v6026_v6 }
 0x594   : > { %v2380_v57 = vpop.permute.xlu1 %2379  ;;  %v2515_v50 = vpop.permute.xlu0 %2514 }
 0x595   : > { %v2393_v29 = vsel %vm2389_vm8, %v2378_v52, %v2380_v57  ;;  %v2527_v21 = vsel %vm2522_vm3, %v5996_v48, %v2515_v50  ;;  %v2593_v48 = vsel %vm606_vm5, %v2014_v19, %v2316_v18  ;;  %v3173_v18 = vld [vmem:[%s6954_s6 + $0x80] sm:$0xff] }
 0x596   : > { %v2613_v42 = vsel %vm606_vm5, %v2348_v8, %v2393_v29  ;;  %v2681_v15 = vsel %vm606_vm5, %v2500_v10, %v2527_v21  ;;  %v3177_v21 = vld [vmem:[%s6954_s6 + $0xa0] sm:$0xff] }
 0x597   : > { %2773 = vmatprep.subr.bf16.mxu0 %v2613_v42  ;;  %v4350_v19 = vcombine.low %v3173_v18, %v3177_v21 }
 0x598   : > { %v2451_v38 = vpop.permute.xlu1 %2450  ;;  %2774 = vmatpush1.bf16.msra.mxu0 %v2609_v2  ;;  %v6040_v43 = vpop.permute.xlu0 %2492 }
 0x599   : > { %v2464_v31 = vsel %vm2460_vm9, %v2449_v20, %v2451_v38 }
 0x59a   : > { %v2645_v52 = vsel %vm606_vm5, %v2419_v12, %v2464_v31  ;;  %v2422_v12 = vsel %vm579_vm4, %v5954_v35, %v5998_v46  ;;  %v2502_v35 = vsel %vm2206_vm14, %v6024_v25, %v6040_v43 }
 0x59b   : > { %2775 = vmatprep.subr.bf16.mxu0 %v2645_v52 }
 0x59c   : > { %v2384_v53 = vpop.permute.xlu1 %2383  ;;  %2776 = vmatpush1.bf16.msra.mxu0 %v2641_v47  ;;  %v2382_v11 = vpop.permute.xlu0 %2381 }
 0x59d   : > { %2777 = vmatprep.subr.bf16.mxu0 %v2677_v13  ;;  %v2394_v17 = vsel %vm2389_vm8, %v2380_v57, %v2382_v11  ;;  %v2395_v4 = vsel %vm2389_vm8, %v2382_v11, %v2384_v53 }
 0x59e   : > { %v2621_v20 = vsel %vm606_vm5, %v2350_v7, %v2395_v4  ;;  %v2617_v22 = vsel %vm606_vm5, %v2349_v56, %v2394_v17 }
 0x59f   : > { %2814 = vmatprep.subr.bf16.mxu1 %v2621_v20 }
 0x5a0   : > { %v2455_v36 = vpop.permute.xlu1 %2454  ;;  %2778 = vmatpush1.bf16.msra.mxu0 %v5922_v45  ;;  %2815 = vmatpush1.bf16.msra.mxu1 %v2617_v22  ;;  %v2386_v62 = vpop.permute.xlu0 %2385  ;;  %v2528_v45 = vsel %vm2522_vm3, %v2515_v50, %v6028_v40 }
 0x5a1   : > { %4328 = vmatprep.subr.msk.bf16.mxu0 %vm606_vm5, %v2562_v32  ;;  %v2685_v54 = vsel %vm606_vm5, %v2501_v0, %v2528_v45  ;;  %v3157_v32 = vld [vmem:[%s6954_s6] sm:$0xff] }
 0x5a2   : > { %v3169_v45 = vld [vmem:[%s6954_s6 + $0x60] sm:$0xff] }
 0x5a4   : > { %v2415_v37 = vpop.permute.xlu1 %2414  ;;  %2780 = vmatpush1.bf16.msra.mxu0 %v2713_v61  ;;  %v2453_v58 = vpop.permute.xlu0 %2452 }
 0x5a5   : > { %v2465_v13 = vsel %vm2460_vm9, %v2451_v38, %v2453_v58  ;;  %v2466_v39 = vsel %vm2460_vm9, %v2453_v58, %v2455_v36  ;;  %v2423_v30 = vsel %vm579_vm4, %v5998_v46, %v2415_v37 }
 0x5a6   : > { %v2653_v16 = vsel %vm606_vm5, %v2421_v33, %v2466_v39  ;;  %v2649_v5 = vsel %vm606_vm5, %v2420_v28, %v2465_v13  ;;  %v3162_v28 = vld [vmem:[%s6954_s6 + $0x28] sm:$0xff]  ;;  %v3165_v33 = vld [vmem:[%s6954_s6 + $0x40] sm:$0xff] }
 0x5a7   : > { %4329 = vmatmul.mubr.msk.bf16.vlgmr.msra.gmra.mrb[12].mxu0 %vm2702_vm10, %v5984_v41  ;;  %2816 = vmatprep.subr.bf16.mxu1 %v2653_v16  ;;  %v3166_v13 = vld [vmem:[%s6954_s6 + $0x48] sm:$0xff]  ;;  %v4343_v39 = vcombine.high %v3165_v33, %v3169_v45 }
 0x5a8   : > { %v2309_v3 = vpop.permute.xlu1 %2308  ;;  %2817 = vmatpush1.bf16.msra.mxu1 %v2649_v5  ;;  %2885 = vmatprep.mubr.bf16.mxu0 %v4789_v1  ;;  %v2457_v1 = vpop.permute.xlu0 %2456  ;;  %v3170_v16 = vld [vmem:[%s6954_s6 + $0x68] sm:$0xff]  ;;  %v4342_v5 = vcombine.low %v3165_v33, %v3169_v45 }
 0x5a9   : > { %v2317_v63 = vsel %vm406_vm0, %v6020_v23, %v2309_v3  ;;  %2818 = vmatprep.subr.bf16.mxu1 %v2685_v54  ;;  %v2396_v23 = vsel %vm2389_vm8, %v2384_v53, %v2386_v62  ;;  %v2467_v42 = vsel %vm2460_vm9, %v2455_v36, %v2457_v1  ;;  %v3161_v36 = vld [vmem:[%s6954_s6 + $0x20] sm:$0xff]  ;;  %v4344_v0 = vcombine.low %v3166_v13, %v3170_v16  ;;  %v3174_v3 = vld [vmem:[%s6954_s6 + $0x88] sm:$0xff] }
 0x5aa   : > { %v2597_v34 = vsel %vm606_vm5, %v2015_v60, %v2317_v63  ;;  %v2625_v29 = vsel %vm606_vm5, %v2351_v44, %v2396_v23  ;;  %v4335_v61 = vcombine.high %v3157_v32, %v3161_v36  ;;  %v4345_v60 = vcombine.high %v3166_v13, %v3170_v16  ;;  %v3178_v63 = vld [vmem:[%s6954_s6 + $0xa8] sm:$0xff]  ;;  %v3233_v16 = vld [vmem:[%s6954_s6 + $0x260] sm:$0xff] }
 0x5ab   : > { %2853 = vmatprep.subr.bf16.mxu0 %v2597_v34  ;;  %v4351_v54 = vcombine.high %v3173_v18, %v3177_v21  ;;  %v4352_v10 = vcombine.low %v3174_v3, %v3178_v63  ;;  %v4353_v34 = vcombine.high %v3174_v3, %v3178_v63  ;;  %v3222_v45 = vld [vmem:[%s6954_s6 + $0x208] sm:$0xff]  ;;  %v3237_v63 = vld [vmem:[%s6954_s6 + $0x280] sm:$0xff] }
 0x5ac   : > { %v2344_v49 = vpop.permute.xlu1 %2343  ;;  %2854 = vmatpush1.bf16.msra.mxu0 %v2593_v48  ;;  %2819 = vmatpush1.bf16.msra.mxu1 %v2681_v15  ;;  %v2519_v55 = vpop.permute.xlu0 %2518  ;;  %v3181_v15 = vld [vmem:[%s6954_s6 + $0xc0] sm:$0xff]  ;;  %v3226_v13 = vld [vmem:[%s6954_s6 + $0x228] sm:$0xff] }
 0x5ad   : > { %v2352_v26 = vsel %vm499_vm6, %v6026_v6, %v2344_v49  ;;  %v2657_v6 = vsel %vm606_vm5, %v2422_v12, %v2467_v42  ;;  %v2529_v31 = vsel %vm2522_vm3, %v6028_v40, %v2519_v55  ;;  %v3185_v49 = vld [vmem:[%s6954_s6 + $0xe0] sm:$0xff]  ;;  %v4401_v18 = vcombine.high %v3222_v45, %v3226_v13  ;;  %v3230_v3 = vld [vmem:[%s6954_s6 + $0x248] sm:$0xff] }
 0x5ae   : > { %v2689_v40 = vsel %vm606_vm5, %v2502_v35, %v2529_v31  ;;  %v4359_v23 = vcombine.high %v3181_v15, %v3185_v49  ;;  %v3193_v42 = vld [vmem:[%s6954_s6 + $0x120] sm:$0xff] }
 0x5af   : > { %v3201_v31 = vld [vmem:[%s6954_s6 + $0x160] sm:$0xff] }
 0x5b0   : > { %v2495_v57 = vpop.permute.xlu1 %2494  ;;  %v2551_v52 = vpop.permute.xlu0 %2550  ;;  %v3205_v35 = vld [vmem:[%s6954_s6 + $0x180] sm:$0xff] }
 0x5b1   : > { %v2503_v53 = vsel %vm2206_vm14, %v6040_v43, %v2495_v57  ;;  %v2563_v56 = vsel %vm2558_vm7, %v6018_v59, %v2551_v52 }
 0x5b2   : > { %v2719_v4 = vsel %vm606_vm5, %v2563_v56, 0  ;;  %v3209_v56 = vld [vmem:[%s6954_s6 + $0x1a0] sm:$0xff] }
 0x5b4   : > { %v2388_v50 = vpop.permute.xlu1 %2387  ;;  %v2555_v20 = vpop.permute.xlu0 %2554 }
 0x5b5   : > { %v2397_v51 = vsel %vm2389_vm8, %v2386_v62, %v2388_v50  ;;  %v3158_v62 = vld [vmem:[%s6954_s6 + $0x8] sm:$0xff] }
 0x5b6   : > { %v2629_v8 = vsel %vm606_vm5, %v2352_v26, %v2397_v51  ;;  %v4336_v37 = vcombine.low %v3158_v62, %v3162_v28  ;;  %v4337_v58 = vcombine.high %v3158_v62, %v3162_v28  ;;  %v3186_v50 = vld [vmem:[%s6954_s6 + $0xe8] sm:$0xff]  ;;  %v4358_v51 = vcombine.low %v3181_v15, %v3185_v49  ;;  %v3225_v28 = vld [vmem:[%s6954_s6 + $0x220] sm:$0xff] }
 0x5b7   : > { %2855 = vmatprep.subr.bf16.mxu0 %v2629_v8  ;;  %v3218_v62 = vld [vmem:[%s6954_s6 + $0x1e8] sm:$0xff] }
 0x5b8   : > { %v2459_v2 = vpop.permute.xlu1 %2458  ;;  %2856 = vmatpush1.bf16.msra.mxu0 %v2625_v29  ;;  %v3189_v29 = vld [vmem:[%s6954_s6 + $0x100] sm:$0xff] }
 0x5b9   : > { %v2468_v38 = vsel %vm2460_vm9, %v2457_v1, %v2459_v2  ;;  %v3182_v1 = vld [vmem:[%s6954_s6 + $0xc8] sm:$0xff]  ;;  %v4366_v12 = vcombine.low %v3189_v29, %v3193_v42 }
 0x5ba   : > { %v2661_v9 = vsel %vm606_vm5, %v2423_v30, %v2468_v38  ;;  %v4360_v44 = vcombine.low %v3182_v1, %v3186_v50  ;;  %v3190_v2 = vld [vmem:[%s6954_s6 + $0x108] sm:$0xff]  ;;  %v4367_v30 = vcombine.high %v3189_v29, %v3193_v42 }
 0x5bb   : > { %2857 = vmatprep.subr.bf16.mxu0 %v2661_v9  ;;  %v3194_v38 = vld [vmem:[%s6954_s6 + $0x128] sm:$0xff] }
 0x5bc   : > { %v2521_v47 = vpop.permute.xlu1 %2520  ;;  %2858 = vmatpush1.bf16.msra.mxu0 %v2657_v6  ;;  %v4368_v9 = vcombine.low %v3190_v2, %v3194_v38  ;;  %v3197_v6 = vld [vmem:[%s6954_s6 + $0x140] sm:$0xff] }
 0x5bd   : > { %v2530_v11 = vsel %vm2522_vm3, %v2519_v55, %v2521_v47  ;;  %v4361_v55 = vcombine.high %v3182_v1, %v3186_v50  ;;  %v4374_v47 = vcombine.low %v3197_v6, %v3201_v31  ;;  %v3238_v50 = vld [vmem:[%s6954_s6 + $0x288] sm:$0xff] }
 0x5be   : > { %v2693_v46 = vsel %vm606_vm5, %v2503_v53, %v2530_v11  ;;  %v3198_v53 = vld [vmem:[%s6954_s6 + $0x148] sm:$0xff] }
 0x5bf   : > { %2859 = vmatprep.subr.bf16.mxu0 %v2693_v46  ;;  %v3202_v11 = vld [vmem:[%s6954_s6 + $0x168] sm:$0xff]  ;;  %v4375_v46 = vcombine.high %v3197_v6, %v3201_v31 }
 0x5c0   : > { %v2553_v7 = vpop.permute.xlu1 %2552  ;;  %2860 = vmatpush1.bf16.msra.mxu0 %v2689_v40  ;;  %v3206_v40 = vld [vmem:[%s6954_s6 + $0x188] sm:$0xff] }
 0x5c1   : > { %v2564_v17 = vsel %vm2558_vm7, %v2551_v52, %v2553_v7  ;;  %v2565_v22 = vsel %vm2558_vm7, %v2553_v7, %v2555_v20  ;;  %v4369_v52 = vcombine.high %v3190_v2, %v3194_v38  ;;  %v3210_v7 = vld [vmem:[%s6954_s6 + $0x1a8] sm:$0xff]  ;;  %v3253_v38 = vld [vmem:[%s6954_s6 + $0x300] sm:$0xff] }
 0x5c2   : > { %4330 = vmatprep.subr.msk.bf16.mxu1 %vm606_vm5, %v2564_v17  ;;  %v2725_v59 = vsel %vm606_vm5, %v2565_v22, 0  ;;  %v4377_v17 = vcombine.high %v3198_v53, %v3202_v11  ;;  %v3213_v22 = vld [vmem:[%s6954_s6 + $0x1c0] sm:$0xff]  ;;  %v3246_v2 = vld [vmem:[%s6954_s6 + $0x2c8] sm:$0xff] }
 0x5c3   : > { %2821 = vmatpush1.bf16.msra.mxu1 %v2719_v4  ;;  %v4376_v4 = vcombine.low %v3198_v53, %v3202_v11  ;;  %v3254_v11 = vld [vmem:[%s6954_s6 + $0x308] sm:$0xff] }
 0x5c4   : > { %v2557_v25 = vpop.permute.xlu1 %2556  ;;  %3927 = vmatprep.subr.bf16.mxu1 %v4335_v61  ;;  %v3221_v61 = vld [vmem:[%s6954_s6 + $0x200] sm:$0xff] }
 0x5c5   : > { %v2566_v43 = vsel %vm2558_vm7, %v2555_v20, %v2557_v25  ;;  %v4383_v20 = vcombine.high %v3205_v35, %v3209_v56  ;;  %v3217_v25 = vld [vmem:[%s6954_s6 + $0x1e0] sm:$0xff]  ;;  %v4399_v33 = vcombine.high %v3221_v61, %v3225_v28 }
 0x5c6   : > { %4331 = vmatmul.mubr.msk.bf16.vlgmr.msra.gmra.mrb[16].mxu1 %vm2702_vm10, %v5984_v41  ;;  %4332 = vmatprep.subr.msk.bf16.mxu0 %vm606_vm5, %v2566_v43  ;;  %v4382_v43 = vcombine.low %v3205_v35, %v3209_v56  ;;  %v3258_v35 = vld [vmem:[%s6954_s6 + $0x328] sm:$0xff]  ;;  %v3265_v56 = vld [vmem:[%s6954_s6 + $0x360] sm:$0xff] }
 0x5c7   : > { %2862 = vmatpush1.bf16.msra.mxu0 %v2725_v59  ;;  %3959 = vmatprep.mubr.bf16.mxu1 %v4912_v27  ;;  %v4385_v59 = vcombine.high %v3206_v40, %v3210_v7 }
 0x5c8   : > { %3968 = vmatprep.subr.bf16.mxu0 %v4337_v58 }
 0x5ca   : > { %4333 = vmatmul.mubr.msk.bf16.vlgmr.msra.gmra.mrb[16].mxu0 %vm2702_vm10, %v5984_v41  ;;  %v4334_v41 = vcombine.low %v3157_v32, %v3161_v36  ;;  %v4391_v32 = vcombine.high %v3213_v22, %v3217_v25  ;;  %v3214_v36 = vld [vmem:[%s6954_s6 + $0x1c8] sm:$0xff] }
 0x5cb   : > { %4000 = vmatprep.mubr.bf16.mxu0 %v4912_v27  ;;  %3969 = vmatpush1.bf16.msra.mxu0 %v4336_v37  ;;  %v4390_v37 = vcombine.low %v3213_v22, %v3217_v25  ;;  %v4393_v58 = vcombine.high %v3214_v36, %v3218_v62  ;;  %v3262_v25 = vld [vmem:[%s6954_s6 + $0x348] sm:$0xff] }
 0x5cc   : > { %3928 = vmatpush1.bf16.msra.mxu1 %v4334_v41  ;;  %3970 = vmatprep.subr.bf16.mxu0 %v4345_v60  ;;  %v4384_v41 = vcombine.low %v3206_v40, %v3210_v7  ;;  %v4398_v60 = vcombine.low %v3221_v61, %v3225_v28 }
 0x5cd   : > { %3929 = vmatprep.subr.bf16.mxu1 %v4343_v39  ;;  %v3229_v39 = vld [vmem:[%s6954_s6 + $0x240] sm:$0xff] }
 0x5ce   : > { %v4407_v21 = vcombine.high %v3229_v39, %v3233_v16  ;;  %v4406_v15 = vcombine.low %v3229_v39, %v3233_v16 }
 0x5cf   : > { %3971 = vmatpush1.bf16.msra.mxu0 %v4344_v0  ;;  %v6258_v0 = vpop.permute.xlu0 %2699 }
 0x5d0   : > { %3930 = vmatpush1.bf16.msra.mxu1 %v4342_v5  ;;  %3972 = vmatprep.subr.bf16.mxu0 %v4353_v34  ;;  %v4392_v5 = vcombine.low %v3214_v36, %v3218_v62  ;;  %v4400_v34 = vcombine.low %v3222_v45, %v3226_v13  ;;  %v4432_v62 = vcombine.low %v3254_v11, %v3258_v35  ;;  %v3277_v45 = vld [vmem:[%s6954_s6 + $0x3c0] sm:$0xff] }
 0x5d1   : > { %3931 = vmatprep.subr.bf16.mxu1 %v4351_v54  ;;  %v3234_v54 = vld [vmem:[%s6954_s6 + $0x268] sm:$0xff]  ;;  %v3281_v13 = vld [vmem:[%s6954_s6 + $0x3e0] sm:$0xff] }
 0x5d2   : > { %v4409_v49 = vcombine.high %v3230_v3, %v3234_v54 }
 0x5d3   : > { %3973 = vmatpush1.bf16.msra.mxu0 %v4352_v10 }
 0x5d4   : > { %3932 = vmatpush1.bf16.msra.mxu1 %v4350_v19  ;;  %3974 = vmatprep.subr.bf16.mxu0 %v4361_v55  ;;  %v3241_v19 = vld [vmem:[%s6954_s6 + $0x2a0] sm:$0xff] }
 0x5d5   : > { %3933 = vmatprep.subr.bf16.mxu1 %v4359_v23  ;;  %v4415_v23 = vcombine.high %v3237_v63, %v3241_v19  ;;  %v4414_v55 = vcombine.low %v3237_v63, %v3241_v19  ;;  %v3159_v19 = vld [vmem:[%s6954_s6 + $0x10] sm:$0xff] }
 0x5d7   : > { %3975 = vmatpush1.bf16.msra.mxu0 %v4360_v44  ;;  %v4408_v44 = vcombine.low %v3230_v3, %v3234_v54  ;;  %v3282_v3 = vld [vmem:[%s6954_s6 + $0x3e8] sm:$0xff] }
 0x5d8   : > { %3934 = vmatpush1.bf16.msra.mxu1 %v4358_v51  ;;  %3976 = vmatprep.subr.bf16.mxu0 %v4369_v52  ;;  %v3249_v51 = vld [vmem:[%s6954_s6 + $0x2e0] sm:$0xff] }
 0x5d9   : > { %3935 = vmatprep.subr.bf16.mxu1 %v4367_v30  ;;  %v3250_v30 = vld [vmem:[%s6954_s6 + $0x2e8] sm:$0xff] }
 0x5da   : > { %v4425_v52 = vcombine.high %v3246_v2, %v3250_v30  ;;  %v4424_v7 = vcombine.low %v3246_v2, %v3250_v30  ;;  %v3167_v30 = vld [vmem:[%s6954_s6 + $0x50] sm:$0xff] }
 0x5db   : > { %3977 = vmatpush1.bf16.msra.mxu0 %v4368_v9 }
 0x5dc   : > { %3936 = vmatpush1.bf16.msra.mxu1 %v4366_v12  ;;  %3978 = vmatprep.subr.bf16.mxu0 %v4377_v17  ;;  %v3257_v12 = vld [vmem:[%s6954_s6 + $0x320] sm:$0xff] }
 0x5dd   : > { %3937 = vmatprep.subr.bf16.mxu1 %v4375_v46  ;;  %v4431_v53 = vcombine.high %v3253_v38, %v3257_v12  ;;  %v3261_v46 = vld [vmem:[%s6954_s6 + $0x340] sm:$0xff]  ;;  %v4430_v17 = vcombine.low %v3253_v38, %v3257_v12  ;;  %v3171_v38 = vld [vmem:[%s6954_s6 + $0x70] sm:$0xff] }
 0x5de   : > { %v4439_v22 = vcombine.high %v3261_v46, %v3265_v56  ;;  %v4438_v61 = vcombine.low %v3261_v46, %v3265_v56  ;;  %v4347_v46 = vcombine.high %v3167_v30, %v3171_v38  ;;  %v3168_v56 = vld [vmem:[%s6954_s6 + $0x58] sm:$0xff] }
 0x5df   : > { %3979 = vmatpush1.bf16.msra.mxu0 %v4376_v4  ;;  %v4433_v4 = vcombine.high %v3254_v11, %v3258_v35 }
 0x5e0   : > { %3938 = vmatpush1.bf16.msra.mxu1 %v4374_v47  ;;  %3980 = vmatprep.subr.bf16.mxu0 %v4385_v59  ;;  %v3269_v59 = vld [vmem:[%s6954_s6 + $0x380] sm:$0xff] }
 0x5e1   : > { %3939 = vmatprep.subr.bf16.mxu1 %v4383_v20 }
 0x5e3   : > { %3981 = vmatpush1.bf16.msra.mxu0 %v4384_v41 }
 0x5e4   : > { %3940 = vmatpush1.bf16.msra.mxu1 %v4382_v43  ;;  %3982 = vmatprep.subr.bf16.mxu0 %v4393_v58  ;;  %v3266_v43 = vld [vmem:[%s6954_s6 + $0x368] sm:$0xff] }
 0x5e5   : > { %3941 = vmatprep.subr.bf16.mxu1 %v4391_v32  ;;  %v3273_v32 = vld [vmem:[%s6954_s6 + $0x3a0] sm:$0xff]  ;;  %v4441_v28 = vcombine.high %v3262_v25, %v3266_v43  ;;  %v3270_v58 = vld [vmem:[%s6954_s6 + $0x388] sm:$0xff]  ;;  %v4440_v39 = vcombine.low %v3262_v25, %v3266_v43 }
 0x5e6   : > { %v4446_v16 = vcombine.low %v3269_v59, %v3273_v32 }
 0x5e7   : > { %3983 = vmatpush1.bf16.msra.mxu0 %v4392_v5 }
 0x5e8   : > { %3942 = vmatpush1.bf16.msra.mxu1 %v4390_v37  ;;  %3984 = vmatprep.subr.bf16.mxu0 %v4401_v18  ;;  %v4447_v37 = vcombine.high %v3269_v59, %v3273_v32  ;;  %v4455_v18 = vcombine.high %v3277_v45, %v3281_v13  ;;  %v4346_v59 = vcombine.low %v3167_v30, %v3171_v38 }
 0x5e9   : > { %3943 = vmatprep.subr.bf16.mxu1 %v4399_v33  ;;  %v3274_v33 = vld [vmem:[%s6954_s6 + $0x3a8] sm:$0xff] }
 0x5ea   : > { %v4449_v5 = vcombine.high %v3270_v58, %v3274_v33 }
 0x5eb   : > { %3985 = vmatpush1.bf16.msra.mxu0 %v4400_v34  ;;  %v3163_v34 = vld [vmem:[%s6954_s6 + $0x30] sm:$0xff] }
 0x5ec   : > { %3944 = vmatpush1.bf16.msra.mxu1 %v4398_v60  ;;  %3986 = vmatprep.subr.bf16.mxu0 %v4409_v49 }
 0x5ed   : > { %3945 = vmatprep.subr.bf16.mxu1 %v4407_v21  ;;  %v3278_v21 = vld [vmem:[%s6954_s6 + $0x3c8] sm:$0xff] }
 0x5ef   : > { %3987 = vmatpush1.bf16.msra.mxu0 %v4408_v44 }
 0x5f0   : > { %3946 = vmatpush1.bf16.msra.mxu1 %v4406_v15 }
 0x5f1   : > { %3947 = vmatprep.subr.bf16.mxu1 %v4415_v23  ;;  %v4448_v23 = vcombine.low %v3270_v58, %v3274_v33 }
 0x5f4   : > { %3948 = vmatpush1.bf16.msra.mxu1 %v4414_v55  ;;  %v4339_v55 = vcombine.high %v3159_v19, %v3163_v34 }
 0x64d   : > { %v6176_v48 = vpop.f32.mrb[8].mxu0 }
 0x64e   : > { %v6187_v57 = vpop.f32.mrb[9].mxu0  ;;  %v6274_v10 = vadd.f32 %v6176_v48, %v6258_v0  ;;  %v3242_v48 = vld [vmem:[%s6954_s6 + $0x2a8] sm:$0xff] }
 0x64f   : > { %v2768_v26 = vpop.f32.mrb[10].mxu0  ;;  %v6278_v1 = vadd.f32 %v6187_v57, %v6258_v0  ;;  %v4416_v6 = vcombine.low %v3238_v50, %v3242_v48 }
 0x650   : > { %v2769_v8 = vpop.f32.mrb[11].mxu0  ;;  %v3245_v26 = vld [vmem:[%s6954_s6 + $0x2c0] sm:$0xff]  ;;  %v6293_v57 = vmul.f32 0.70710677, %v6274_v10 }
 0x651   : > { %v4417_v8 = vcombine.high %v3238_v50, %v3242_v48  ;;  %v6296_v29 = vmul.f32 0.70710677, %v6278_v1  ;;  %v4423_v42 = vcombine.high %v3245_v26, %v3249_v51  ;;  %v4422_v31 = vcombine.low %v3245_v26, %v3249_v51 }
 0x652   : > { %v6311_v9 = vand.u32 2147483647, %v6293_v57  ;;  %v4454_v26 = vcombine.low %v3277_v45, %v3281_v13  ;;  %v4457_v51 = vcombine.high %v3278_v21, %v3282_v3  ;;  %vm2910_vm0 = vcmp.ge.f32.partialorder %v6293_v57, 0.0 }
 0x653   : > { %3988 = vmatprep.subr.bf16.mxu0 %v4417_v8  ;;  %v6314_v47 = vand.u32 2147483647, %v6296_v29  ;;  %3949 = vmatprep.subr.bf16.mxu1 %v4423_v42  ;;  %v3160_v8 = vld [vmem:[%s6954_s6 + $0x18] sm:$0xff]  ;;  %vm2911_vm4 = vcmp.ge.f32.partialorder %v6296_v29, 0.0 }
 0x654   : > { %v2934_v40 = vmul.f32 0.3275911, %v6311_v9  ;;  %3989 = vmatpush1.bf16.msra.mxu0 %v4416_v6  ;;  %3950 = vmatpush1.bf16.msra.mxu1 %v4422_v31  ;;  %v3164_v42 = vld [vmem:[%s6954_s6 + $0x38] sm:$0xff]  ;;  %v4456_v6 = vcombine.low %v3278_v21, %v3282_v3 }
 0x655   : > { %3990 = vmatprep.subr.bf16.mxu0 %v4425_v52  ;;  %v2935_v20 = vmul.f32 0.3275911, %v6314_v47  ;;  %3951 = vmatprep.subr.bf16.mxu1 %v4431_v53  ;;  %v4338_v52 = vcombine.low %v3159_v19, %v3163_v34  ;;  %v4341_v53 = vcombine.high %v3160_v8, %v3164_v42  ;;  %v4340_v25 = vcombine.low %v3160_v8, %v3164_v42  ;;  %v3203_v8 = vld [vmem:[%s6954_s6 + $0x170] sm:$0xff] }
 0x656   : > { %v2942_v36 = vadd.f32 1.0, %v2934_v40  ;;  %v3172_v40 = vld [vmem:[%s6954_s6 + $0x78] sm:$0xff]  ;;  %v3038_v34 = vsub.f32 0.0, %v6311_v9 }
 0x657   : > { %v2943_v41 = vadd.f32 1.0, %v2935_v20  ;;  %v4349_v32 = vcombine.high %v3168_v56, %v3172_v40  ;;  %v4348_v58 = vcombine.low %v3168_v56, %v3172_v40 }
 0x658   : > { %3991 = vmatpush1.bf16.msra.mxu0 %v4424_v7  ;;  %3952 = vmatpush1.bf16.msra.mxu1 %v4430_v17  ;;  %4739 = vrcp.f32 %v2942_v36  ;;  %v3175_v17 = vld [vmem:[%s6954_s6 + $0x90] sm:$0xff] }
 0x659   : > { %3992 = vmatprep.subr.bf16.mxu0 %v4433_v4  ;;  %3953 = vmatprep.subr.bf16.mxu1 %v4439_v22  ;;  %4741 = vrcp.f32 %v2943_v41  ;;  %v3179_v4 = vld [vmem:[%s6954_s6 + $0xb0] sm:$0xff] }
 0x65a   : > { %v4355_v36 = vcombine.high %v3175_v17, %v3179_v4  ;;  %v3183_v41 = vld [vmem:[%s6954_s6 + $0xd0] sm:$0xff]  ;;  %v4354_v45 = vcombine.low %v3175_v17, %v3179_v4  ;;  %v3204_v17 = vld [vmem:[%s6954_s6 + $0x178] sm:$0xff] }
 0x65c   : > { %3993 = vmatpush1.bf16.msra.mxu0 %v4432_v62  ;;  %3954 = vmatpush1.bf16.msra.mxu1 %v4438_v61  ;;  %v3176_v62 = vld [vmem:[%s6954_s6 + $0x98] sm:$0xff] }
 0x65d   : > { %3994 = vmatprep.subr.bf16.mxu0 %v4441_v28  ;;  %3955 = vmatprep.subr.bf16.mxu1 %v4447_v37  ;;  %v3180_v61 = vld [vmem:[%s6954_s6 + $0xb8] sm:$0xff]  ;;  %v3187_v37 = vld [vmem:[%s6954_s6 + $0xf0] sm:$0xff] }
 0x65e   : > { %v4357_v13 = vcombine.high %v3176_v62, %v3180_v61  ;;  %v4356_v21 = vcombine.low %v3176_v62, %v3180_v61 }
 0x660   : > { %3995 = vmatpush1.bf16.msra.mxu0 %v4440_v39  ;;  %3956 = vmatpush1.bf16.msra.mxu1 %v4446_v16  ;;  %v4363_v39 = vcombine.high %v3183_v41, %v3187_v37  ;;  %v3184_v16 = vld [vmem:[%s6954_s6 + $0xd8] sm:$0xff] }
 0x661   : > { %3996 = vmatprep.subr.bf16.mxu0 %v4449_v5  ;;  %3957 = vmatprep.subr.bf16.mxu1 %v4455_v18  ;;  %v3188_v5 = vld [vmem:[%s6954_s6 + $0xf8] sm:$0xff]  ;;  %v3195_v18 = vld [vmem:[%s6954_s6 + $0x130] sm:$0xff] }
 0x662   : > { %v6397_v11 = vpop.eup %4739  ;;  %v4365_v19 = vcombine.high %v3184_v16, %v3188_v5  ;;  %v4364_v38 = vcombine.low %v3184_v16, %v3188_v5  ;;  %v6513_v16 = vld [vmem:[%s6954_s6 + $0x1f0] sm:$0xff] }
 0x663   : > { %v6412_v20 = vpop.eup %4741  ;;  %v2966_v43 = vmul.f32 1.0614054, %v6397_v11 }
 0x664   : > { %3997 = vmatpush1.bf16.msra.mxu0 %v4448_v23  ;;  %3958 = vmatpush1.bf16.msra.mxu1 %v4454_v26  ;;  %v2967_v28 = vmul.f32 1.0614054, %v6412_v20  ;;  %v3192_v23 = vld [vmem:[%s6954_s6 + $0x118] sm:$0xff] }
 0x665   : > { %3998 = vmatprep.subr.bf16.mxu0 %v4457_v51  ;;  %4009 = vmatprep.subr.bf16.mxu1 %v4339_v55  ;;  %v2974_v33 = vadd.f32 -1.4531521, %v2966_v43  ;;  %v3199_v55 = vld [vmem:[%s6954_s6 + $0x150] sm:$0xff] }
 0x666   : > { %v4379_v40 = vcombine.high %v3199_v55, %v3203_v8 }
 0x667   : > { %3960 = vmatmul.mubr.bf16.vlgmr.msra.gmra.mrb[20].mxu1 %v4900_v24  ;;  %v2982_v3 = vmul.f32 %v6397_v11, %v2974_v33  ;;  %v6498_v33 = vmul.f32 0.5, %v6274_v10  ;;  %v6518_v10 = vsel %vm2910_vm0, 1.0, %v4790_v14 }
 0x668   : > { %3999 = vmatpush1.bf16.msra.mxu0 %v4456_v6  ;;  %4010 = vmatpush1.bf16.msra.mxu1 %v4338_v52 }
 0x669   : > { %4050 = vmatprep.subr.bf16.mxu0 %v4341_v53  ;;  %4011 = vmatprep.subr.bf16.mxu1 %v4347_v46  ;;  %v2990_v6 = vadd.f32 1.4214138, %v2982_v3  ;;  %v3046_v46 = vmul.f32 %v3038_v34, %v6311_v9  ;;  %v3211_v9 = vld [vmem:[%s6954_s6 + $0x1b0] sm:$0xff] }
 0x66a   : > { %4041 = vmatprep.mubr.bf16.mxu1 %v4912_v27 }
 0x66b   : > { %4001 = vmatmul.mubr.bf16.vlgmr.msra.gmra.mrb[20].mxu0 %v4900_v24 }
 0x66c   : > { %4051 = vmatpush1.bf16.msra.mxu0 %v4340_v25  ;;  %4082 = vmatprep.mubr.bf16.mxu0 %v4912_v27  ;;  %v3191_v27 = vld [vmem:[%s6954_s6 + $0x110] sm:$0xff] }
 0x66d   : > { %4052 = vmatprep.subr.bf16.mxu0 %v4349_v32  ;;  %4012 = vmatpush1.bf16.msra.mxu1 %v4346_v59  ;;  %v4370_v52 = vcombine.low %v3191_v27, %v3195_v18  ;;  %v2998_v32 = vmul.f32 %v6397_v11, %v2990_v6  ;;  %v6558_v6 = vld [vmem:[%s6954_s6 + $0x230] sm:$0xff] }
 0x66e   : > { %4013 = vmatprep.subr.bf16.mxu1 %v4355_v36  ;;  %v4378_v36 = vcombine.low %v3199_v55, %v3203_v8 }
 0x670   : > { %4053 = vmatpush1.bf16.msra.mxu0 %v4348_v58  ;;  %v6495_v58 = vld [vmem:[%s6954_s6 + $0x1b8] sm:$0xff] }
 0x671   : > { %4054 = vmatprep.subr.bf16.mxu0 %v4357_v13  ;;  %4014 = vmatpush1.bf16.msra.mxu1 %v4354_v45  ;;  %v6501_v45 = vmul.f32 0.5, %v6278_v1 }
 0x672   : > { %4015 = vmatprep.subr.bf16.mxu1 %v4363_v39  ;;  %v6508_v39 = vld [vmem:[%s6954_s6 + $0x1d0] sm:$0xff] }
 0x673   : > { %v4395_v29 = vcombine.high %v6508_v39, %v6513_v16 }
 0x674   : > { %4055 = vmatpush1.bf16.msra.mxu0 %v4356_v21 }
 0x675   : > { %4056 = vmatprep.subr.bf16.mxu0 %v4365_v19 }
 0x678   : > { %4057 = vmatpush1.bf16.msra.mxu0 %v4364_v38  ;;  %v6553_v38 = vld [vmem:[%s6954_s6 + $0x210] sm:$0xff] }
 0x67a   : > { %v2805_v60 = vpop.f32.mrb[12].mxu0 }
 0x67b   : > { %v6361_v54 = vadd.f32 %v2805_v60, %v6258_v0  ;;  %v2807_v63 = vpop.f32.mrb[13].mxu0  ;;  %v2975_v60 = vadd.f32 -1.4531521, %v2967_v28  ;;  %v3054_v28 = vmul.f32 1.442695, %v3046_v46 }
 0x67c   : > { %v6370_v15 = vadd.f32 %v2807_v63, %v6258_v0  ;;  %v2809_v49 = vpop.f32.mrb[14].mxu0  ;;  %v4362_v63 = vcombine.low %v3183_v41, %v3187_v37  ;;  %v6490_v37 = vld [vmem:[%s6954_s6 + $0x198] sm:$0xff] }
 0x67d   : > { %v6373_v50 = vmul.f32 0.70710677, %v6361_v54  ;;  %v2810_v48 = vpop.f32.mrb[15].mxu0  ;;  %v4371_v49 = vcombine.high %v3191_v27, %v3195_v18  ;;  %v2983_v51 = vmul.f32 %v6412_v20, %v2975_v60  ;;  %v6524_v27 = vsel %vm2911_vm4, 1.0, %v4790_v14 }
 0x67e   : > { %v6376_v44 = vmul.f32 0.70710677, %v6370_v15  ;;  %v3196_v48 = vld [vmem:[%s6954_s6 + $0x138] sm:$0xff]  ;;  %4016 = vmatpush1.bf16.msra.mxu1 %v4362_v63  ;;  %v3006_v18 = vadd.f32 -0.28449672, %v2998_v32  ;;  %v4389_v57 = vcombine.high %v6490_v37, %v6495_v58 }
 0x67f   : > { %v6385_v2 = vand.u32 2147483647, %v6373_v50  ;;  %v4373_v53 = vcombine.high %v3192_v23, %v3196_v48  ;;  %4017 = vmatprep.subr.bf16.mxu1 %v4371_v49  ;;  %v2991_v4 = vadd.f32 1.4214138, %v2983_v51  ;;  %v4372_v59 = vcombine.low %v3192_v23, %v3196_v48  ;;  %v6537_v49 = vld [vmem:[%s6954_s6 + $0x1d8] sm:$0xff] }
 0x680   : > { %v6394_v12 = vand.u32 2147483647, %v6376_v44  ;;  %v6542_v23 = vld [vmem:[%s6954_s6 + $0x1f8] sm:$0xff]  ;;  %v3014_v46 = vmul.f32 %v6397_v11, %v3006_v18  ;;  %vm2912_vm6 = vcmp.ge.f32.partialorder %v6373_v50, 0.0  ;;  %vm2913_vm11 = vcmp.ge.f32.partialorder %v6376_v44, 0.0 }
 0x681   : > { %v2936_v31 = vmul.f32 0.3275911, %v6385_v2  ;;  %4058 = vmatprep.subr.bf16.mxu0 %v4373_v53  ;;  %v3040_v13 = vsub.f32 0.0, %v6385_v2 }
 0x682   : > { %v2937_v35 = vmul.f32 0.3275911, %v6394_v12  ;;  %4018 = vmatpush1.bf16.msra.mxu1 %v4370_v52  ;;  %4059 = vmatpush1.bf16.msra.mxu0 %v4372_v59  ;;  %v6589_v59 = vld [vmem:[%s6954_s6 + $0x238] sm:$0xff] }
 0x683   : > { %v2944_v7 = vadd.f32 1.0, %v2936_v31  ;;  %4019 = vmatprep.subr.bf16.mxu1 %v4379_v40  ;;  %v3048_v51 = vmul.f32 %v3040_v13, %v6385_v2 }
 0x684   : > { %v2945_v22 = vadd.f32 1.0, %v2937_v35  ;;  %v3039_v35 = vsub.f32 0.0, %v6314_v47 }
 0x685   : > { %4743 = vrcp.f32 %v2944_v7  ;;  %v3200_v7 = vld [vmem:[%s6954_s6 + $0x158] sm:$0xff] }
 0x686   : > { %4745 = vrcp.f32 %v2945_v22  ;;  %v6476_v22 = vld [vmem:[%s6954_s6 + $0x190] sm:$0xff]  ;;  %v4381_v62 = vcombine.high %v3200_v7, %v3204_v17  ;;  %v3047_v61 = vmul.f32 %v3039_v35, %v6314_v47  ;;  %v2999_v47 = vmul.f32 %v6412_v20, %v2991_v4  ;;  %4020 = vmatpush1.bf16.msra.mxu1 %v4378_v36 }
 0x687   : > { %v4387_v41 = vcombine.high %v6476_v22, %v3211_v9  ;;  %v4380_v60 = vcombine.low %v3200_v7, %v3204_v17  ;;  %v4386_v3 = vcombine.low %v6476_v22, %v3211_v9  ;;  %4747 = vpow2.f32 %v3054_v28  ;;  %v6600_v28 = vld [vmem:[%s6954_s6 + $0x250] sm:$0xff] }
 0x688   : > { %4060 = vmatprep.subr.bf16.mxu0 %v4381_v62  ;;  %v3056_v63 = vmul.f32 1.442695, %v3047_v61  ;;  %v3007_v48 = vadd.f32 -0.28449672, %v2999_v47  ;;  %v4394_v35 = vcombine.low %v6508_v39, %v6513_v16  ;;  %v4397_v17 = vcombine.high %v6537_v49, %v6542_v23 }
 0x689   : > { %4021 = vmatprep.subr.bf16.mxu1 %v4387_v41  ;;  %4061 = vmatpush1.bf16.msra.mxu0 %v4380_v60  ;;  %v3058_v36 = vmul.f32 1.442695, %v3048_v51  ;;  %v4396_v61 = vcombine.low %v6537_v49, %v6542_v23  ;;  %v6605_v41 = vld [vmem:[%s6954_s6 + $0x270] sm:$0xff]  ;;  %v4402_v39 = vcombine.low %v6553_v38, %v6558_v6  ;;  %v3022_v16 = vadd.f32 0.2548296, %v3014_v46 }
 0x68a   : > { %4062 = vmatprep.subr.bf16.mxu0 %v4389_v57  ;;  %4022 = vmatpush1.bf16.msra.mxu1 %v4386_v3  ;;  %4749 = vpow2.f32 %v3056_v63  ;;  %v3015_v32 = vmul.f32 %v6412_v20, %v3007_v48  ;;  %v4411_v63 = vcombine.high %v6600_v28, %v6605_v41  ;;  %v6638_v48 = vld [vmem:[%s6954_s6 + $0x290] sm:$0xff] }
 0x68b   : > { %4023 = vmatprep.subr.bf16.mxu1 %v4395_v29  ;;  %4751 = vpow2.f32 %v3058_v36  ;;  %v6643_v51 = vld [vmem:[%s6954_s6 + $0x2b0] sm:$0xff]  ;;  %v6691_v36 = vld [vmem:[%s6954_s6 + $0x2d8] sm:$0xff] }
 0x68c   : > { %v3023_v29 = vadd.f32 0.2548296, %v3015_v32  ;;  %v6664_v46 = vld [vmem:[%s6954_s6 + $0x2d0] sm:$0xff] }
 0x68e   : > { %4024 = vmatpush1.bf16.msra.mxu1 %v4394_v35 }
 0x68f   : > { %v6452_v26 = vpop.eup %4743 }
 0x690   : > { %v6461_v42 = vpop.eup %4745  ;;  %v2968_v30 = vmul.f32 1.0614054, %v6452_v26 }
 0x691   : > { %v2969_v31 = vmul.f32 1.0614054, %v6461_v42 }
 0x692   : > { %v2976_v56 = vadd.f32 -1.4531521, %v2968_v30  ;;  %v4388_v30 = vcombine.low %v6490_v37, %v6495_v58 }
 0x693   : > { %v2977_v43 = vadd.f32 -1.4531521, %v2969_v31 }
 0x694   : > { %v2984_v25 = vmul.f32 %v6452_v26, %v2976_v56  ;;  %v3041_v56 = vsub.f32 0.0, %v6394_v12  ;;  %4063 = vmatpush1.bf16.msra.mxu0 %v4388_v30 }
 0x695   : > { %v2985_v5 = vmul.f32 %v6461_v42, %v2977_v43  ;;  %v6584_v43 = vld [vmem:[%s6954_s6 + $0x218] sm:$0xff]  ;;  %4064 = vmatprep.subr.bf16.mxu0 %v4397_v17  ;;  %v4418_v17 = vcombine.low %v6638_v48, %v6643_v51 }
 0x696   : > { %v2992_v1 = vadd.f32 1.4214138, %v2984_v25  ;;  %v4403_v25 = vcombine.high %v6553_v38, %v6558_v6  ;;  %v4405_v18 = vcombine.high %v6584_v43, %v6589_v59  ;;  %v4404_v57 = vcombine.low %v6584_v43, %v6589_v59  ;;  %v6651_v6 = vld [vmem:[%s6954_s6 + $0x298] sm:$0xff] }
 0x697   : > { %v2993_v2 = vadd.f32 1.4214138, %v2985_v5 }
 0x698   : > { %v3000_v31 = vmul.f32 %v6452_v26, %v2992_v1  ;;  %v3049_v1 = vmul.f32 %v3041_v56, %v6394_v12  ;;  %4025 = vmatprep.subr.bf16.mxu1 %v4403_v25  ;;  %v6625_v12 = vld [vmem:[%s6954_s6 + $0x258] sm:$0xff]  ;;  %4065 = vmatpush1.bf16.msra.mxu0 %v4396_v61  ;;  %v6669_v56 = vld [vmem:[%s6954_s6 + $0x2f0] sm:$0xff]  ;;  %v3031_v25 = vmul.f32 %v6412_v20, %v3023_v29 }
 0x699   : > { %v2846_v21 = vpop.f32.mrb[16].mxu1  ;;  %v3001_v58 = vmul.f32 %v6461_v42, %v2993_v2  ;;  %v3030_v2 = vmul.f32 %v6397_v11, %v3022_v16  ;;  %4066 = vmatprep.subr.bf16.mxu0 %v4405_v18  ;;  %4026 = vmatpush1.bf16.msra.mxu1 %v4402_v39  ;;  %v6696_v61 = vld [vmem:[%s6954_s6 + $0x2f8] sm:$0xff] }
 0x69a   : > { %v6530_v19 = vadd.f32 %v2846_v21, %v6258_v0  ;;  %v2848_v34 = vpop.f32.mrb[17].mxu1  ;;  %v3008_v37 = vadd.f32 -0.28449672, %v3000_v31  ;;  %v6656_v31 = vld [vmem:[%s6954_s6 + $0x2b8] sm:$0xff]  ;;  %4027 = vmatprep.subr.bf16.mxu1 %v4411_v63  ;;  %v4428_v18 = vcombine.low %v6691_v36, %v6696_v61 }
 0x69b   : > { %v6546_v55 = vadd.f32 %v2848_v34, %v6258_v0  ;;  %v2850_v8 = vpop.f32.mrb[18].mxu1  ;;  %v6630_v34 = vld [vmem:[%s6954_s6 + $0x278] sm:$0xff]  ;;  %v3009_v38 = vadd.f32 -0.28449672, %v3001_v58  ;;  %v4420_v59 = vcombine.low %v6651_v6, %v6656_v31  ;;  %v4421_v32 = vcombine.high %v6651_v6, %v6656_v31 }
 0x69c   : > { %v6562_v52 = vmul.f32 0.70710677, %v6530_v19  ;;  %v2851_v53 = vpop.f32.mrb[19].mxu1  ;;  %v4748_v8 = vpop.eup %4747  ;;  %v3016_v30 = vmul.f32 %v6452_v26, %v3008_v37  ;;  %v4413_v35 = vcombine.high %v6625_v12, %v6630_v34  ;;  %v4412_v11 = vcombine.low %v6625_v12, %v6630_v34  ;;  %4067 = vmatpush1.bf16.msra.mxu0 %v4404_v57  ;;  %v6725_v57 = vld [vmem:[%s6954_s6 + $0x318] sm:$0xff]  ;;  %v6735_v12 = vld [vmem:[%s6954_s6 + $0x350] sm:$0xff] }
 0x69d   : > { %v6569_v40 = vmul.f32 0.70710677, %v6546_v55  ;;  %v2887_v7 = vpop.f32.mrb[16].mxu0  ;;  %v3060_v53 = vmul.f32 1.442695, %v3049_v1  ;;  %v4750_v20 = vpop.eup %4749  ;;  %v4426_v58 = vcombine.low %v6664_v46, %v6669_v56  ;;  %v3070_v39 = vmul.f32 %v4748_v8, %v3030_v2  ;;  %v6730_v63 = vld [vmem:[%s6954_s6 + $0x338] sm:$0xff] }
 0x69e   : > { %v6574_v4 = vand.u32 2147483647, %v6562_v52  ;;  %v6577_v22 = vadd.f32 %v2887_v7, %v6258_v0  ;;  %v2889_v9 = vpop.f32.mrb[17].mxu0  ;;  %4068 = vmatprep.subr.bf16.mxu0 %v4413_v35  ;;  %v4427_v1 = vcombine.high %v6664_v46, %v6669_v56  ;;  %v3071_v34 = vmul.f32 %v4750_v20, %v3031_v25  ;;  %v6749_v8 = vld [vmem:[%s6954_s6 + $0x358] sm:$0xff]  ;;  %v4752_v31 = vpop.eup %4751  ;;  %v6775_v25 = vld [vmem:[%s6954_s6 + $0x390] sm:$0xff] }
 0x69f   : > { %v6593_v62 = vand.u32 2147483647, %v6569_v40  ;;  %v2891_v13 = vpop.f32.mrb[18].mxu0  ;;  %v6633_v23 = vadd.f32 %v2889_v9, %v6258_v0  ;;  %v4410_v0 = vcombine.low %v6600_v28, %v6605_v41  ;;  %v4419_v9 = vcombine.high %v6638_v48, %v6643_v51  ;;  %v6744_v51 = vld [vmem:[%s6954_s6 + $0x370] sm:$0xff] }
 0x6a0   : > { %v2938_v47 = vmul.f32 0.3275911, %v6574_v4  ;;  %v2892_v60 = vpop.f32.mrb[19].mxu0  ;;  %v6616_v3 = vmul.f32 0.70710677, %v6577_v22  ;;  %v3017_v41 = vmul.f32 %v6461_v42, %v3009_v38  ;;  %v6710_v13 = vld [vmem:[%s6954_s6 + $0x330] sm:$0xff]  ;;  %4069 = vmatpush1.bf16.msra.mxu0 %v4412_v11  ;;  %v4436_v35 = vcombine.low %v6725_v57, %v6730_v63 }
 0x6a1   : > { %v2939_v5 = vmul.f32 0.3275911, %v6593_v62  ;;  %v6682_v43 = vmul.f32 0.70710677, %v6633_v23  ;;  %v3024_v28 = vadd.f32 0.2548296, %v3016_v30  ;;  %4028 = vmatpush1.bf16.msra.mxu1 %v4410_v0  ;;  %4070 = vmatprep.subr.bf16.mxu0 %v4421_v32  ;;  %v4437_v46 = vcombine.high %v6725_v57, %v6730_v63 }
 0x6a2   : > { %v2946_v21 = vadd.f32 1.0, %v2938_v47  ;;  %v6672_v7 = vand.u32 2147483647, %v6616_v3  ;;  %v6705_v47 = vld [vmem:[%s6954_s6 + $0x310] sm:$0xff]  ;;  %4029 = vmatprep.subr.bf16.mxu1 %v4419_v9  ;;  %v3043_v29 = vsub.f32 0.0, %v6593_v62  ;;  %v6754_v30 = vld [vmem:[%s6954_s6 + $0x378] sm:$0xff]  ;;  %v4442_v11 = vcombine.low %v6735_v12, %v6744_v51 }
 0x6a3   : > { %v2947_v49 = vadd.f32 1.0, %v2939_v5  ;;  %v6713_v16 = vand.u32 2147483647, %v6682_v43  ;;  %v3042_v5 = vsub.f32 0.0, %v6574_v4  ;;  %v4434_v48 = vcombine.low %v6705_v47, %v6710_v13  ;;  %v6780_v32 = vld [vmem:[%s6954_s6 + $0x3b0] sm:$0xff] }
 0x6a4   : > { %4753 = vrcp.f32 %v2946_v21  ;;  %v2940_v37 = vmul.f32 0.3275911, %v6672_v7  ;;  %v4429_v21 = vcombine.high %v6691_v36, %v6696_v61  ;;  %v3032_v38 = vmul.f32 %v6452_v26, %v3024_v28  ;;  %4071 = vmatpush1.bf16.msra.mxu0 %v4420_v59 }
 0x6a5   : > { %4755 = vrcp.f32 %v2947_v49  ;;  %v2941_v49 = vmul.f32 0.3275911, %v6713_v16  ;;  %v3025_v0 = vadd.f32 0.2548296, %v3017_v41  ;;  %v4435_v6 = vcombine.high %v6705_v47, %v6710_v13  ;;  %4030 = vmatpush1.bf16.msra.mxu1 %v4418_v17 }
 0x6a6   : > { %4757 = vpow2.f32 %v3060_v53  ;;  %v2948_v60 = vadd.f32 1.0, %v2940_v37  ;;  %v3078_v2 = vsub.f32 1.0, %v3070_v39  ;;  %v3050_v26 = vmul.f32 %v3042_v5, %v6574_v4  ;;  %4031 = vmatprep.subr.bf16.mxu1 %v4427_v1  ;;  %v6789_v37 = vld [vmem:[%s6954_s6 + $0x398] sm:$0xff]  ;;  %4072 = vmatprep.subr.bf16.mxu0 %v4429_v21 }
 0x6a7   : > { %v2949_v53 = vadd.f32 1.0, %v2941_v49  ;;  %v4443_v9 = vcombine.high %v6735_v12, %v6744_v51  ;;  %v4444_v17 = vcombine.low %v6749_v8, %v6754_v30  ;;  %v3079_v20 = vsub.f32 1.0, %v3071_v34  ;;  %v6794_v39 = vld [vmem:[%s6954_s6 + $0x3b8] sm:$0xff] }
 0x6a8   : > { %4759 = vrcp.f32 %v2948_v60  ;;  %v3051_v41 = vmul.f32 %v3043_v29, %v6593_v62  ;;  %v3072_v1 = vmul.f32 %v4752_v31, %v3032_v38  ;;  %v3033_v5 = vmul.f32 %v6461_v42, %v3025_v0  ;;  %v6808_v42 = vld [vmem:[%s6954_s6 + $0x3d0] sm:$0xff]  ;;  %4073 = vmatpush1.bf16.msra.mxu0 %v4428_v18 }
 0x6a9   : > { %4761 = vrcp.f32 %v2949_v53  ;;  %v4445_v62 = vcombine.high %v6749_v8, %v6754_v30  ;;  %v3086_v34 = vmul.f32 %v3078_v2, %v6518_v10  ;;  %4032 = vmatpush1.bf16.msra.mxu1 %v4426_v58  ;;  %v4451_v53 = vcombine.high %v6775_v25, %v6780_v32  ;;  %v6816_v58 = vld [vmem:[%s6954_s6 + $0x3f0] sm:$0xff]  ;;  %4074 = vmatprep.subr.bf16.mxu0 %v4437_v46 }
 0x6aa   : > { %v3062_v59 = vmul.f32 1.442695, %v3050_v26  ;;  %v3044_v0 = vsub.f32 0.0, %v6672_v7  ;;  %4033 = vmatprep.subr.bf16.mxu1 %v4435_v6  ;;  %v3087_v31 = vmul.f32 %v3079_v20, %v6524_v27  ;;  %v4453_v26 = vcombine.high %v6789_v37, %v6794_v39  ;;  %v6825_v6 = vld [vmem:[%s6954_s6 + $0x3d8] sm:$0xff] }
 0x6ab   : > { %v3080_v10 = vsub.f32 1.0, %v3072_v1  ;;  %v4458_v49 = vcombine.low %v6808_v42, %v6816_v58  ;;  %v4459_v1 = vcombine.high %v6808_v42, %v6816_v58  ;;  %v2920_v47 = vsel %vm2912_vm6, 1.0, %v4790_v14 }
 0x6ac   : > { %4763 = vpow2.f32 %v3062_v59  ;;  %v3052_v36 = vmul.f32 %v3044_v0, %v6672_v7  ;;  %4075 = vmatpush1.bf16.msra.mxu0 %v4436_v35  ;;  %v3095_v63 = vadd.f32 1.0, %v3087_v31  ;;  %v2921_v35 = vsel %vm2913_vm11, 1.0, %v4790_v14 }
 0x6ad   : > { %4034 = vmatpush1.bf16.msra.mxu1 %v4434_v48  ;;  %v3088_v48 = vmul.f32 %v3080_v10, %v2920_v47  ;;  %4076 = vmatprep.subr.bf16.mxu0 %v4445_v62  ;;  %vm2914_vm12 = vcmp.ge.f32.partialorder %v6562_v52, 0.0  ;;  %vm2915_vm13 = vcmp.ge.f32.partialorder %v6569_v40, 0.0  ;;  %vm2916_vm14 = vcmp.ge.f32.partialorder %v6616_v3, 0.0 }
 0x6ae   : > { %v6763_v56 = vpop.eup %4753  ;;  %4035 = vmatprep.subr.bf16.mxu1 %v4443_v9  ;;  %v3094_v9 = vadd.f32 1.0, %v3086_v34  ;;  %v6887_v8 = vmul.f32 %v3095_v63, %v6501_v45  ;;  %v2923_v42 = vsel %vm2915_vm13, 1.0, %v4790_v14  ;;  %vm2917_vm15 = vcmp.ge.f32.partialorder %v6682_v43, 0.0 }
 0x6af   : > { %v6782_v4 = vpop.eup %4755  ;;  %v2970_v28 = vmul.f32 1.0614054, %v6763_v56  ;;  %v3096_v34 = vadd.f32 1.0, %v3088_v48  ;;  %v2922_v48 = vsel %vm2914_vm12, 1.0, %v4790_v14  ;;  %v2925_v3 = vsel %vm2917_vm15, 1.0, %v4790_v14 }
 0x6b0   : > { %v2971_v60 = vmul.f32 1.0614054, %v6782_v4  ;;  %v4758_v21 = vpop.eup %4757  ;;  %4077 = vmatpush1.bf16.msra.mxu0 %v4444_v17 }
 0x6b1   : > { %v2978_v29 = vadd.f32 -1.4531521, %v2970_v28  ;;  %v3064_v28 = vmul.f32 1.442695, %v3051_v41  ;;  %v3073_v27 = vmul.f32 %v4758_v21, %v3033_v5  ;;  %4036 = vmatpush1.bf16.msra.mxu1 %v4442_v11  ;;  %4078 = vmatprep.subr.bf16.mxu0 %v4453_v26 }
 0x6b2   : > { %v2979_v38 = vadd.f32 -1.4531521, %v2971_v60  ;;  %v6830_v60 = vld [vmem:[%s6954_s6 + $0x3f8] sm:$0xff]  ;;  %v6845_v5 = vpop.eup %4759  ;;  %4037 = vmatprep.subr.bf16.mxu1 %v4451_v53  ;;  %v6879_v53 = vmul.f32 %v3094_v9, %v6498_v33 }
 0x6b3   : > { %v2986_v2 = vmul.f32 %v6763_v56, %v2978_v29  ;;  %v3045_v29 = vsub.f32 0.0, %v6713_v16  ;;  %v4460_v61 = vcombine.low %v6825_v6, %v6830_v60  ;;  %4765 = vpow2.f32 %v3064_v28  ;;  %v6860_v7 = vpop.eup %4761 }
 0x6b4   : > { %v2987_v20 = vmul.f32 %v6782_v4, %v2979_v38  ;;  %v2972_v18 = vmul.f32 1.0614054, %v6845_v5  ;;  %v3081_v46 = vsub.f32 1.0, %v3073_v27  ;;  %v2973_v28 = vmul.f32 1.0614054, %v6860_v7 }
 0x6b5   : > { %v2994_v41 = vadd.f32 1.4214138, %v2986_v2  ;;  %v3053_v21 = vmul.f32 %v3045_v29, %v6713_v16  ;;  %v3066_v2 = vmul.f32 1.442695, %v3052_v36  ;;  %v4461_v57 = vcombine.high %v6825_v6, %v6830_v60 }
 0x6b6   : > { %v2995_v38 = vadd.f32 1.4214138, %v2987_v20  ;;  %v2980_v0 = vadd.f32 -1.4531521, %v2972_v18  ;;  %v3089_v12 = vmul.f32 %v3081_v46, %v2921_v35  ;;  %v2981_v11 = vadd.f32 -1.4531521, %v2973_v28  ;;  %v4764_v17 = vpop.eup %4763 }
 0x6b7   : > { %v3002_v13 = vmul.f32 %v6763_v56, %v2994_v41  ;;  %v3068_v44 = vmul.f32 1.442695, %v3053_v21  ;;  %v6958_v20 = vcombine.low %v6775_v25, %v6780_v32  ;;  %v2896_v41 = vmul.f32 0.5, %v6361_v54 }
 0x6b8   : > { %v3003_v59 = vmul.f32 %v6782_v4, %v2995_v38  ;;  %v2988_v62 = vmul.f32 %v6845_v5, %v2980_v0  ;;  %4767 = vpow2.f32 %v3066_v2  ;;  %v2989_v38 = vmul.f32 %v6860_v7, %v2981_v11 }
 0x6b9   : > { %v3010_v50 = vadd.f32 -0.28449672, %v3002_v13  ;;  %4038 = vmatpush1.bf16.msra.mxu1 %v6958_v20  ;;  %v3097_v26 = vadd.f32 1.0, %v3089_v12  ;;  %v6959_v32 = vcombine.low %v6789_v37, %v6794_v39  ;;  %v6897_v45 = vmul.f32 %v3096_v34, %v2896_v41 }
 0x6ba   : > { %v3011_v10 = vadd.f32 -0.28449672, %v3003_v59  ;;  %v2996_v27 = vadd.f32 1.4214138, %v2988_v62  ;;  %4039 = vmatprep.subr.bf16.mxu1 %v4459_v1  ;;  %v2997_v25 = vadd.f32 1.4214138, %v2989_v38  ;;  %4769 = vpow2.f32 %v3068_v44 }
 0x6bb   : > { %v3018_v16 = vmul.f32 %v6763_v56, %v3010_v50  ;;  %4079 = vmatpush1.bf16.msra.mxu0 %v6959_v32  ;;  %v2897_v37 = vmul.f32 0.5, %v6370_v15  ;;  %v2898_v0 = vmul.f32 0.5, %v6530_v19  ;;  %v2899_v6 = vmul.f32 0.5, %v6546_v55 }
 0x6bc   : > { %v3019_v51 = vmul.f32 %v6782_v4, %v3011_v10  ;;  %v3004_v30 = vmul.f32 %v6845_v5, %v2996_v27  ;;  %4080 = vmatprep.subr.bf16.mxu0 %v4461_v57  ;;  %v3005_v13 = vmul.f32 %v6860_v7, %v2997_v25 }
 0x6bd   : > { %v3026_v31 = vadd.f32 0.2548296, %v3018_v16  ;;  %v4766_v1 = vpop.eup %4765  ;;  %4040 = vmatpush1.bf16.msra.mxu1 %v4458_v49  ;;  %v3105_v46 = vmul.f32 %v3097_v26, %v2897_v37 }
 0x6be   : > { %v3027_v29 = vadd.f32 0.2548296, %v3019_v51  ;;  %v3012_v47 = vadd.f32 -0.28449672, %v3004_v30  ;;  %v3013_v58 = vadd.f32 -0.28449672, %v3005_v13 }
 0x6bf   : > { %v3034_v33 = vmul.f32 %v6763_v56, %v3026_v31  ;;  %4081 = vmatpush1.bf16.msra.mxu0 %v4460_v61  ;;  %v2900_v51 = vmul.f32 0.5, %v6577_v22 }
 0x6c0   : > { %v3035_v54 = vmul.f32 %v6782_v4, %v3027_v29  ;;  %v3110_v4 = vadd.f32 %v6887_v8, %v6879_v53  ;;  %v3020_v18 = vmul.f32 %v6845_v5, %v3012_v47  ;;  %4042 = vmatmul.mubr.bf16.vlgmr.msra.gmra.mrb[24].mxu1 %v4900_v24  ;;  %v3021_v52 = vmul.f32 %v6860_v7, %v3013_v58 }
 0x6c1   : > { %v3074_v36 = vmul.f32 %v4764_v17, %v3034_v33 }
 0x6c2   : > { %v3075_v56 = vmul.f32 %v4766_v1, %v3035_v54  ;;  %v3111_v15 = vadd.f32 %v3110_v4, %v6897_v45  ;;  %v3028_v9 = vadd.f32 0.2548296, %v3020_v18  ;;  %4083 = vmatmul.mubr.bf16.vlgmr.msra.gmra.mrb[24].mxu0 %v4900_v24  ;;  %v4768_v10 = vpop.eup %4767  ;;  %v3029_v61 = vadd.f32 0.2548296, %v3021_v52 }
 0x6c3   : > { %v3082_v39 = vsub.f32 1.0, %v3074_v36 }
 0x6c4   : > { %v3083_v49 = vsub.f32 1.0, %v3075_v56  ;;  %v3036_v21 = vmul.f32 %v6845_v5, %v3028_v9  ;;  %v3112_v2 = vadd.f32 %v3111_v15, %v3105_v46  ;;  %v3037_v63 = vmul.f32 %v6860_v7, %v3029_v61  ;;  %v4770_v35 = vpop.eup %4769 }
 0x6c5   : > { %v3090_v59 = vmul.f32 %v3082_v39, %v2922_v48  ;;  %v2924_v5 = vsel %vm2916_vm14, 1.0, %v4790_v14  ;;  %v2901_v7 = vmul.f32 0.5, %v6633_v23 }
 0x6c6   : > { %v3091_v50 = vmul.f32 %v3083_v49, %v2923_v42  ;;  %v3076_v57 = vmul.f32 %v4768_v10, %v3036_v21  ;;  %v3077_v24 = vmul.f32 %v4770_v35, %v3037_v63 }
 0x6c7   : > { %v3098_v40 = vadd.f32 1.0, %v3090_v59 }
 0x6c8   : > { %v3099_v60 = vadd.f32 1.0, %v3091_v50  ;;  %v3084_v62 = vsub.f32 1.0, %v3076_v57  ;;  %v3085_v55 = vsub.f32 1.0, %v3077_v24 }
 0x6c9   : > { %v3106_v28 = vmul.f32 %v3098_v40, %v2898_v0 }
 0x6ca   : > { %v3107_v19 = vmul.f32 %v3099_v60, %v2899_v6  ;;  %v3092_v34 = vmul.f32 %v3084_v62, %v2924_v5  ;;  %v3093_v31 = vmul.f32 %v3085_v55, %v2925_v3 }
 0x6cb   : > { %v3113_v16 = vadd.f32 %v3112_v2, %v3106_v28 }
 0x6cc   : > { %v3100_v11 = vadd.f32 1.0, %v3092_v34  ;;  %v3101_v44 = vadd.f32 1.0, %v3093_v31 }
 0x6cd   : > { %v3114_v12 = vadd.f32 %v3113_v16, %v3107_v19 }
 0x6ce   : > { %v3108_v27 = vmul.f32 %v3100_v11, %v2900_v51  ;;  %v3109_v41 = vmul.f32 %v3101_v44, %v2901_v7 }
 0x6d0   : > { %v3115_v20 = vadd.f32 %v3114_v12, %v3108_v27 }
 0x6d2   : > { %v3116_v29 = vadd.f32 %v3115_v20, %v3109_v41 }
 0x6d4   : > { %3117 = vadd.xlane.f32.xlu1 %v3116_v29 }
 0x73a   : > { %v3961_v38 = vpop.f32.mrb[20].mxu1 }
 0x73b   : > { %v3963_v43 = vpop.f32.mrb[21].mxu1  ;;  %v4091_v63 = vsel %vm606_vm5, %v3961_v38, 0.0 }
 0x73c   : > { %v3965_v33 = vpop.f32.mrb[22].mxu1  ;;  %v4092_v16 = vsel %vm606_vm5, %v3963_v43, 0.0 }
 0x73d   : > { %v3966_v17 = vpop.f32.mrb[23].mxu1 }
 0x73e   : > { %v4002_v30 = vpop.f32.mrb[20].mxu0 }
 0x73f   : > { %v4004_v26 = vpop.f32.mrb[21].mxu0  ;;  %v4093_v35 = vsel %vm606_vm5, %v4002_v30, 0.0 }
 0x740   : > { %v4006_v54 = vpop.f32.mrb[22].mxu0 }
 0x741   : > { %v4007_v22 = vpop.f32.mrb[23].mxu0 }
 0x761   : > { %v3118_v25 = vpop.xlane.xlu1 %3117 }
 0x762   : > { %v3120_v32 = vmul.f32 0.0009765625, %v3118_v25 }
 0x764   : > { %v3121_v14 = vsub.f32 %v6879_v53, %v3120_v32  ;;  %v3122_v1 = vsub.f32 %v6887_v8, %v3120_v32  ;;  %v3123_v23 = vsub.f32 %v6897_v45, %v3120_v32  ;;  %v3124_v36 = vsub.f32 %v3105_v46, %v3120_v32 }
 0x765   : > { %v3125_v13 = vsub.f32 %v3106_v28, %v3120_v32  ;;  %v3126_v39 = vsub.f32 %v3107_v19, %v3120_v32  ;;  %v3127_v42 = vsub.f32 %v3108_v27, %v3120_v32  ;;  %v3128_v15 = vsub.f32 %v3109_v41, %v3120_v32 }
 0x766   : > { %v3129_v47 = vmul.f32 %v3121_v14, %v3121_v14  ;;  %v3130_v56 = vmul.f32 %v3122_v1, %v3122_v1  ;;  %v3131_v4 = vmul.f32 %v3123_v23, %v3123_v23  ;;  %v3132_v18 = vmul.f32 %v3124_v36, %v3124_v36 }
 0x767   : > { %v3133_v49 = vmul.f32 %v3125_v13, %v3125_v13  ;;  %v3134_v59 = vmul.f32 %v3126_v39, %v3126_v39  ;;  %v3135_v53 = vmul.f32 %v3127_v42, %v3127_v42  ;;  %v3136_v8 = vmul.f32 %v3128_v15, %v3128_v15 }
 0x768   : > { %v3137_v37 = vadd.f32 %v3130_v56, %v3129_v47  ;;  %v4094_v19 = vsel %vm606_vm5, %v4004_v26, 0.0 }
 0x76a   : > { %v3138_v48 = vadd.f32 %v3137_v37, %v3131_v4 }
 0x76c   : > { %v3139_v58 = vadd.f32 %v3138_v48, %v3132_v18 }
 0x76e   : > { %v3140_v9 = vadd.f32 %v3139_v58, %v3133_v49 }
 0x770   : > { %v3141_v50 = vadd.f32 %v3140_v9, %v3134_v59 }
 0x772   : > { %v3142_v52 = vadd.f32 %v3141_v50, %v3135_v53 }
 0x774   : > { %v3143_v45 = vadd.f32 %v3142_v52, %v3136_v8 }
 0x776   : > { %3144 = vadd.xlane.f32.xlu0 %v3143_v45 }
 0x793   : > { %v4043_v46 = vpop.f32.mrb[24].mxu1 }
 0x794   : > { %v4045_v0 = vpop.f32.mrb[25].mxu1  ;;  %v4095_v5 = vsel %vm606_vm5, %v4043_v46, 0.0 }
 0x795   : > { %v4047_v40 = vpop.f32.mrb[26].mxu1  ;;  %v4084_v21 = vpop.f32.mrb[24].mxu0  ;;  %v4096_v34 = vsel %vm606_vm5, %v4045_v0, 0.0 }
 0x796   : > { %v4048_v10 = vpop.f32.mrb[27].mxu1  ;;  %v4086_v6 = vpop.f32.mrb[25].mxu0  ;;  %v4097_v24 = vsel %vm606_vm5, %v4084_v21, 0.0 }
 0x797   : > { %v4088_v60 = vpop.f32.mrb[26].mxu0  ;;  %v4098_v55 = vsel %vm606_vm5, %v4086_v6, 0.0 }
 0x798   : > { %v4089_v61 = vpop.f32.mrb[27].mxu0 }
 0x803   : > { %v3145_v2 = vpop.xlane.xlu0 %3144 }
 0x804   : > { %v3146_v28 = vmul.f32 0.0009765625, %v3145_v2 }
 0x806   : > { %v3147_v57 = vadd.f32 1e-05, %v3146_v28 }
 0x808   : > { %4771 = vrsqrt.f32 %v3147_v57 }
 0x812   : > { %v4772_v62 = vpop.eup %4771 }
 0x813   : > { %v3149_v12 = vmul.f32 %v4772_v62, %v3121_v14  ;;  %v3150_v51 = vmul.f32 %v4772_v62, %v3122_v1  ;;  %v3151_v11 = vmul.f32 %v4772_v62, %v3123_v23  ;;  %v3152_v3 = vmul.f32 %v4772_v62, %v3124_v36 }
 0x814   : > { %v3153_v31 = vmul.f32 %v4772_v62, %v3125_v13  ;;  %v3155_v27 = vmul.f32 %v4772_v62, %v3127_v42  ;;  %v3154_v7 = vmul.f32 %v4772_v62, %v3126_v39  ;;  %v3156_v44 = vmul.f32 %v4772_v62, %v3128_v15 }
 0x815   : > { %v4099_v20 = vadd.f32 %v4091_v63, %v3149_v12  ;;  %v4100_v41 = vadd.f32 %v4092_v16, %v3150_v51  ;;  %v4101_v29 = vadd.f32 %v4093_v35, %v3151_v11  ;;  %v4102_v38 = vadd.f32 %v4094_v19, %v3152_v3 }
 0x816   : > { %v4103_v43 = vadd.f32 %v4095_v5, %v3153_v31  ;;  %v4105_v33 = vadd.f32 %v4097_v24, %v3155_v27  ;;  %v4104_v30 = vadd.f32 %v4096_v34, %v3154_v7  ;;  %v4106_v17 = vadd.f32 %v4098_v55, %v3156_v44 }
 0x817   : > { %4107 = vst [vmem:[%s332_s26] sm:$0xff] %v4099_v20  ;;  %4108 = vst [vmem:[%s332_s26 + $0x8] sm:$0xff] %v4100_v41 }
 0x818   : > { %4109 = vst [vmem:[%s332_s26 + $0x10] sm:$0xff] %v4101_v29  ;;  %4110 = vst [vmem:[%s332_s26 + $0x18] sm:$0xff] %v4102_v38 }
 0x819   : > { %4111 = vst [vmem:[%s332_s26 + $0x20] sm:$0xff] %v4103_v43  ;;  %4113 = vst [vmem:[%s332_s26 + $0x30] sm:$0xff] %v4105_v33 }
 0x81a   : > { %4112 = vst [vmem:[%s332_s26 + $0x28] sm:$0xff] %v4104_v30  ;;  %4114 = vst [vmem:[%s332_s26 + $0x38] sm:$0xff] %v4106_v17 }
 0x81b PF: > { %s19_s30 = sadd.s32 1, %s4779_s30  }
 0x81c   : > { %p16_p4 = scmp.ge.s32.totalorder %s19_s30, 4  }
 0x81e   :  { %18 = sbr.rel (!%p16_p4) target bundleno = 1 (0x1), region = 86 }

</bundles_post_ra>
